<compile_context>
chip_gen: v5e
topology: v5e:2x2
jax: 0.10.0
libtpu: 0.0.40
codegen_flags: <defaults>
</compile_context>

<pallas_src>
import functools
import math

import jax
import jax.numpy as jnp
from jax.experimental import pallas as pl
from jax.experimental.pallas import tpu as pltpu


def _round_up(x: int, m: int) -> int:
    return (x + m - 1) // m * m


def _attn_pool_kernel(x_ref, wq_ref, wkv_ref, wc_ref, kvpos_ref, qc_ref,
                      kvcls_ref, bc_ref, o_ref, *, num_heads, seq_valid):
    """One batch tile.

    x_ref      : (Bt*L_pad, E)   raw tokens (compute dtype), L-padding rows = 0
    wq_ref     : (E, E)          Wq^T * 1/sqrt(D)
    wkv_ref    : (E, 2E)         [Wk^T | Wv^T]
    wc_ref     : (E, O_pad)      Wc^T (zero-padded to O_pad)
    kvpos_ref  : (L_pad, 2E)     pos[1:T] @ Wkv + bkv (f32, zero for pad rows)
    qc_ref     : (1, E)          (pos[0] @ Wq + bq) * 1/sqrt(D)   (f32)
    kvcls_ref  : (1, 2E)         pos[0] @ Wkv + bkv               (f32)
    bc_ref     : (1, O_pad)      bc (f32, zero-padded)
    o_ref      : (Bt, O_pad)
    """
    f32 = jnp.float32
    rows, e = x_ref.shape
    l_pad = kvpos_ref.shape[0]
    bt = rows // l_pad
    h = num_heads
    d = e // h

    x = x_ref[...]                                            # (Bt*L_pad, E)

    # ---- token K/V projection: one fused (E, 2E) MXU matmul, f32 acc --------
    kv = jnp.dot(x, wkv_ref[...], preferred_element_type=f32)  # (Bt*L_pad, 2E)
    kv = kv.reshape(bt, l_pad, 2 * e) + kvpos_ref[...][None, :, :]

    # ---- class token = mean over the L valid tokens (pad rows are zero) -----
    x3 = x.reshape(bt, l_pad, e)
    mean = (jnp.sum(x3.astype(f32), axis=1) * f32(1.0 / seq_valid)).astype(x.dtype)
    # (mean + pos[0]) @ W + b  ==  mean @ W + (pos[0] @ W + b)   (consts below)
    q = jnp.dot(mean, wq_ref[...], preferred_element_type=f32) + qc_ref[...]       # (Bt, E)
    kv_c = jnp.dot(mean, wkv_ref[...], preferred_element_type=f32) + kvcls_ref[...]  # (Bt, 2E)

    # ---- all-heads attention on the VPU/XLU (no per-head loop, no MXU) ------
    k4 = kv[:, :, :e].reshape(bt, l_pad, h, d)                 # (Bt, L_pad, H, D)
    v4 = kv[:, :, e:].reshape(bt, l_pad, h, d)
    q3 = q.reshape(bt, h, d)                                   # (Bt, H, D)
    kc3 = kv_c[:, :e].reshape(bt, h, d)
    vc3 = kv_c[:, e:].reshape(bt, h, d)

    s_tok = jnp.sum(q3[:, None, :, :] * k4, axis=-1)           # (Bt, L_pad, H)
    s_cls = jnp.sum(q3 * kc3, axis=-1)                         # (Bt, H)

    tok_id = jax.lax.broadcasted_iota(jnp.int32, s_tok.shape, 1)
    s_tok = jnp.where(tok_id < seq_valid, s_tok, f32(-1e30))   # mask L padding

    # Softmax over {class token} ∪ {tokens} without concatenating the scores.
    m = jnp.maximum(jnp.max(s_tok, axis=1), s_cls)             # (Bt, H)
    p_tok = jnp.exp(s_tok - m[:, None, :])                     # (Bt, L_pad, H)
    p_cls = jnp.exp(s_cls - m)                                 # (Bt, H)
    denom = jnp.sum(p_tok, axis=1) + p_cls                     # (Bt, H)

    ctx = jnp.sum(p_tok[:, :, :, None] * v4, axis=1) + p_cls[:, :, None] * vc3
    ctx = ctx * pl.reciprocal(denom, approx=True)[:, :, None]  # (Bt, H, D)
    ctx = ctx.reshape(bt, e)                                   # (Bt, E)

    # ---- output projection on the lane-concatenated heads -------------------
    out = jnp.dot(ctx.astype(wc_ref.dtype), wc_ref[...],
                  preferred_element_type=f32) + bc_ref[...]
    o_ref[...] = out.astype(o_ref.dtype)                       # (Bt, O_pad)


def sentence_attention_pool(x, params, num_heads, *, batch_tile=None,
                            compute_dtype=None, pos_embed=True,
                            vmem_budget_mb=48):
    """x: (N, L, E) batch-first input (== PyTorch input before its permute).

    Returns (N, output_dim), i.e. the PyTorch module's `x[0]`.
    compute_dtype=jnp.bfloat16 runs the matmuls with bf16 operands
    (f32 accumulation / f32 softmax) for ~2x MXU throughput at real sizes."""
    N, L, E = x.shape
    assert E % num_heads == 0
    D = E // num_heads
    T = L + 1
    scale = 1.0 / math.sqrt(D)
    f32 = jnp.float32
    cdt = jnp.dtype(compute_dtype) if compute_dtype is not None else x.dtype

    # ---- parameter prep (plain JAX, once; tiny vs. the activations) ---------
    if pos_embed:
        pos = params["positional_embedding"][:T].astype(f32)
    else:
        pos = jnp.zeros((T, E), f32)
    wq_t = params["q_w"].astype(f32).T * scale                 # scale folded
    bq = params["q_b"].astype(f32) * scale
    wkv_t = jnp.concatenate([params["k_w"].astype(f32).T,
                             params["v_w"].astype(f32).T], axis=1)   # (E, 2E)
    bkv = jnp.concatenate([params["k_b"], params["v_b"]]).astype(f32)
    wc_t = params["c_w"].astype(f32).T                         # (E, O)
    bc = params["c_b"].astype(f32)
    O = wc_t.shape[1]

    # (x + pos) @ W + b == x @ W + (pos @ W + b): precompute the pos/bias parts.
    L_pad = _round_up(max(L, 8), 8)
    q_const = pos[0:1] @ wq_t + bq[None]                       # (1, E)
    kv_cls_const = pos[0:1] @ wkv_t + bkv[None]                # (1, 2E)
    kv_pos = jnp.zeros((L_pad, 2 * E), f32).at[:L].set(pos[1:T] @ wkv_t + bkv[None])

    # Lane-dense output: pad O to a multiple of 128 (unmasked stores).
    O_pad = _round_up(O, 128)
    wc_t = jnp.pad(wc_t, ((0, 0), (0, O_pad - O)))
    bc_p = jnp.pad(bc, (0, O_pad - O))[None]                   # (1, O_pad)

    wq_c = wq_t.astype(cdt)
    wkv_c = wkv_t.astype(cdt)
    wc_c = wc_t.astype(cdt)
    w_bytes = (wq_c.size + wkv_c.size + wc_c.size) * jnp.dtype(cdt).itemsize
    # Single-buffer the grid-invariant weights once they are large (v7x VMEM).
    big_weights = w_bytes > (4 << 20)
    w_kwargs = {"pipeline_mode": pl.Buffered(1)} if big_weights else {}

    # ---- batch tile: target ~1024 MXU rows / step within the VMEM budget ----
    in_b = jnp.dtype(cdt).itemsize
    per_b = L_pad * E * 2 * in_b + L_pad * 2 * E * 4 * 2 + 4096   # x (2-buf) + f32 kv/att
    resident = (w_bytes * (1 if big_weights else 2)
                + (L_pad * 2 * E + 3 * E + 2 * O_pad) * 4 + (2 << 20))
    if batch_tile is None:
        budget = vmem_budget_mb << 20
        bt = max(8, _round_up(pl.cdiv(1024, L_pad), 8))           # ~1024 rows/step
        bt_fit = max(8, ((budget - resident) // per_b) // 8 * 8)
        bt = min(bt, bt_fit, _round_up(N, 8))
        if N > 8 and _round_up(N, bt) // bt < 2:                   # keep >=2 steps
            bt = max(8, _round_up(pl.cdiv(N, 2), 8))               # (v7x megacore)
        batch_tile = bt
    Bt = max(8, _round_up(batch_tile, 8))
    N_pad = _round_up(N, Bt)

    # One pad pass; mean/cls/pos-add all happen inside the kernel.
    x_p = jnp.pad(x, ((0, N_pad - N), (0, L_pad - L), (0, 0))).astype(cdt)
    x2 = x_p.reshape(N_pad * L_pad, E)

    kernel = functools.partial(_attn_pool_kernel, num_heads=num_heads, seq_valid=L)

    def w_spec(shape):
        return pl.BlockSpec(shape, lambda n: (0, 0), **w_kwargs)

    vmem_limit = int(min(112 << 20, max(48 << 20, 1.25 * (resident + 2 * Bt * per_b))))

    out = pl.pallas_call(
        kernel,
        out_shape=jax.ShapeDtypeStruct((N_pad, O_pad), x.dtype),
        grid_spec=pltpu.PrefetchScalarGridSpec(
            num_scalar_prefetch=0,
            grid=(N_pad // Bt,),
            in_specs=[
                pl.BlockSpec((Bt * L_pad, E), lambda n: (n, 0)),   # raw tokens
                w_spec((E, E)),                                    # Wq^T (scaled)
                w_spec((E, 2 * E)),                                # [Wk^T | Wv^T]
                w_spec((E, O_pad)),                                # Wc^T
                w_spec((L_pad, 2 * E)),                            # pos[1:]@Wkv + bkv
                w_spec((1, E)),                                    # pos[0]@Wq + bq
                w_spec((1, 2 * E)),                                # pos[0]@Wkv + bkv
                w_spec((1, O_pad)),                                # bc
            ],
            out_specs=pl.BlockSpec((Bt, O_pad), lambda n: (n, 0)),
        ),
        compiler_params=pltpu.CompilerParams(
            dimension_semantics=("parallel",),   # 2 TensorCores on v7x
            vmem_limit_bytes=vmem_limit,
        ),
    )(x2, wq_c, wkv_c, wc_c, kv_pos, q_const, kv_cls_const, bc_p)
    return out[:N, :O]                                          # (N, O)


def init_params(key, spacial_dim, embed_dim, output_dim, dtype=jnp.float32):
    """Deterministic synthetic init mirroring the module's parameter shapes."""
    ks = jax.random.split(key, 9)

    def linear(kw, kb, fan_in, fan_out):
        bound = 1.0 / math.sqrt(fan_in)
        w = jax.random.uniform(kw, (fan_out, fan_in), dtype, -bound, bound)
        b = jax.random.uniform(kb, (fan_out,), dtype, -bound, bound)
        return w, b

    q_w, q_b = linear(ks[1], ks[2], embed_dim, embed_dim)
    k_w, k_b = linear(ks[3], ks[4], embed_dim, embed_dim)
    v_w, v_b = linear(ks[5], ks[6], embed_dim, embed_dim)
    c_w, c_b = linear(ks[7], ks[8], embed_dim, output_dim)
    pos = (jax.random.normal(ks[0], (spacial_dim + 1, embed_dim), dtype)
           / math.sqrt(embed_dim))
    return dict(positional_embedding=pos,
                q_w=q_w, q_b=q_b, k_w=k_w, k_b=k_b,
                v_w=v_w, v_b=v_b, c_w=c_w, c_b=c_b)


def ref_forward(x, params, num_heads):
    """Pure-JAX reference of the PyTorch forward (returns x[0])."""
    N, L, E = x.shape
    T = L + 1
    D = E // num_heads
    mean = jnp.mean(x, axis=1, keepdims=True)
    seq = jnp.concatenate([mean, x], axis=1)
    seq = seq + params["positional_embedding"][None, :T, :]
    q = seq @ params["q_w"].T + params["q_b"]
    k = seq @ params["k_w"].T + params["k_b"]
    v = seq @ params["v_w"].T + params["v_b"]

    def split(t):
        return t.reshape(N, T, num_heads, D).transpose(0, 2, 1, 3)

    qh, kh, vh = split(q), split(k), split(v)
    s = jnp.einsum('nhtd,nhsd->nhts', qh, kh) / math.sqrt(D)
    p = jax.nn.softmax(s, axis=-1)
    o = jnp.einsum('nhts,nhsd->nhtd', p, vh)
    o = o.transpose(0, 2, 1, 3).reshape(N, T, E)
    out = o @ params["c_w"].T + params["c_b"]
    return out[:, 0, :]


if __name__ == "__main__":
    # batch, seq(spacial_dim), embed, heads, out  (small, consistent shapes)
    N, L, E, H, O = 16, 16, 32, 4, 32
    key = jax.random.PRNGKey(0)
    kx, kp = jax.random.split(key)
    x = jax.random.normal(kx, (N, L, E), jnp.float32)
    params = init_params(kp, spacial_dim=L, embed_dim=E, output_dim=O)

    ref = ref_forward(x, params, H)

    # f32 path (heuristic picks Bt=8 -> 2 grid steps, exercising the tiling).
    out = jax.block_until_ready(sentence_attention_pool(x, params, H))
    assert out.shape == (N, O), out.shape
    err = float(jnp.max(jnp.abs(out - ref)))
    assert jnp.allclose(out, ref, rtol=1e-2, atol=1e-2), err

    # bf16-operand path (f32 accumulation / f32 softmax), looser tolerance.
    out_bf16 = jax.block_until_ready(
        sentence_attention_pool(x, params, H, compute_dtype=jnp.bfloat16))
    err_bf16 = float(jnp.max(jnp.abs(out_bf16 - ref)))
    assert jnp.allclose(out_bf16, ref, rtol=1e-1, atol=1e-1), err_bf16

    print("KERNEL_OK")
</pallas_src>

<mosaic_0001>
module attributes {stable_mosaic.version = 11 : i64} {
  func.func @_attn_pool_kernel(%arg0: i32, %arg1: memref<128x32xf32, #tpu.memory_space<vmem>>, %arg2: memref<32x32xf32, #tpu.memory_space<vmem>>, %arg3: memref<32x64xf32, #tpu.memory_space<vmem>>, %arg4: memref<32x128xf32, #tpu.memory_space<vmem>>, %arg5: memref<16x64xf32, #tpu.memory_space<vmem>>, %arg6: memref<1x32xf32, #tpu.memory_space<vmem>>, %arg7: memref<1x64xf32, #tpu.memory_space<vmem>>, %arg8: memref<1x128xf32, #tpu.memory_space<vmem>>, %arg9: memref<8x128xf32, #tpu.memory_space<vmem>>) attributes {dimension_semantics = [#tpu.dimension_semantics<parallel>], iteration_bounds = array<i64: 2>, scalar_prefetch = 0 : i64, scratch_operands = 0 : i64, tpu.core_type = #tpu.core_type<tc>, window_params = [{transform_indices = @transform_0, window_bounds = array<i64: 128, 32>}, {pipeline_mode = #tpu.pipeline_mode<synchronous>, transform_indices = @transform_1, window_bounds = array<i64: 32, 32>}, {pipeline_mode = #tpu.pipeline_mode<synchronous>, transform_indices = @transform_2, window_bounds = array<i64: 32, 64>}, {pipeline_mode = #tpu.pipeline_mode<synchronous>, transform_indices = @transform_3, window_bounds = array<i64: 32, 128>}, {pipeline_mode = #tpu.pipeline_mode<synchronous>, transform_indices = @transform_4, window_bounds = array<i64: 16, 64>}, {pipeline_mode = #tpu.pipeline_mode<synchronous>, transform_indices = @transform_5, window_bounds = array<i64: 1, 32>}, {pipeline_mode = #tpu.pipeline_mode<synchronous>, transform_indices = @transform_6, window_bounds = array<i64: 1, 64>}, {pipeline_mode = #tpu.pipeline_mode<synchronous>, transform_indices = @transform_7, window_bounds = array<i64: 1, 128>}, {transform_indices = @transform_8, window_bounds = array<i64: 8, 128>}]} {
    %c0 = arith.constant 0 : index
    %c0_0 = arith.constant 0 : index
    %0 = vector.load %arg1[%c0, %c0_0] : memref<128x32xf32, #tpu.memory_space<vmem>>, vector<128x32xf32>
    %c0_1 = arith.constant 0 : index
    %c0_2 = arith.constant 0 : index
    %1 = vector.load %arg3[%c0_1, %c0_2] : memref<32x64xf32, #tpu.memory_space<vmem>>, vector<32x64xf32>
    %cst = arith.constant dense<0.000000e+00> : vector<128x64xf32>
    %2 = tpu.matmul %0, %1, %cst {dimension_numbers = #tpu.dot_dimension_numbers<[1], [0], [0], [1], [0, 0, 1, 1], [], []>} : vector<128x32xf32>, vector<32x64xf32>, vector<128x64xf32> -> vector<128x64xf32>
    %3 = vector.shape_cast %2 : vector<128x64xf32> to vector<8x16x64xf32>
    %c0_3 = arith.constant 0 : index
    %c0_4 = arith.constant 0 : index
    %4 = vector.load %arg5[%c0_3, %c0_4] : memref<16x64xf32, #tpu.memory_space<vmem>>, vector<16x64xf32>
    %5 = vector.shape_cast %4 : vector<16x64xf32> to vector<1x16x64xf32>
    %6 = vector.broadcast %5 : vector<1x16x64xf32> to vector<8x16x64xf32>
    %7 = arith.addf %3, %6 : vector<8x16x64xf32>
    %8 = vector.shape_cast %0 : vector<128x32xf32> to vector<8x16x32xf32>
    %cst_5 = arith.constant dense<0.000000e+00> : vector<8x32xf32>
    %9 = vector.multi_reduction <add>, %8, %cst_5 [1] : vector<8x16x32xf32> to vector<8x32xf32>
    %cst_6 = arith.constant 6.250000e-02 : f32
    %10 = vector.broadcast %cst_6 : f32 to vector<8x32xf32>
    %11 = arith.mulf %9, %10 : vector<8x32xf32>
    %c0_7 = arith.constant 0 : index
    %c0_8 = arith.constant 0 : index
    %12 = vector.load %arg2[%c0_7, %c0_8] : memref<32x32xf32, #tpu.memory_space<vmem>>, vector<32x32xf32>
    %cst_9 = arith.constant dense<0.000000e+00> : vector<8x32xf32>
    %13 = tpu.matmul %11, %12, %cst_9 {dimension_numbers = #tpu.dot_dimension_numbers<[1], [0], [0], [1], [0, 0, 1, 1], [], []>} : vector<8x32xf32>, vector<32x32xf32>, vector<8x32xf32> -> vector<8x32xf32>
    %c0_10 = arith.constant 0 : index
    %c0_11 = arith.constant 0 : index
    %14 = vector.load %arg6[%c0_10, %c0_11] : memref<1x32xf32, #tpu.memory_space<vmem>>, vector<1x32xf32>
    %15 = vector.broadcast %14 : vector<1x32xf32> to vector<8x32xf32>
    %16 = arith.addf %13, %15 : vector<8x32xf32>
    %c0_12 = arith.constant 0 : index
    %c0_13 = arith.constant 0 : index
    %17 = vector.load %arg3[%c0_12, %c0_13] : memref<32x64xf32, #tpu.memory_space<vmem>>, vector<32x64xf32>
    %cst_14 = arith.constant dense<0.000000e+00> : vector<8x64xf32>
    %18 = tpu.matmul %11, %17, %cst_14 {dimension_numbers = #tpu.dot_dimension_numbers<[1], [0], [0], [1], [0, 0, 1, 1], [], []>} : vector<8x32xf32>, vector<32x64xf32>, vector<8x64xf32> -> vector<8x64xf32>
    %c0_15 = arith.constant 0 : index
    %c0_16 = arith.constant 0 : index
    %19 = vector.load %arg7[%c0_15, %c0_16] : memref<1x64xf32, #tpu.memory_space<vmem>>, vector<1x64xf32>
    %20 = vector.broadcast %19 : vector<1x64xf32> to vector<8x64xf32>
    %21 = arith.addf %18, %20 : vector<8x64xf32>
    %22 = vector.extract_strided_slice %7 {offsets = [0, 0, 0], sizes = [8, 16, 32], strides = [1, 1, 1]} : vector<8x16x64xf32> to vector<8x16x32xf32>
    %23 = vector.shape_cast %22 : vector<8x16x32xf32> to vector<8x16x4x8xf32>
    %24 = vector.extract_strided_slice %7 {offsets = [0, 0, 32], sizes = [8, 16, 32], strides = [1, 1, 1]} : vector<8x16x64xf32> to vector<8x16x32xf32>
    %25 = vector.shape_cast %24 : vector<8x16x32xf32> to vector<8x16x4x8xf32>
    %26 = vector.shape_cast %16 : vector<8x32xf32> to vector<8x4x8xf32>
    %27 = vector.extract_strided_slice %21 {offsets = [0, 0], sizes = [8, 32], strides = [1, 1]} : vector<8x64xf32> to vector<8x32xf32>
    %28 = vector.shape_cast %27 : vector<8x32xf32> to vector<8x4x8xf32>
    %29 = vector.extract_strided_slice %21 {offsets = [0, 32], sizes = [8, 32], strides = [1, 1]} : vector<8x64xf32> to vector<8x32xf32>
    %30 = vector.shape_cast %29 : vector<8x32xf32> to vector<8x4x8xf32>
    %31 = vector.shape_cast %26 : vector<8x4x8xf32> to vector<8x1x4x8xf32>
    %32 = vector.broadcast %31 : vector<8x1x4x8xf32> to vector<8x16x4x8xf32>
    %33 = arith.mulf %32, %23 : vector<8x16x4x8xf32>
    %cst_17 = arith.constant dense<0.000000e+00> : vector<8x16x4xf32>
    %34 = vector.multi_reduction <add>, %33, %cst_17 [3] : vector<8x16x4x8xf32> to vector<8x16x4xf32>
    %35 = arith.mulf %26, %28 : vector<8x4x8xf32>
    %cst_18 = arith.constant dense<0.000000e+00> : vector<8x4xf32>
    %36 = vector.multi_reduction <add>, %35, %cst_18 [2] : vector<8x4x8xf32> to vector<8x4xf32>
    %37 = tpu.iota {dimensions = array<i32: 1>} : vector<8x16x4xi32>
    %c16_i32 = arith.constant 16 : i32
    %38 = vector.broadcast %c16_i32 : i32 to vector<8x16x4xi32>
    %39 = arith.cmpi slt, %37, %38 : vector<8x16x4xi32>
    %cst_19 = arith.constant -1.000000e+30 : f32
    %40 = vector.broadcast %cst_19 : f32 to vector<8x16x4xf32>
    %41 = arith.select %39, %34, %40 : vector<8x16x4xi1>, vector<8x16x4xf32>
    %cst_20 = arith.constant dense<0xFF800000> : vector<8x4xf32>
    %42 = vector.multi_reduction <maximumf>, %41, %cst_20 [1] : vector<8x16x4xf32> to vector<8x4xf32>
    %43 = arith.maximumf %42, %36 : vector<8x4xf32>
    %44 = vector.shape_cast %43 : vector<8x4xf32> to vector<8x1x4xf32>
    %45 = vector.broadcast %44 : vector<8x1x4xf32> to vector<8x16x4xf32>
    %46 = arith.subf %41, %45 : vector<8x16x4xf32>
    %47 = math.exp %46 : vector<8x16x4xf32>
    %48 = arith.subf %36, %43 : vector<8x4xf32>
    %49 = math.exp %48 : vector<8x4xf32>
    %cst_21 = arith.constant dense<0.000000e+00> : vector<8x4xf32>
    %50 = vector.multi_reduction <add>, %47, %cst_21 [1] : vector<8x16x4xf32> to vector<8x4xf32>
    %51 = arith.addf %50, %49 : vector<8x4xf32>
    %52 = vector.shape_cast %47 : vector<8x16x4xf32> to vector<8x16x4x1xf32>
    %53 = vector.broadcast %52 : vector<8x16x4x1xf32> to vector<8x16x4x8xf32>
    %54 = arith.mulf %53, %25 : vector<8x16x4x8xf32>
    %cst_22 = arith.constant dense<0.000000e+00> : vector<8x4x8xf32>
    %55 = vector.multi_reduction <add>, %54, %cst_22 [1] : vector<8x16x4x8xf32> to vector<8x4x8xf32>
    %56 = vector.shape_cast %49 : vector<8x4xf32> to vector<8x4x1xf32>
    %57 = vector.broadcast %56 : vector<8x4x1xf32> to vector<8x4x8xf32>
    %58 = arith.mulf %57, %30 : vector<8x4x8xf32>
    %59 = arith.addf %55, %58 : vector<8x4x8xf32>
    %60 = tpu.reciprocal %51 {approx = true} : vector<8x4xf32> -> vector<8x4xf32>
    %61 = vector.shape_cast %60 : vector<8x4xf32> to vector<8x4x1xf32>
    %62 = vector.broadcast %61 : vector<8x4x1xf32> to vector<8x4x8xf32>
    %63 = arith.mulf %59, %62 : vector<8x4x8xf32>
    %64 = vector.shape_cast %63 : vector<8x4x8xf32> to vector<8x32xf32>
    %c0_23 = arith.constant 0 : index
    %c0_24 = arith.constant 0 : index
    %65 = vector.load %arg4[%c0_23, %c0_24] : memref<32x128xf32, #tpu.memory_space<vmem>>, vector<32x128xf32>
    %cst_25 = arith.constant dense<0.000000e+00> : vector<8x128xf32>
    %66 = tpu.matmul %64, %65, %cst_25 {dimension_numbers = #tpu.dot_dimension_numbers<[1], [0], [0], [1], [0, 0, 1, 1], [], []>} : vector<8x32xf32>, vector<32x128xf32>, vector<8x128xf32> -> vector<8x128xf32>
    %c0_26 = arith.constant 0 : index
    %c0_27 = arith.constant 0 : index
    %67 = vector.load %arg8[%c0_26, %c0_27] : memref<1x128xf32, #tpu.memory_space<vmem>>, vector<1x128xf32>
    %68 = vector.broadcast %67 : vector<1x128xf32> to vector<8x128xf32>
    %69 = arith.addf %66, %68 : vector<8x128xf32>
    %c0_28 = arith.constant 0 : index
    %c0_29 = arith.constant 0 : index
    %70 = vector.load %arg9[%c0_28, %c0_29] : memref<8x128xf32, #tpu.memory_space<vmem>>, vector<8x128xf32>
    tpu.vector_store %arg9[%c0_28, %c0_29], %69 {strides = array<i32>} : memref<8x128xf32, #tpu.memory_space<vmem>>, vector<8x128xf32>,
    return
  }
  func.func @transform_0(%arg0: i32) -> (i32, i32) {
    %c0_i32 = arith.constant 0 : i32
    %c0_i32_0 = arith.constant 0 : i32
    return %arg0, %c0_i32 : i32, i32
  }
  func.func @transform_1(%arg0: i32) -> (i32, i32) {
    %c0_i32 = arith.constant 0 : i32
    %c0_i32_0 = arith.constant 0 : i32
    %c0_i32_1 = arith.constant 0 : i32
    return %c0_i32, %c0_i32_0 : i32, i32
  }
  func.func @transform_2(%arg0: i32) -> (i32, i32) {
    %c0_i32 = arith.constant 0 : i32
    %c0_i32_0 = arith.constant 0 : i32
    %c0_i32_1 = arith.constant 0 : i32
    return %c0_i32, %c0_i32_0 : i32, i32
  }
  func.func @transform_3(%arg0: i32) -> (i32, i32) {
    %c0_i32 = arith.constant 0 : i32
    %c0_i32_0 = arith.constant 0 : i32
    %c0_i32_1 = arith.constant 0 : i32
    return %c0_i32, %c0_i32_0 : i32, i32
  }
  func.func @transform_4(%arg0: i32) -> (i32, i32) {
    %c0_i32 = arith.constant 0 : i32
    %c0_i32_0 = arith.constant 0 : i32
    %c0_i32_1 = arith.constant 0 : i32
    return %c0_i32, %c0_i32_0 : i32, i32
  }
  func.func @transform_5(%arg0: i32) -> (i32, i32) {
    %c0_i32 = arith.constant 0 : i32
    %c0_i32_0 = arith.constant 0 : i32
    %c0_i32_1 = arith.constant 0 : i32
    return %c0_i32, %c0_i32_0 : i32, i32
  }
  func.func @transform_6(%arg0: i32) -> (i32, i32) {
    %c0_i32 = arith.constant 0 : i32
    %c0_i32_0 = arith.constant 0 : i32
    %c0_i32_1 = arith.constant 0 : i32
    return %c0_i32, %c0_i32_0 : i32, i32
  }
  func.func @transform_7(%arg0: i32) -> (i32, i32) {
    %c0_i32 = arith.constant 0 : i32
    %c0_i32_0 = arith.constant 0 : i32
    %c0_i32_1 = arith.constant 0 : i32
    return %c0_i32, %c0_i32_0 : i32, i32
  }
  func.func @transform_8(%arg0: i32) -> (i32, i32) {
    %c0_i32 = arith.constant 0 : i32
    %c0_i32_0 = arith.constant 0 : i32
    return %arg0, %c0_i32 : i32, i32
  }
}

</mosaic_0001>

<bundles_post_ra>
// kernel: tpu_custom_call.1
= control target key start
LH: loop header
LB: loop body
LE: loop exit
PB: predicated region body
PF: predicated region fallthrough
CT: control target
= control target key end

     0   :  { %13 = vsyncpa [#allocation3], 0  ;;  %s10202_s0 = inlined_call_operand.vmem [shape: f32[256,32], index: 0, kind: input, shape index: {}]   ;;  %s10203_s1 = inlined_call_operand.vmem [shape: f32[32,32], index: 1, kind: input, shape index: {}]   ;;  %s10204_s2 = inlined_call_operand.vmem [shape: f32[32,64], index: 2, kind: input, shape index: {}]   ;;  %s10205_s3 = inlined_call_operand.vmem [shape: f32[32,128], index: 3, kind: input, shape index: {}]   ;;  %s10206_s4 = inlined_call_operand.vmem [shape: f32[16,64], index: 4, kind: input, shape index: {}]   ;;  %s10207_s5 = inlined_call_operand.vmem [shape: f32[1,32], index: 5, kind: input, shape index: {}]   ;;  %s10208_s6 = inlined_call_operand.vmem [shape: f32[1,64], index: 6, kind: input, shape index: {}]   ;;  %s10209_s7 = inlined_call_operand.vmem [shape: f32[1,128], index: 7, kind: input, shape index: {}]   ;;  %s10210_s8 = inlined_call_operand.hbm [shape: f32[16,128], index: 8, kind: output, shape index: {}]  }
   0x1   :  { %15 = vsyncpa [#allocation3 + $0x1], 0  ;;  %s6131_s27 = smov 0   ;;  %s6133_s28 = smov 0  }
   0x2   :  { %s6135_s29 = smov 0   ;;  %s6137_s30 = smov 0  }
   0x3 LB: > { %s6152_s9 = sadd.s32 4294967295, %s6074_s30   ;;  %s5845_s10 = sadd.s32 4294967294, %s6074_s30   ;;  %s6074_s30 = sphi %s6137_s30, %s10702_s30   ;;  %s6070_s29 = sphi %s6135_s29, %s10701_s29   ;;  %s6066_s28 = sphi %s6133_s28, %s10700_s28   ;;  %s6062_s27 = sphi %s6131_s27, %s10699_s27  }
   0x4   : > { %s6156_s11 = sadd.s32 1, %s6074_s30   ;;  %s201_s12 = sadd.s32 1, %s6070_s29 }
   0x5   : > { %s198_s13 = ssub.s32 %s6074_s30, %s6156_s11  ;;  %p211_p0 = scmp.ne.s32.totalorder %s6070_s29, %s6066_s28 }
   0x6   : > { %p199_p1 = scmp.eq.s32.totalorder %s198_s13, 0  ;;  %p212_p2 = scmp.eq.s32.totalorder %s6152_s9, 1 }
   0x7   : > { %p217_p3 = scmp.ne.s32.totalorder %s6066_s28, %s6062_s27  ;;  %p218_p4 = scmp.eq.s32.totalorder %s5845_s10, 1 }
   0x8   : > { %s6167_s14 = scalar_select %p199_p1, %s6070_s29, %s201_s12  }
   0x9   : > { %p6169_p5 = por %p212_p2, %p211_p0  ;;  %p6173_p6 = por %p218_p4, %p217_p3 }
   0xa   : > { %p5848_p7 = scmp.ge.s32.totalorder %s6074_s30, 1  ;;  %p266_p8 = scmp.lt.s32.totalorder %s6074_s30, 3 }
   0xc   : > { %p267_p9 = pnand %p5848_p7, %p266_p8 }
   0xe   : > { %270 = sbr.rel (%p267_p9) target bundleno = 1991 (0x7c7), region = 52 }
  0x13   : > { %v325_v0 = vld [vmem:[%s10204_s2 + $0x18] sm:$0xff]  ;;  %v324_v1 = vld [vmem:[%s10204_s2 + $0x10] sm:$0xff]  ;;  %s5850_s21 = sshll.u32 %s6152_s9, 4  ;;  %v323_v2 = vld [vmem:[%s10204_s2 + $0x8] sm:$0xff]  ;;  %vm326_vm0 = vcmask 261120   ;;  %vm554_vm1 = vcmask 1041409  }
  0x14   : > { %387 = vmatpush.msra.mxu0 %v325_v0  ;;  %5875 = vmatpush.msra.mxu1 %v325_v0  ;;  %p301_p10 = scmp.lt.s32.totalorder %s5850_s21, 31  ;;  %v322_v3 = vld [vmem:[%s10204_s2] sm:$0xff]  ;;  %v6272_v60 = vld [vmem:[%s10206_s4 + $0x8] sm:$0xff]  ;;  %s6077_s22 = smov 112   ;;  %vm556_vm2 = vcmask 1042434   ;;  %vm558_vm3 = vcmask 1043459  }
  0x15   : > { %5877 = vmatpush.msra.mxu3 %v325_v0  ;;  %5876 = vmatpush.msra.mxu2 %v325_v0  ;;  %v6267_v59 = vld [vmem:[%s10206_s4] sm:$0xff]  ;;  %s6078_s23 = smov 104   ;;  %s6079_s24 = smov 96   ;;  %vm560_vm4 = vcmask 1044484   ;;  %vm562_vm5 = vcmask 1045509   ;;  %vm564_vm6 = vcmask 1046534  }
  0x16   : > { %388 = vmatpush.msra.mxu0 %v324_v1  ;;  %5878 = vmatpush.msra.mxu1 %v324_v1  ;;  %s10704_s21 = smov (!%p301_p10, %s5850_s21), 31  ;;  %vm566_vm7 = vcmask 1047559   ;;  %vm775_vm8 = vcmask 1047556   ;;  %vm3087_vm9 = vcmask 60416   ;;  %vm3911_vm10 = vcmask 31744  }
  0x17   : > { %5880 = vmatpush.msra.mxu3 %v324_v1  ;;  %5879 = vmatpush.msra.mxu2 %v324_v1  ;;  %s5851_s26 = sshll.u32 %s10704_s21, 3  ;;  %s6076_s21 = smov 120   ;;  %vm5732_vm11 = vcmask 64512   ;;  %vm5734_vm12 = vcmask 130048   ;;  %vm5736_vm13 = vcmask 195584  }
  0x18   : > { %389 = vmatpush.msra.mxu0 %v323_v2  ;;  %5881 = vmatpush.msra.mxu1 %v323_v2  ;;  %s6195_s13 = scalar_lea.vmem %s10202_s0, %s5851_s26  ;;  %s297_s26 = sand.u32 1, %s6066_s28  }
  0x19   : > { %5883 = vmatpush.msra.mxu3 %v323_v2  ;;  %5882 = vmatpush.msra.mxu2 %v323_v2  ;;  %v306_v4 = vld [vmem:[%s6195_s13] sm:$0xff]  ;;  %v6199_v5 = vld [vmem:[%s6195_s13 + $0x28] sm:$0xff]  ;;  %v312_v10 = vld [vmem:[%s6195_s13 + $0x30] sm:$0xff]  ;;  %s5849_s10 = sshll.u32 %s297_s26, 3  ;;  %s5771_s20 = scalar_lea.sflag [#allocation3], %s297_s26 }
  0x1a   : > { %390 = vmatpush.msra.mxu0 %v322_v3  ;;  %5884 = vmatpush.msra.mxu1 %v322_v3  ;;  %v319_v6 = vld [vmem:[%s6195_s13 + $0x68] sm:$0xff]  ;;  %v458_v7 = vsel %vm326_vm0, %v306_v4, 0.0  ;;  %v485_v12 = vsel %vm326_vm0, %v312_v10, 0.0  ;;  %v316_v13 = vld [vmem:[%s6195_s13 + $0x50] sm:$0xff]  ;;  %v313_v18 = vld [vmem:[%s6195_s13 + $0x38] sm:$0xff]  ;;  %v477_v54 = vsel %vm326_vm0, %v6199_v5, 0.0 }
  0x1b   : > { %5852 = vmatmul.msk.f32.vlgmr.msra.gmra.mxu0 %vm326_vm0, %v306_v4  ;;  %5857 = vmatmul.msk.f32.vlgmr.msra.gmra.mxu1 %vm326_vm0, %v6199_v5  ;;  %v315_v8 = vld [vmem:[%s6195_s13 + $0x48] sm:$0xff]  ;;  %v320_v14 = vld [vmem:[%s6195_s13 + $0x70] sm:$0xff]  ;;  %v503_v16 = vsel %vm326_vm0, %v316_v13, 0.0  ;;  %v317_v19 = vld [vmem:[%s6195_s13 + $0x58] sm:$0xff]  ;;  %v486_v21 = vsel %vm326_vm0, %v313_v18, 0.0  ;;  %v513_v44 = vsel %vm326_vm0, %v319_v6, 0.0 }
  0x1c   : > { %v307_v9 = vld [vmem:[%s6195_s13 + $0x8] sm:$0xff]  ;;  %5886 = vmatpush.msra.mxu3 %v322_v3  ;;  %5885 = vmatpush.msra.mxu2 %v322_v3  ;;  %v521_v17 = vsel %vm326_vm0, %v320_v14, 0.0  ;;  %v321_v20 = vld [vmem:[%s6195_s13 + $0x78] sm:$0xff]  ;;  %v504_v22 = vsel %vm326_vm0, %v317_v19, 0.0  ;;  %v495_v24 = vsel %vm326_vm0, %v315_v8, 0.0  ;;  %v6224_v25 = vadd.f32 %v486_v21, %v485_v12  ;;  %v314_v28 = vld [vmem:[%s6195_s13 + $0x40] sm:$0xff] }
  0x1d   : > { %v459_v11 = vsel %vm326_vm0, %v307_v9, 0.0  ;;  %5865 = vmatmul.msk.f32.vlgmr.msra.gmra.mxu3 %vm326_vm0, %v319_v6  ;;  %5861 = vmatmul.msk.f32.vlgmr.msra.gmra.mxu2 %vm326_vm0, %v315_v8  ;;  %v522_v23 = vsel %vm326_vm0, %v321_v20, 0.0  ;;  %v6226_v26 = vadd.f32 %v504_v22, %v503_v16  ;;  %v494_v29 = vsel %vm326_vm0, %v314_v28, 0.0  ;;  %v308_v31 = vld [vmem:[%s6195_s13 + $0x10] sm:$0xff]  ;;  %v309_v36 = vld [vmem:[%s6195_s13 + $0x18] sm:$0xff]  ;;  %v318_v47 = vld [vmem:[%s6195_s13 + $0x60] sm:$0xff] }
  0x1e   : > { %v460_v15 = vadd.f32 %v459_v11, %v458_v7  ;;  %606 = vmatpush.msrb.mxu2 %v325_v0  ;;  %v6228_v27 = vadd.f32 %v522_v23, %v521_v17  ;;  %v6232_v30 = vadd.f32 %v495_v24, %v494_v29  ;;  %v467_v35 = vsel %vm326_vm0, %v308_v31, 0.0  ;;  %v310_v56 = vld [vmem:[%s6195_s13 + $0x20] sm:$0xff]  ;;  %s299_s17 = scalar_lea.vmem [#allocation2], %s5849_s10 }
  0x1f   : > { %v468_v37 = vsel %vm326_vm0, %v309_v36, 0.0  ;;  %v512_v48 = vsel %vm326_vm0, %v318_v47, 0.0  ;;  %v476_v57 = vsel %vm326_vm0, %v310_v56, 0.0  ;;  %v488_v24 = vrot.slane %v6224_v25, 4  ;;  %s5783_s18 = sshll.u32 %s299_s17, 4  ;;  %s5784_s18 = int_to_ptr.vmem [resolvable:$true] %s5783_s18 }
  0x20   : > { %607 = vmatpush.msrb.mxu2 %v324_v1  ;;  %v461_v32 = vrot.slane %v460_v15, 4  ;;  %v469_v39 = vadd.f32 %v468_v37, %v467_v35  ;;  %v6252_v50 = vadd.f32 %v513_v44, %v512_v48  ;;  %v6262_v58 = vadd.f32 %v477_v54, %v476_v57 }
  0x21   : > { %v497_v29 = vrot.slane %v6232_v30, 4 }
  0x22   : > { %608 = vmatpush.msrb.mxu2 %v323_v2  ;;  %v462_v33 = vadd.f32 %v461_v32, %v460_v15  ;;  %v470_v40 = vrot.slane %v469_v39, 4  ;;  %v479_v23 = vrot.slane %v6262_v58, 4  ;;  %v506_v32 = vrot.slane %v6226_v26, 4 }
  0x23   : > { %5853 = vmatmul.msk.f32.gmra.mxu0 %vm326_vm0, %v307_v9  ;;  %5858 = vmatmul.msk.f32.gmra.mxu1 %vm326_vm0, %v312_v10  ;;  %v498_v35 = vadd.f32 %v497_v29, %v6232_v30 }
  0x24   : > { %609 = vmatpush.msrb.mxu2 %v322_v3  ;;  %v463_v34 = vrot.slane %v462_v33, 2  ;;  %v471_v42 = vadd.f32 %v470_v40, %v469_v39  ;;  %v507_v37 = vadd.f32 %v506_v32, %v6226_v26 }
  0x25   : > { %5862 = vmatmul.msk.f32.gmra.mxu2 %vm326_vm0, %v316_v13  ;;  %5866 = vmatmul.msk.f32.gmra.mxu3 %vm326_vm0, %v320_v14 }
  0x26   : > { %v464_v38 = vadd.f32 %v463_v34, %v462_v33  ;;  %v472_v43 = vrot.slane %v471_v42, 2  ;;  %v515_v33 = vrot.slane %v6252_v50, 4  ;;  %v489_v34 = vadd.f32 %v488_v24, %v6224_v25  ;;  %v541_v25 = vld [vmem:[%s10203_s1 + $0x18] sm:$0xff] }
  0x27   : > { %582 = vmatpush.msrb.mxu1 %v541_v25 }
  0x28   : > { %v465_v41 = vrot.slane %v464_v38, 1  ;;  %v473_v46 = vadd.f32 %v472_v43, %v471_v42  ;;  %v516_v39 = vadd.f32 %v515_v33, %v6252_v50  ;;  %v490_v30 = vrot.slane %v489_v34, 2 }
  0x29   : > { %v499_v42 = vrot.slane %v498_v35, 2 }
  0x2a   : > { %v466_v45 = vadd.f32 %v465_v41, %v464_v38  ;;  %v474_v49 = vrot.slane %v473_v46, 1  ;;  %v524_v38 = vrot.slane %v6228_v27, 4  ;;  %v517_v48 = vrot.slane %v516_v39, 2 }
  0x2b   : > { %5854 = vmatmul.msk.f32.gmra.mxu0 %vm326_vm0, %v308_v31  ;;  %5859 = vmatmul.msk.f32.gmra.mxu1 %vm326_vm0, %v313_v18  ;;  %v480_v31 = vadd.f32 %v479_v23, %v6262_v58  ;;  %v500_v50 = vadd.f32 %v499_v42, %v498_v35 }
  0x2c   : > { %v530_v51 = vmul.f32 0.0625, %v466_v45  ;;  %v475_v52 = vadd.f32 %v474_v49, %v473_v46  ;;  %v508_v45 = vrot.slane %v507_v37, 2  ;;  %v525_v46 = vadd.f32 %v524_v38, %v6228_v27 }
  0x2d   : > { %5863 = vmatmul.msk.f32.gmra.mxu2 %vm326_vm0, %v317_v19  ;;  %5867 = vmatmul.msk.f32.gmra.mxu3 %vm326_vm0, %v321_v20  ;;  %v491_v49 = vadd.f32 %v490_v30, %v489_v34  ;;  %v518_v27 = vadd.f32 %v517_v48, %v516_v39 }
  0x2e   : > { %v531_v53 = vmul.f32 0.0625, %v475_v52  ;;  %v540_v52 = vld [vmem:[%s10203_s1 + $0x10] sm:$0xff]  ;;  %v526_v54 = vrot.slane %v525_v46, 2 }
  0x2f   : > { %583 = vmatpush.msrb.mxu1 %v540_v52  ;;  %v492_v57 = vrot.slane %v491_v49, 1 }
  0x30   : > { %v6257_v55 = vsel %vm554_vm1, %v531_v53, %v530_v51  ;;  %v509_v53 = vadd.f32 %v508_v45, %v507_v37  ;;  %v538_v37 = vld [vmem:[%s10203_s1] sm:$0xff] }
  0x33   : > { %5860 = vmatmul.msk.f32.gmra.mxu1 %vm326_vm0, %v314_v28  ;;  %5855 = vmatmul.msk.f32.gmra.mxu0 %vm326_vm0, %v309_v36  ;;  %v481_v36 = vrot.slane %v480_v31, 2 }
  0x35   : > { %5864 = vmatmul.msk.f32.gmra.mxu2 %vm326_vm0, %v318_v47  ;;  %v482_v43 = vadd.f32 %v481_v36, %v480_v31 }
  0x37   : > { %v483_v51 = vrot.slane %v482_v43, 1 }
  0x3b   : > { %5856 = vmatmul.msk.f32.gmra.mxu0 %vm326_vm0, %v310_v56 }
  0x98   : > { %v392_v61 = vpop.f32.mrf.mxu0  ;;  %v407_v62 = vpop.f32.mrf.mxu1 }
  0x99   : > { %v6275_v63 = vadd.f32 %v6267_v59, %v392_v61  ;;  %v6278_v0 = vadd.f32 %v6272_v60, %v407_v62  ;;  %v501_v62 = vrot.slane %v500_v50, 1 }
  0x9b   : > { %640 = vrot.lane.b32.xlu2 %v6278_v0, %s6076_s21  ;;  %678 = vrot.lane.b32.xlu1 %v6275_v63, %s6077_s22 }
  0x9c   : > { %630 = vrot.lane.b32.xlu0 %v6275_v63, %s6076_s21 }
  0xa0   : > { %v431_v1 = vpop.f32.mrf.mxu3  ;;  %v419_v3 = vpop.f32.mrf.mxu2 }
  0xa1   : > { %v6293_v2 = vadd.f32 %v6272_v60, %v431_v1  ;;  %v6302_v4 = vadd.f32 %v6272_v60, %v419_v3  ;;  %v395_v5 = vpop.f32.mrf.mxu0  ;;  %v410_v6 = vpop.f32.mrf.mxu1  ;;  %v484_v1 = vadd.f32 %v483_v51, %v482_v43 }
  0xa2   : > { %v6317_v7 = vadd.f32 %v6272_v60, %v395_v5  ;;  %v6320_v8 = vadd.f32 %v6267_v59, %v410_v6  ;;  %v510_v5 = vrot.slane %v509_v53, 1  ;;  %v527_v6 = vadd.f32 %v526_v54, %v525_v46 }
  0xa3   : > { %726 = vrot.lane.b32.xlu2 %v6275_v63, %s6078_s23  ;;  %736 = vrot.lane.b32.xlu1 %v6278_v0, %s6078_s23  ;;  %10351 = vst [vmem:[#allocation5_spill] sm:$0xff] %v6293_v2 }
  0xa4   : > { %688 = vrot.lane.b32.xlu0 %v6278_v0, %s6077_s22  ;;  %v511_v23 = vadd.f32 %v510_v5, %v509_v53  ;;  %v528_v24 = vrot.slane %v527_v6, 1 }
  0xa6   : > { %v535_v36 = vmul.f32 0.0625, %v511_v23  ;;  %v529_v38 = vadd.f32 %v528_v24, %v527_v6 }
  0xa8   : > { %v422_v9 = vpop.f32.mrf.mxu2  ;;  %v434_v10 = vpop.f32.mrf.mxu3 }
  0xa9   : > { %v6335_v11 = vadd.f32 %v6267_v59, %v422_v9  ;;  %v6338_v12 = vadd.f32 %v6267_v59, %v434_v10  ;;  %v398_v13 = vpop.f32.mrf.mxu0  ;;  %v413_v14 = vpop.f32.mrf.mxu1  ;;  %v519_v10 = vrot.slane %v518_v27, 1 }
  0xaa   : > { %v6359_v15 = vadd.f32 %v6267_v59, %v398_v13  ;;  %v6362_v16 = vadd.f32 %v6272_v60, %v413_v14  ;;  %v493_v13 = vadd.f32 %v492_v57, %v491_v49  ;;  %v539_v14 = vld [vmem:[%s10203_s1 + $0x8] sm:$0xff] }
  0xab   : > { %1705 = vrot.lane.b32.xlu2 %v6278_v0, %s6079_s24  ;;  %656 = vrot.lane.b32.xlu1 %v6293_v2, %s6076_s21  ;;  %10352 = vst [vmem:[#allocation6_spill] sm:$0xff] %v6335_v11  ;;  %v520_v29 = vadd.f32 %v519_v10, %v518_v27 }
  0xac   : > { %1671 = vrot.lane.b32.xlu0 %v6275_v63, %s6079_s24  ;;  %10353 = vst [vmem:[#allocation7_spill] sm:$0xff] %v6338_v12  ;;  %584 = vmatpush.msrb.mxu1 %v539_v14 }
  0xad   : > { %v536_v39 = vmul.f32 0.0625, %v520_v29 }
  0xae   : > { %585 = vmatpush.msrb.mxu1 %v538_v37 }
  0xb0   : > { %v425_v17 = vpop.f32.mrf.mxu2  ;;  %v437_v20 = vpop.f32.mrf.mxu3 }
  0xb1   : > { %v6379_v19 = vadd.f32 %v6272_v60, %v425_v17  ;;  %v6390_v22 = vadd.f32 %v6272_v60, %v437_v20  ;;  %v416_v40 = vpop.f32.mrf.mxu1  ;;  %v401_v56 = vpop.f32.mrf.mxu0  ;;  %v502_v17 = vadd.f32 %v501_v62, %v500_v50  ;;  %v532_v20 = vmul.f32 0.0625, %v484_v1 }
  0xb2   : > { %v6428_v47 = vadd.f32 %v6267_v59, %v416_v40  ;;  %v6446_v9 = vadd.f32 %v6272_v60, %v401_v56  ;;  %v533_v60 = vmul.f32 0.0625, %v493_v13  ;;  %v537_v40 = vmul.f32 0.0625, %v529_v38 }
  0xb3   : > { %704 = vrot.lane.b32.xlu2 %v6293_v2, %s6077_s22  ;;  %696 = vrot.lane.b32.xlu1 %v6302_v4, %s6077_s22  ;;  %10354 = vst [vmem:[#allocation8_spill] sm:$0xff] %v6379_v19  ;;  %v534_v33 = vmul.f32 0.0625, %v502_v17  ;;  %v557_v35 = vsel %vm556_vm2, %v532_v20, %v6257_v55 }
  0xb4   : > { %648 = vrot.lane.b32.xlu0 %v6302_v4, %s6076_s21  ;;  %10355 = vst [vmem:[#allocation9_spill] sm:$0xff] %v6390_v22  ;;  %v559_v25 = vsel %vm558_vm3, %v533_v60, %v557_v35 }
  0xb5   : > { %v561_v30 = vsel %vm560_vm4, %v534_v33, %v559_v25 }
  0xb6   : > { %v563_v55 = vsel %vm562_vm5, %v535_v36, %v561_v30 }
  0xb7   : > { %v565_v43 = vsel %vm564_vm6, %v536_v39, %v563_v55 }
  0xb8   : > { %v428_v42 = vpop.f32.mrf.mxu2  ;;  %v567_v48 = vsel %vm566_vm7, %v537_v40, %v565_v43 }
  0xb9   : > { %5868 = vmatmul.msk.f32.vlgmr.msrb.gmra.mxu1 %vm326_vm0, %v567_v48  ;;  %5869 = vmatmul.msk.f32.vlgmr.msrb.gmra.mxu2 %vm326_vm0, %v567_v48  ;;  %v6488_v50 = vadd.f32 %v6267_v59, %v428_v42  ;;  %v404_v51 = vpop.f32.mrf.mxu0 }
  0xba   : > { %v6503_v27 = vadd.f32 %v6267_v59, %v404_v51 }
  0xbb   : > { %744 = vrot.lane.b32.xlu2 %v6302_v4, %s6078_s23  ;;  %1769 = vrot.lane.b32.xlu1 %v6293_v2, %s6079_s24  ;;  %10360 = vst [vmem:[#allocation14_spill] sm:$0xff] %v6488_v50 }
  0xbc   : > { %752 = vrot.lane.b32.xlu0 %v6293_v2, %s6078_s23 }
  0xc3   : > { %690 = vrot.lane.b32.xlu1 %v6320_v8, %s6077_s22  ;;  %680 = vrot.lane.b32.xlu2 %v6317_v7, %s6077_s22 }
  0xc4   : > { %1737 = vrot.lane.b32.xlu0 %v6302_v4, %s6079_s24 }
  0xcb   : > { %1673 = vrot.lane.b32.xlu1 %v6317_v7, %s6079_s24  ;;  %738 = vrot.lane.b32.xlu2 %v6320_v8, %s6078_s23 }
  0xcc   : > { %632 = vrot.lane.b32.xlu0 %v6317_v7, %s6076_s21 }
  0xd3   : > { %650 = vrot.lane.b32.xlu1 %v6335_v11, %s6076_s21  ;;  %658 = vrot.lane.b32.xlu2 %v6338_v12, %s6076_s21 }
  0xd4   : > { %642 = vrot.lane.b32.xlu0 %v6320_v8, %s6076_s21 }
  0xdb   : > { %754 = vrot.lane.b32.xlu1 %v6338_v12, %s6078_s23  ;;  %698 = vrot.lane.b32.xlu2 %v6335_v11, %s6077_s22 }
  0xdc   : > { %728 = vrot.lane.b32.xlu0 %v6317_v7, %s6078_s23 }
  0xe3   : > { %1751 = vrot.lane.b32.xlu1 %v6335_v11, %s6079_s24  ;;  %1783 = vrot.lane.b32.xlu2 %v6338_v12, %s6079_s24 }
  0xe4   : > { %1719 = vrot.lane.b32.xlu0 %v6320_v8, %s6079_s24 }
  0xeb   : > { %692 = vrot.lane.b32.xlu2 %v6362_v16, %s6077_s22  ;;  %634 = vrot.lane.b32.xlu1 %v6359_v15, %s6076_s21 }
  0xec   : > { %706 = vrot.lane.b32.xlu0 %v6338_v12, %s6077_s22 }
  0xf3   : > { %1687 = vrot.lane.b32.xlu2 %v6359_v15, %s6079_s24  ;;  %644 = vrot.lane.b32.xlu1 %v6362_v16, %s6076_s21 }
  0xf4   : > { %746 = vrot.lane.b32.xlu0 %v6335_v11, %s6078_s23 }
  0xf5   : > { %v6376_v18 = vpop.permute.xlu2 %640 }
  0xfb   : > { %652 = vrot.lane.b32.xlu2 %v6379_v19, %s6076_s21  ;;  %730 = vrot.lane.b32.xlu1 %v6359_v15, %s6078_s23 }
  0xfc   : > { %682 = vrot.lane.b32.xlu0 %v6359_v15, %s6077_s22 }
  0xfd   : > { %v6387_v21 = vpop.permute.xlu2 %726 }
 0x103   : > { %756 = vrot.lane.b32.xlu2 %v6390_v22, %s6078_s23  ;;  %1721 = vrot.lane.b32.xlu1 %v6362_v16, %s6079_s24 }
 0x104   : > { %740 = vrot.lane.b32.xlu0 %v6362_v16, %s6078_s23 }
 0x105   : > { %v6400_v28 = vpop.permute.xlu2 %1705 }
 0x106   : > { %10356 = vst [vmem:[#allocation10_spill] sm:$0xff] %v6400_v28 }
 0x10b   : > { %1753 = vrot.lane.b32.xlu2 %v6379_v19, %s6079_s24  ;;  %708 = vrot.lane.b32.xlu1 %v6390_v22, %s6077_s22 }
 0x10c   : > { %660 = vrot.lane.b32.xlu0 %v6390_v22, %s6076_s21 }
 0x10d   : > { %v6420_v26 = vpop.permute.xlu2 %704  ;;  %v6422_v41 = vpop.permute.xlu1 %678 }
 0x10e   : > { %10357 = vst [vmem:[#allocation11_spill] sm:$0xff] %v6420_v26  ;;  %v6424_v44 = vpop.permute.xlu0 %630 }
 0x113   : > { %646 = vrot.lane.b32.xlu2 %v6428_v47, %s6076_s21  ;;  %748 = vrot.lane.b32.xlu1 %v6379_v19, %s6078_s23 }
 0x114   : > { %700 = vrot.lane.b32.xlu0 %v6379_v19, %s6077_s22 }
 0x115   : > { %v6439_v58 = vpop.permute.xlu2 %744  ;;  %v6441_v61 = vpop.permute.xlu1 %736 }
 0x116   : > { %v6443_v3 = vpop.permute.xlu0 %688 }
 0x11b   : > { %732 = vrot.lane.b32.xlu2 %v6446_v9, %s6078_s23  ;;  %636 = vrot.lane.b32.xlu1 %v6446_v9, %s6076_s21 }
 0x11c   : > { %1785 = vrot.lane.b32.xlu0 %v6390_v22, %s6079_s24 }
 0x11d   : > { %v6457_v31 = vpop.permute.xlu1 %656  ;;  %v6459_v32 = vpop.permute.xlu2 %680 }
 0x11e   : > { %10358 = vst [vmem:[#allocation12_spill] sm:$0xff] %v6457_v31  ;;  %v6461_v34 = vpop.permute.xlu0 %1671 }
 0x11f   : > { %10359 = vst [vmem:[#allocation13_spill] sm:$0xff] %v6461_v34 }
 0x123   : > { %1735 = vrot.lane.b32.xlu2 %v6428_v47, %s6079_s24  ;;  %684 = vrot.lane.b32.xlu1 %v6446_v9, %s6077_s22 }
 0x124   : > { %694 = vrot.lane.b32.xlu0 %v6428_v47, %s6077_s22 }
 0x125   : > { %v6478_v45 = vpop.permute.xlu1 %696  ;;  %v6480_v46 = vpop.permute.xlu2 %738 }
 0x126   : > { %v6483_v49 = vpop.permute.xlu0 %648 }
 0x12b   : > { %750 = vrot.lane.b32.xlu2 %v6488_v50, %s6078_s23  ;;  %742 = vrot.lane.b32.xlu1 %v6428_v47, %s6078_s23 }
 0x12c   : > { %1689 = vrot.lane.b32.xlu0 %v6446_v9, %s6079_s24 }
 0x12d   : > { %v6496_v52 = vpop.permute.xlu1 %1769  ;;  %v6498_v53 = vpop.permute.xlu2 %658 }
 0x12e   : > { %10361 = vst [vmem:[#allocation15_spill] sm:$0xff] %v6496_v52  ;;  %v6500_v54 = vpop.permute.xlu0 %752 }
 0x12f   : > { %10362 = vst [vmem:[#allocation16_spill] sm:$0xff] %v6498_v53 }
 0x130   : > { %10363 = vst [vmem:[#allocation17_spill] sm:$0xff] %v6500_v54 }
 0x133   : > { %702 = vrot.lane.b32.xlu1 %v6488_v50, %s6077_s22  ;;  %638 = vrot.lane.b32.xlu2 %v6503_v27, %s6076_s21 }
 0x134   : > { %654 = vrot.lane.b32.xlu0 %v6488_v50, %s6076_s21 }
 0x135   : > { %v6511_v56 = vpop.permute.xlu1 %690  ;;  %v6513_v57 = vpop.permute.xlu2 %698 }
 0x136   : > { %v6515_v62 = vpop.permute.xlu0 %1737 }
 0x137   : > { %10364 = vst [vmem:[#allocation18_spill] sm:$0xff] %v6515_v62 }
 0x13b   : > { %1703 = vrot.lane.b32.xlu1 %v6503_v27, %s6079_s24  ;;  %686 = vrot.lane.b32.xlu2 %v6503_v27, %s6077_s22 }
 0x13c   : > { %1767 = vrot.lane.b32.xlu0 %v6488_v50, %s6079_s24 }
 0x13d   : > { %v6523_v59 = vpop.permute.xlu1 %1673  ;;  %v6525_v1 = vpop.permute.xlu2 %1783 }
 0x13e   : > { %10365 = vst [vmem:[#allocation19_spill] sm:$0xff] %v6523_v59  ;;  %v6527_v5 = vpop.permute.xlu0 %632 }
 0x13f   : > { %10366 = vst [vmem:[#allocation20_spill] sm:$0xff] %v6525_v1 }
 0x143   : > { %1679 = vrot.lane.b32.xlu1 %v6422_v41, %s6079_s24  ;;  %1675 = vrot.lane.b32.xlu2 %v6424_v44, %s6079_s24 }
 0x144   : > { %734 = vrot.lane.b32.xlu0 %v6503_v27, %s6078_s23 }
 0x145   : > { %v6535_v6 = vpop.permute.xlu1 %650  ;;  %v6537_v10 = vpop.permute.xlu2 %692 }
 0x146   : > { %10367 = vst [vmem:[#allocation21_spill] sm:$0xff] %v6535_v6  ;;  %v6539_v13 = vpop.permute.xlu0 %642 }
 0x14b   : > { %1709 = vrot.lane.b32.xlu1 %v6376_v18, %s6079_s24  ;;  %1717 = vrot.lane.b32.xlu2 %v6441_v61, %s6079_s24 }
 0x14c   : > { %1683 = vrot.lane.b32.xlu0 %v6387_v21, %s6079_s24 }
 0x14d   : > { %v6547_v14 = vpop.permute.xlu1 %754  ;;  %v6549_v17 = vpop.permute.xlu2 %1687 }
 0x14e   : > { %10368 = vst [vmem:[#allocation22_spill] sm:$0xff] %v6547_v14  ;;  %v6551_v20 = vpop.permute.xlu0 %728 }
 0x14f   : > { %10369 = vst [vmem:[#allocation23_spill] sm:$0xff] %v6549_v17 }
 0x153   : > { %1745 = vrot.lane.b32.xlu1 %v6478_v45, %s6079_s24  ;;  %1741 = vrot.lane.b32.xlu2 %v6483_v49, %s6079_s24 }
 0x154   : > { %1713 = vrot.lane.b32.xlu0 %v6443_v3, %s6079_s24 }
 0x155   : > { %v6559_v23 = vpop.permute.xlu1 %1751  ;;  %v6561_v24 = vpop.permute.xlu2 %652 }
 0x156   : > { %10370 = vst [vmem:[#allocation24_spill] sm:$0xff] %v6559_v23  ;;  %v6563_v29 = vpop.permute.xlu0 %1719 }
 0x157   : > { %10371 = vst [vmem:[#allocation25_spill] sm:$0xff] %v6561_v24 }
 0x158   : > { %10372 = vst [vmem:[#allocation26_spill] sm:$0xff] %v6563_v29 }
 0x15b   : > { %1781 = vrot.lane.b32.xlu1 %v6500_v54, %s6079_s24  ;;  %1777 = vrot.lane.b32.xlu2 %v6420_v26, %s6079_s24 }
 0x15c   : > { %1749 = vrot.lane.b32.xlu0 %v6439_v58, %s6079_s24 }
 0x15d   : > { %v6571_v60 = vpop.permute.xlu2 %756  ;;  %v6573_v33 = vpop.permute.xlu1 %634 }
 0x15e   : > { %10373 = vst [vmem:[#allocation27_spill] sm:$0xff] %v6571_v60  ;;  %v6575_v35 = vpop.permute.xlu0 %706 }
 0x15f   : > { %10374 = vst [vmem:[#allocation28_spill] sm:$0xff] %v6575_v35 }
 0x163   : > { %1685 = vrot.lane.b32.xlu1 %v6551_v20, %s6079_s24  ;;  %1681 = vrot.lane.b32.xlu2 %v6459_v32, %s6079_s24 }
 0x164   : > { %1773 = vrot.lane.b32.xlu0 %v6457_v31, %s6079_s24 }
 0x165   : > { %v6583_v36 = vpop.permute.xlu2 %1753  ;;  %v6585_v37 = vpop.permute.xlu1 %644 }
 0x166   : > { %10375 = vst [vmem:[#allocation29_spill] sm:$0xff] %v6583_v36  ;;  %v6587_v38 = vpop.permute.xlu0 %746 }
 0x16b   : > { %1727 = vrot.lane.b32.xlu1 %v6511_v56, %s6079_s24  ;;  %1723 = vrot.lane.b32.xlu2 %v6539_v13, %s6079_s24 }
 0x16c   : > { %1677 = vrot.lane.b32.xlu0 %v6527_v5, %s6079_s24 }
 0x16d   : > { %v6595_v39 = vpop.permute.xlu2 %646  ;;  %v6597_v40 = vpop.permute.xlu1 %730 }
 0x16e   : > { %v6599_v25 = vpop.permute.xlu0 %682 }
 0x173   : > { %1763 = vrot.lane.b32.xlu1 %v6587_v38, %s6079_s24  ;;  %1759 = vrot.lane.b32.xlu2 %v6513_v57, %s6079_s24 }
 0x174   : > { %1731 = vrot.lane.b32.xlu0 %v6480_v46, %s6079_s24 }
 0x175   : > { %v6607_v30 = vpop.permute.xlu1 %1721  ;;  %v6609_v55 = vpop.permute.xlu2 %732 }
 0x176   : > { %10376 = vst [vmem:[#allocation30_spill] sm:$0xff] %v6607_v30  ;;  %v6611_v42 = vpop.permute.xlu0 %740 }
 0x17b   : > { %1787 = vrot.lane.b32.xlu1 %v6498_v53, %s6079_s24  ;;  %1699 = vrot.lane.b32.xlu2 %v6597_v40, %s6079_s24 }
 0x17c   : > { %1755 = vrot.lane.b32.xlu0 %v6535_v6, %s6079_s24  ;;  %v899_v6 = vrot.slane %v6597_v40, 4 }
 0x17d   : > { %v6619_v43 = vpop.permute.xlu1 %708  ;;  %v6621_v48 = vpop.permute.xlu2 %1735 }
 0x17e   : > { %10377 = vst [vmem:[#allocation31_spill] sm:$0xff] %v6619_v43  ;;  %v6623_v51 = vpop.permute.xlu0 %660 }
 0x17f   : > { %10378 = vst [vmem:[#allocation32_spill] sm:$0xff] %v6621_v48 }
 0x180   : > { %10379 = vst [vmem:[#allocation33_spill] sm:$0xff] %v6623_v51 }
 0x183   : > { %1691 = vrot.lane.b32.xlu1 %v6573_v33, %s6079_s24  ;;  %1729 = vrot.lane.b32.xlu2 %v6537_v10, %s6079_s24 }
 0x184   : > { %1695 = vrot.lane.b32.xlu0 %v6599_v25, %s6079_s24 }
 0x185   : > { %v6631_v1 = vpop.permute.xlu1 %748  ;;  %v6633_v52 = vpop.permute.xlu2 %750 }
 0x186   : > { %10380 = vst [vmem:[#allocation34_spill] sm:$0xff] %v6631_v1  ;;  %v6635_v36 = vpop.permute.xlu0 %700 }
 0x187   : > { %10381 = vst [vmem:[#allocation35_spill] sm:$0xff] %v6633_v52 }
 0x188   : > { %10382 = vst [vmem:[#allocation36_spill] sm:$0xff] %v6635_v36 }
 0x18b   : > { %1733 = vrot.lane.b32.xlu1 %v6611_v42, %s6079_s24  ;;  %1765 = vrot.lane.b32.xlu2 %v6631_v1, %s6079_s24 }
 0x18c   : > { %1725 = vrot.lane.b32.xlu0 %v6585_v37, %s6079_s24 }
 0x18d   : > { %v6643_v23 = vpop.permute.xlu1 %636  ;;  %v6645_v62 = vpop.permute.xlu2 %638 }
 0x18e   : > { %v6647_v30 = vpop.permute.xlu0 %1785 }
 0x18f   : > { %10383 = vst [vmem:[#allocation37_spill] sm:$0xff] %v6647_v30 }
 0x193   : > { %1757 = vrot.lane.b32.xlu1 %v6561_v24, %s6079_s24  ;;  %1789 = vrot.lane.b32.xlu2 %v6623_v51, %s6079_s24 }
 0x194   : > { %1761 = vrot.lane.b32.xlu0 %v6635_v36, %s6079_s24 }
 0x195   : > { %v6655_v48 = vpop.permute.xlu1 %684  ;;  %v6657_v29 = vpop.permute.xlu2 %686 }
 0x196   : > { %v6659_v28 = vpop.permute.xlu0 %694 }
 0x19b   : > { %1697 = vrot.lane.b32.xlu1 %v6655_v48, %s6079_s24  ;;  %1693 = vrot.lane.b32.xlu2 %v6643_v23, %s6079_s24 }
 0x19c   : > { %1701 = vrot.lane.b32.xlu0 %v6609_v55, %s6079_s24 }
 0x19d   : > { %v6667_v30 = vpop.permute.xlu1 %742  ;;  %v6669_v59 = vpop.permute.xlu2 %1675 }
 0x19e   : > { %10384 = vst [vmem:[#allocation38_spill] sm:$0xff] %v6669_v59  ;;  %v6671_v17 = vpop.permute.xlu0 %1689 }
 0x19f   : > { %10385 = vst [vmem:[#allocation39_spill] sm:$0xff] %v6671_v17 }
 0x1a3   : > { %1739 = vrot.lane.b32.xlu1 %v6595_v39, %s6079_s24  ;;  %1747 = vrot.lane.b32.xlu2 %v6667_v30, %s6079_s24 }
 0x1a4   : > { %1743 = vrot.lane.b32.xlu0 %v6659_v28, %s6079_s24 }
 0x1a5   : > { %v6679_v34 = vpop.permute.xlu1 %702  ;;  %v6681_v22 = vpop.permute.xlu2 %1717 }
 0x1a6   : > { %10386 = vst [vmem:[#allocation40_spill] sm:$0xff] %v6679_v34  ;;  %v6683_v51 = vpop.permute.xlu0 %654 }
 0x1a7   : > { %10387 = vst [vmem:[#allocation41_spill] sm:$0xff] %v6681_v22 }
 0x1a8   : > { %10388 = vst [vmem:[#allocation42_spill] sm:$0xff] %v6683_v51 }
 0x1ab   : > { %1775 = vrot.lane.b32.xlu1 %v6679_v34, %s6079_s24  ;;  %1771 = vrot.lane.b32.xlu2 %v6683_v51, %s6079_s24  ;;  %v6081_v51 = vmov 1934713408  }
 0x1ac   : > { %1779 = vrot.lane.b32.xlu0 %v6633_v52, %s6079_s24  ;;  %v804_v34 = vunpack.c.l.s4 %v6081_v51 }
 0x1ad   : > { %v6691_v17 = vpop.permute.xlu1 %1703  ;;  %v6693_v59 = vpop.permute.xlu2 %1741 }
 0x1ae   : > { %10389 = vst [vmem:[#allocation43_spill] sm:$0xff] %v6691_v17  ;;  %v6695_v12 = vpop.permute.xlu0 %1767  ;;  %v6858_v51 = vunpack.c.0.s8 %v804_v34 }
 0x1af   : > { %10390 = vst [vmem:[#allocation44_spill] sm:$0xff] %v6693_v59  ;;  %v587_v59 = vpop.f32.mrf.mxu1 }
 0x1b0   : > { %10391 = vst [vmem:[#allocation45_spill] sm:$0xff] %v6695_v12  ;;  %v5945_v12 = vld [vmem:[%s10207_s5] ss:$0 sm:$0xff] }
 0x1b1   : > { %v6724_v31 = vadd.f32 %v5945_v12, %v587_v59  ;;  %10440 = vst [vmem:[#allocation94_spill] sm:$0xff] %v6858_v51 }
 0x1b3   : > { %1711 = vrot.lane.b32.xlu2 %v6657_v29, %s6079_s24 }
 0x1b4   : > { %1707 = vrot.lane.b32.xlu0 %v6645_v62, %s6079_s24 }
 0x1b5   : > { %v6701_v22 = vpop.permute.xlu1 %1679  ;;  %v6703_v53 = vpop.permute.xlu2 %1777 }
 0x1b6   : > { %10392 = vst [vmem:[#allocation46_spill] sm:$0xff] %v6701_v22  ;;  %v6705_v2 = vpop.permute.xlu0 %734 }
 0x1b7   : > { %10393 = vst [vmem:[#allocation47_spill] sm:$0xff] %v6703_v53  ;;  %1715 = vrot.lane.b32.xlu1 %v6705_v2, %s6079_s24 }
 0x1bb   : > { %1795 = vrot.lane.b32.xlu2 %v6547_v14, %s6079_s24  ;;  %v5946_v14 = vld [vmem:[%s10208_s6] ss:$0 sm:$0xff] }
 0x1bc   : > { %1791 = vrot.lane.b32.xlu0 %v6575_v35, %s6079_s24 }
 0x1bd   : > { %v6716_v17 = vpop.permute.xlu1 %1709  ;;  %v6718_v22 = vpop.permute.xlu2 %1681 }
 0x1be   : > { %10394 = vst [vmem:[#allocation48_spill] sm:$0xff] %v6716_v17  ;;  %v6720_v53 = vpop.permute.xlu0 %1683  ;;  %v611_v17 = vpop.f32.mrf.mxu2 }
 0x1bf   : > { %10395 = vst [vmem:[#allocation49_spill] sm:$0xff] %v6718_v22  ;;  %1793 = vrot.lane.b32.xlu1 %v6619_v43, %s6079_s24  ;;  %v6741_v12 = vadd.f32 %v5946_v14, %v611_v17 }
 0x1c0   : > { %10396 = vst [vmem:[#allocation50_spill] sm:$0xff] %v6720_v53 }
 0x1c1   : > { %10400 = vst [vmem:[#allocation54_spill] sm:$0xff] %v6741_v12 }
 0x1c3   : > { %2763 = vrot.lane.b32.xlu2 %v6724_v31, %s6077_s22 }
 0x1c4   : > { %1797 = vrot.lane.b32.xlu0 %v6571_v60, %s6079_s24 }
 0x1c5   : > { %v6733_v35 = vpop.permute.xlu1 %1745  ;;  %v6735_v22 = vpop.permute.xlu2 %1723 }
 0x1c6   : > { %10397 = vst [vmem:[#allocation51_spill] sm:$0xff] %v6733_v35  ;;  %v6737_v53 = vpop.permute.xlu0 %1713 }
 0x1c7   : > { %10398 = vst [vmem:[#allocation52_spill] sm:$0xff] %v6735_v22  ;;  %2760 = vrot.lane.b32.xlu1 %v6724_v31, %s6076_s21 }
 0x1c8   : > { %10399 = vst [vmem:[#allocation53_spill] sm:$0xff] %v6737_v53 }
 0x1cb   : > { %2829 = vrot.lane.b32.xlu2 %v6741_v12, %s6077_s22  ;;  %s6084_s22 = smov 16  }
 0x1cc   : > { %2766 = vrot.lane.b32.xlu0 %v6724_v31, %s6078_s23 }
 0x1cd   : > { %v6747_v59 = vpop.permute.xlu1 %1781  ;;  %v6749_v60 = vpop.permute.xlu2 %1759 }
 0x1ce   : > { %10401 = vst [vmem:[#allocation55_spill] sm:$0xff] %v6747_v59  ;;  %v6751_v35 = vpop.permute.xlu0 %1749 }
 0x1cf   : > { %10402 = vst [vmem:[#allocation56_spill] sm:$0xff] %v6749_v60  ;;  %2826 = vrot.lane.b32.xlu1 %v6741_v12, %s6076_s21  ;;  %s6083_s21 = smov 24  }
 0x1d0   : > { %10403 = vst [vmem:[#allocation57_spill] sm:$0xff] %v6751_v35 }
 0x1d4   : > { %2832 = vrot.lane.b32.xlu0 %v6741_v12, %s6078_s23  ;;  %s6085_s23 = smov 8  }
 0x1d5   : > { %v6757_v14 = vpop.permute.xlu1 %1685  ;;  %v6759_v17 = vpop.permute.xlu2 %1699 }
 0x1d6   : > { %10404 = vst [vmem:[#allocation58_spill] sm:$0xff] %v6757_v14  ;;  %v6761_v22 = vpop.permute.xlu0 %1773 }
 0x1d7   : > { %10405 = vst [vmem:[#allocation59_spill] sm:$0xff] %v6759_v17  ;;  %2891 = vrot.lane.b32.xlu1 %v6741_v12, %s6079_s24 }
 0x1d8   : > { %10406 = vst [vmem:[#allocation60_spill] sm:$0xff] %v6761_v22 }
 0x1dd   : > { %v6765_v59 = vpop.permute.xlu1 %1727  ;;  %v6767_v60 = vpop.permute.xlu2 %1729 }
 0x1de   : > { %10407 = vst [vmem:[#allocation61_spill] sm:$0xff] %v6765_v59  ;;  %v6769_v35 = vpop.permute.xlu0 %1677 }
 0x1df   : > { %10408 = vst [vmem:[#allocation62_spill] sm:$0xff] %v6767_v60 }
 0x1e0   : > { %10409 = vst [vmem:[#allocation63_spill] sm:$0xff] %v6769_v35 }
 0x1e5   : > { %v6771_v53 = vpop.permute.xlu1 %1763  ;;  %v6773_v43 = vpop.permute.xlu2 %1765 }
 0x1e6   : > { %10410 = vst [vmem:[#allocation64_spill] sm:$0xff] %v6771_v53  ;;  %v6775_v26 = vpop.permute.xlu0 %1731 }
 0x1e7   : > { %10411 = vst [vmem:[#allocation65_spill] sm:$0xff] %v6773_v43 }
 0x1e8   : > { %10412 = vst [vmem:[#allocation66_spill] sm:$0xff] %v6775_v26 }
 0x1ed   : > { %v6777_v14 = vpop.permute.xlu1 %1787  ;;  %v6779_v17 = vpop.permute.xlu2 %1789 }
 0x1ee   : > { %10413 = vst [vmem:[#allocation67_spill] sm:$0xff] %v6777_v14  ;;  %v6781_v22 = vpop.permute.xlu0 %1755 }
 0x1ef   : > { %10414 = vst [vmem:[#allocation68_spill] sm:$0xff] %v6779_v17 }
 0x1f0   : > { %10415 = vst [vmem:[#allocation69_spill] sm:$0xff] %v6781_v22 }
 0x1f5   : > { %v6783_v54 = vpop.permute.xlu1 %1691  ;;  %v6785_v12 = vpop.permute.xlu2 %1693 }
 0x1f6   : > { %10416 = vst [vmem:[#allocation70_spill] sm:$0xff] %v6783_v54  ;;  %v6787_v59 = vpop.permute.xlu0 %1695 }
 0x1f7   : > { %10417 = vst [vmem:[#allocation71_spill] sm:$0xff] %v6785_v12 }
 0x1f8   : > { %10418 = vst [vmem:[#allocation72_spill] sm:$0xff] %v6787_v59 }
 0x1fd   : > { %v6789_v60 = vpop.permute.xlu1 %1733  ;;  %v6791_v35 = vpop.permute.xlu2 %1747 }
 0x1fe   : > { %10419 = vst [vmem:[#allocation73_spill] sm:$0xff] %v6789_v60  ;;  %v6793_v53 = vpop.permute.xlu0 %1725 }
 0x1ff   : > { %10420 = vst [vmem:[#allocation74_spill] sm:$0xff] %v6791_v35 }
 0x200   : > { %10421 = vst [vmem:[#allocation75_spill] sm:$0xff] %v6793_v53 }
 0x205   : > { %v6795_v43 = vpop.permute.xlu1 %1757  ;;  %v6797_v26 = vpop.permute.xlu2 %1771 }
 0x206   : > { %10422 = vst [vmem:[#allocation76_spill] sm:$0xff] %v6795_v43  ;;  %v6799_v14 = vpop.permute.xlu0 %1761 }
 0x207   : > { %10423 = vst [vmem:[#allocation77_spill] sm:$0xff] %v6797_v26 }
 0x208   : > { %10424 = vst [vmem:[#allocation78_spill] sm:$0xff] %v6799_v14 }
 0x20d   : > { %v6801_v17 = vpop.permute.xlu1 %1697  ;;  %v6803_v22 = vpop.permute.xlu2 %1711 }
 0x20e   : > { %10425 = vst [vmem:[#allocation79_spill] sm:$0xff] %v6801_v17  ;;  %v6805_v54 = vpop.permute.xlu0 %1701 }
 0x20f   : > { %10426 = vst [vmem:[#allocation80_spill] sm:$0xff] %v6803_v22 }
 0x210   : > { %10427 = vst [vmem:[#allocation81_spill] sm:$0xff] %v6805_v54 }
 0x215   : > { %v6807_v12 = vpop.permute.xlu2 %1795  ;;  %v6811_v60 = vpop.permute.xlu1 %1739 }
 0x216   : > { %10428 = vst [vmem:[#allocation82_spill] sm:$0xff] %v6807_v12  ;;  %v6809_v59 = vpop.permute.xlu0 %1743  ;;  %v6080_v12 = vmov 1983009808  }
 0x217   : > { %10429 = vst [vmem:[#allocation83_spill] sm:$0xff] %v6809_v59  ;;  %v780_v59 = vunpack.c.l.s4 %v6080_v12 }
 0x218   : > { %10430 = vst [vmem:[#allocation84_spill] sm:$0xff] %v6811_v60 }
 0x219   : > { %v6830_v54 = vunpack.c.0.s8 %v780_v59 }
 0x21b   : > { %10438 = vst [vmem:[#allocation92_spill] sm:$0xff] %v6830_v54 }
 0x21d   : > { %v2764_v35 = vpop.permute.xlu2 %2763  ;;  %v6815_v43 = vpop.permute.xlu1 %1775 }
 0x21e   : > { %v6813_v53 = vpop.permute.xlu0 %1779  ;;  %10432 = vst [vmem:[#allocation86_spill] sm:$0xff] %v6815_v43  ;;  %v774_v43 = vrot.slane %v6422_v41, 4  ;;  %v2769_v12 = vrot.slane %v2764_v35, 4 }
 0x21f   : > { %10431 = vst [vmem:[#allocation85_spill] sm:$0xff] %v6813_v53  ;;  %v787_v53 = vrot.slane %v6387_v21, 4 }
 0x225   : > { %v6817_v26 = vpop.permute.xlu2 %2829 }
 0x226   : > { %10433 = vst [vmem:[#allocation87_spill] sm:$0xff] %v6817_v26  ;;  %v6819_v14 = vpop.permute.xlu0 %1707  ;;  %2895 = vrot.lane.b32.xlu0 %v6817_v26, %s6079_s24  ;;  %v789_v26 = vrot.slane %v6424_v44, 4 }
 0x227   : > { %10434 = vst [vmem:[#allocation88_spill] sm:$0xff] %v6819_v14  ;;  %v788_v14 = vsel %vm775_vm8, %v787_v53, %v6424_v44 }
 0x228   : > { %v790_v19 = vsel %vm775_vm8, %v6387_v21, %v789_v26 }
 0x229   : > { %v6823_v22 = vpop.permute.xlu1 %1715  ;;  %v6861_v36 = vperm.slane %v790_v19, %v6830_v54 }
 0x22a   : > { %10435 = vst [vmem:[#allocation89_spill] sm:$0xff] %v6823_v22  ;;  %v6838_v22 = vperm.slane %v788_v14, %v6830_v54  ;;  %v2770_v14 = vsel %vm775_vm8, %v2769_v12, %v6724_v31 }
 0x22e   : > { %v6825_v17 = vpop.permute.xlu0 %1791 }
 0x22f   : > { %10436 = vst [vmem:[#allocation90_spill] sm:$0xff] %v6825_v17  ;;  %v2771_v17 = vrot.slane %v6724_v31, 4 }
 0x231   : > { %v6827_v60 = vpop.permute.xlu1 %1793  ;;  %v2772_v59 = vsel %vm775_vm8, %v2764_v35, %v2771_v17  ;;  %v777_v35 = vrot.slane %v6275_v63, 4  ;;  %v2776_v17 = vperm.slane %v2770_v14, %v6830_v54 }
 0x232   : > { %10437 = vst [vmem:[#allocation91_spill] sm:$0xff] %v6827_v60  ;;  %v776_v60 = vsel %vm775_vm8, %v774_v43, %v6275_v63  ;;  %v6854_v43 = vperm.slane %v2772_v59, %v6830_v54 }
 0x233   : > { %v6846_v53 = vperm.slane %v776_v60, %v6830_v54  ;;  %v778_v63 = vsel %vm775_vm8, %v6422_v41, %v777_v35  ;;  %v2795_v19 = vrot.slane %v2776_v17, 4 }
 0x234   : > { %v2807_v26 = vrot.slane %v6854_v43, 4 }
 0x236   : > { %v6835_v52 = vpop.permute.xlu0 %1797 }
 0x237   : > { %10439 = vst [vmem:[#allocation93_spill] sm:$0xff] %v6835_v52  ;;  %v799_v52 = vrot.slane %v6838_v22, 4 }
 0x239   : > { %v2761_v50 = vpop.permute.xlu1 %2760  ;;  %v800_v21 = vsel %vm775_vm8, %v799_v52, %v6846_v53 }
 0x23a   : > { %v2783_v44 = vrot.slane %v2761_v50, 4  ;;  %v806_v52 = vperm.slane %v800_v21, %v6858_v51 }
 0x23e   : > { %v2767_v60 = vpop.permute.xlu0 %2766 }
 0x23f   : > { %v2781_v24 = vrot.slane %v2767_v60, 4  ;;  %v2784_v31 = vsel %vm775_vm8, %v2767_v60, %v2783_v44  ;;  %v811_v60 = vrot.slane %v6861_v36, 4 }
 0x240   : > { %v6868_v12 = vperm.slane %v2784_v31, %v6830_v54 }
 0x241   : > { %v2782_v34 = vsel %vm775_vm8, %v2781_v24, %v2761_v50  ;;  %v6873_v59 = vpop.permute.xlu1 %2826  ;;  %v6888_v50 = vperm.slane %v778_v63, %v6830_v54 }
 0x242   : > { %10441 = vst [vmem:[#allocation95_spill] sm:$0xff] %v6873_v59  ;;  %v2788_v14 = vperm.slane %v2782_v34, %v6830_v54  ;;  %v6878_v44 = vsel %vm775_vm8, %v6868_v12, %v2807_v26  ;;  %2893 = vrot.lane.b32.xlu2 %v6873_v59, %s6079_s24  ;;  %v823_v26 = vrot.slane %v806_v52, 4  ;;  %v843_v34 = vrot.slane %v6551_v20, 4 }
 0x243   : > { %10442 = vst [vmem:[#allocation96_spill] sm:$0xff] %v6878_v44  ;;  %v812_v21 = vsel %vm775_vm8, %v811_v60, %v6888_v50 }
 0x244   : > { %v2793_v31 = vrot.slane %v2788_v14, 4  ;;  %v6885_v41 = vsel %vm775_vm8, %v2788_v14, %v2795_v19  ;;  %v831_v19 = vrot.slane %v6459_v32, 4  ;;  %v824_v63 = vsel %vm775_vm8, 0.0, %v823_v26 }
 0x245   : > { %v844_v14 = vsel %vm775_vm8, %v843_v34, %v6527_v5 }
 0x246   : > { %v2794_v24 = vsel %vm775_vm8, %v2793_v31, %v2776_v17  ;;  %v6891_v35 = vpop.permute.xlu0 %2832  ;;  %v6904_v17 = vperm.slane %v812_v21, %v6858_v51 }
 0x247   : > { %10443 = vst [vmem:[#allocation97_spill] sm:$0xff] %v6891_v35  ;;  %v6895_v59 = vperm.slane %v2794_v24, %v6858_v51  ;;  %2897 = vrot.lane.b32.xlu1 %v6891_v35, %s6079_s24  ;;  %v832_v24 = vsel %vm775_vm8, %v831_v19, %v6317_v7  ;;  %v850_v35 = vperm.slane %v844_v14, %v6830_v54 }
 0x248   : > { %v827_v60 = vrot.slane %v6904_v17, 4  ;;  %v838_v26 = vperm.slane %v832_v24, %v6830_v54  ;;  %v833_v24 = vrot.slane %v6317_v7, 4 }
 0x249   : > { %v2960_v31 = vmul.f32 %v6895_v59, %v824_v63  ;;  %v855_v1 = vrot.slane %v850_v35, 4 }
 0x24a   : > { %v828_v21 = vsel %vm775_vm8, 0.0, %v827_v60  ;;  %v857_v11 = vrot.slane %v838_v26, 4 }
 0x24b   : > { %v3091_v44 = vsel %vm3087_vm9, %v2960_v31, 0.0  ;;  %v2964_v34 = vmul.f32 %v6895_v59, %v828_v21  ;;  %v856_v63 = vsel %vm775_vm8, %v855_v1, %v838_v26  ;;  %v900_v1 = vsel %vm775_vm8, %v899_v6, %v6573_v33 }
 0x24c   : > { %v858_v14 = vsel %vm775_vm8, %v850_v35, %v857_v11  ;;  %v6922_v31 = vperm.slane %v856_v63, %v6858_v51  ;;  %v834_v11 = vsel %vm775_vm8, %v6459_v32, %v833_v24  ;;  %v845_v35 = vrot.slane %v6527_v5, 4 }
 0x24d   : > { %v3103_v19 = vsel %vm3087_vm9, %v2964_v34, 0.0  ;;  %v887_v26 = vrot.slane %v6599_v25, 4  ;;  %v801_v34 = vrot.slane %v6846_v53, 4  ;;  %v6941_v63 = vperm.slane %v900_v1, %v6830_v54 }
 0x24e   : > { %v2967_v60 = vmul.f32 %v6895_v59, %v6922_v31  ;;  %v846_v7 = vsel %vm775_vm8, %v6551_v20, %v845_v35  ;;  %v6945_v6 = vperm.slane %v834_v11, %v6830_v54  ;;  %v2959_v35 = vmul.f32 %v6895_v59, %v806_v52 }
 0x24f   : > { %v6948_v32 = vperm.slane %v846_v7, %v6830_v54  ;;  %v888_v5 = vsel %vm775_vm8, %v887_v26, %v6359_v15  ;;  %v802_v20 = vsel %vm775_vm8, %v6838_v22, %v801_v34  ;;  %v911_v24 = vrot.slane %v6941_v63, 4 }
 0x250   : > { %3092 = vadd.xlane.f32.xlu0 %v3091_v44  ;;  %v6925_v44 = vperm.slane %v858_v14, %v6858_v51  ;;  %v6959_v1 = vperm.slane %v888_v5, %v6830_v54  ;;  %v810_v11 = vperm.slane %v802_v20, %v6858_v51  ;;  %v901_v34 = vrot.slane %v6573_v33, 4 }
 0x251   : > { %v889_v5 = vrot.slane %v6359_v15, 4  ;;  %v813_v20 = vrot.slane %v6888_v50, 4  ;;  %v2817_v15 = vrot.slane %v6895_v59, 4 }
 0x252   : > { %v881_v21 = vrot.slane %v6925_v44, 4  ;;  %v912_v22 = vsel %vm775_vm8, %v911_v24, %v6959_v1 }
 0x253   : > { %v6975_v52 = vperm.slane %v912_v22, %v6858_v51  ;;  %v890_v24 = vsel %vm775_vm8, %v6599_v25, %v889_v5 }
 0x254   : > { %v882_v53 = vsel %vm775_vm8, 0.0, %v881_v21 }
 0x255   : > { %v2970_v14 = vmul.f32 %v6895_v59, %v882_v53  ;;  %v3088_v53 = vsel %vm3087_vm9, %v2959_v35, 0.0 }
 0x257   : > { %v3121_v21 = vsel %vm3087_vm9, %v2970_v14, 0.0  ;;  %v902_v14 = vsel %vm775_vm8, %v6597_v40, %v901_v34  ;;  %v898_v40 = vperm.slane %v890_v24, %v6830_v54  ;;  %v814_v34 = vsel %vm775_vm8, %v6861_v36, %v813_v20 }
 0x258   : > { %3104 = vadd.xlane.f32.xlu0 %v3103_v19  ;;  %v3112_v19 = vsel %vm3087_vm9, %v2967_v60, 0.0  ;;  %v869_v60 = vrot.slane %v6945_v6, 4  ;;  %v2963_v20 = vmul.f32 %v6895_v59, %v6904_v17  ;;  %v957_v17 = vrot.slane %v6643_v23, 4 }
 0x259   : > { %v925_v24 = vrot.slane %v898_v40, 4 }
 0x25a   : > { %v870_v26 = vsel %vm775_vm8, %v6948_v32, %v869_v60  ;;  %v2961_v60 = vmul.f32 %v6895_v59, %v810_v11 }
 0x25b   : > { %v6970_v7 = vperm.slane %v870_v26, %v6858_v51  ;;  %v910_v26 = vperm.slane %v902_v14, %v6830_v54 }
 0x25c   : > { %v3094_v25 = vsel %vm3087_vm9, %v2961_v60, 0.0 }
 0x25d   : > { %v2973_v33 = vmul.f32 %v6895_v59, %v6970_v7 }
 0x25f   : > { %v3130_v22 = vsel %vm3087_vm9, %v2973_v33, 0.0 }
 0x260   : > { %3113 = vadd.xlane.f32.xlu0 %v3112_v19  ;;  %v825_v19 = vrot.slane %v810_v11, 4  ;;  %v6996_v11 = vsel %vm775_vm8, 0.0, %v2817_v15  ;;  %v943_v15 = vrot.slane %v6655_v48, 4 }
 0x262   : > { %v826_v35 = vsel %vm775_vm8, 0.0, %v825_v19  ;;  %v923_v19 = vrot.slane %v910_v26, 4 }
 0x263   : > { %v2962_v50 = vmul.f32 %v6895_v59, %v826_v35 }
 0x264   : > { %v924_v60 = vsel %vm775_vm8, %v923_v19, %v898_v40  ;;  %v3100_v40 = vsel %vm3087_vm9, %v2963_v20, 0.0 }
 0x265   : > { %v3097_v5 = vsel %vm3087_vm9, %v2962_v50, 0.0  ;;  %v879_v50 = vrot.slane %v6922_v31, 4  ;;  %v944_v31 = vsel %vm775_vm8, %v943_v15, %v6446_v9  ;;  %v955_v15 = vrot.slane %v6609_v55, 4 }
 0x268   : > { %3122 = vadd.xlane.f32.xlu0 %v3121_v21  ;;  %v935_v21 = vrot.slane %v6975_v52, 4 }
 0x26a   : > { %v936_v14 = vsel %vm775_vm8, 0.0, %v935_v21 }
 0x26b   : > { %3089 = vadd.xlane.f32.xlu2 %v3088_v53  ;;  %v822_v53 = vperm.slane %v814_v34, %v6858_v51  ;;  %v2976_v33 = vmul.f32 %v6996_v11, %v936_v14  ;;  %v7012_v34 = vperm.slane %v924_v60, %v6858_v51 }
 0x26d   : > { %v2965_v36 = vmul.f32 %v6895_v59, %v822_v53  ;;  %v3139_v35 = vsel %vm3087_vm9, %v2976_v33, 0.0  ;;  %v2979_v14 = vmul.f32 %v6996_v11, %v7012_v34 }
 0x26f   : > { %v3106_v21 = vsel %vm3087_vm9, %v2965_v36, 0.0  ;;  %v958_v36 = vsel %vm775_vm8, %v6609_v55, %v957_v17 }
 0x270   : > { %3131 = vadd.xlane.f32.xlu0 %v3130_v22  ;;  %v926_v22 = vsel %vm775_vm8, %v910_v26, %v925_v24  ;;  %v880_v26 = vsel %vm775_vm8, 0.0, %v879_v50  ;;  %v945_v24 = vrot.slane %v6446_v9, 4 }
 0x271   : > { %3095 = vadd.xlane.f32.xlu1 %v3094_v25  ;;  %v829_v25 = vrot.slane %v822_v53, 4  ;;  %v7017_v19 = vperm.slane %v926_v22, %v6858_v51  ;;  %v2968_v53 = vmul.f32 %v6895_v59, %v880_v26 }
 0x272   : > { %v946_v9 = vsel %vm775_vm8, %v6655_v48, %v945_v24  ;;  %v1011_v24 = vrot.slane %v6705_v2, 4 }
 0x273   : > { %3098 = vadd.xlane.f32.xlu2 %v3097_v5  ;;  %v867_v5 = vrot.slane %v6948_v32, 4  ;;  %v830_v33 = vsel %vm775_vm8, 0.0, %v829_v25  ;;  %v7031_v32 = vperm.slane %v944_v31, %v6830_v54  ;;  %v941_v60 = vrot.slane %v7017_v19, 4 }
 0x274   : > { %v2966_v20 = vmul.f32 %v6895_v59, %v830_v33  ;;  %v3115_v22 = vsel %vm3087_vm9, %v2968_v53, 0.0  ;;  %v7045_v25 = vperm.slane %v958_v36, %v6830_v54  ;;  %v7052_v48 = vperm.slane %v946_v9, %v6830_v54 }
 0x275   : > { %v868_v50 = vsel %vm775_vm8, %v867_v5, %v6945_v6  ;;  %v969_v6 = vrot.slane %v7031_v32, 4  ;;  %v885_v36 = vrot.slane %v6970_v7, 4  ;;  %v1012_v7 = vsel %vm775_vm8, %v1011_v24, %v6645_v62 }
 0x276   : > { %v3109_v55 = vsel %vm3087_vm9, %v2966_v20, 0.0  ;;  %v874_v17 = vperm.slane %v868_v50, %v6858_v51  ;;  %v979_v26 = vrot.slane %v7045_v25, 4 }
 0x278   : > { %3140 = vadd.xlane.f32.xlu0 %v3139_v35  ;;  %v3148_v35 = vsel %vm3087_vm9, %v2979_v14, 0.0  ;;  %v2971_v31 = vmul.f32 %v6895_v59, %v874_v17  ;;  %v2969_v14 = vmul.f32 %v6895_v59, %v6925_v44  ;;  %v980_v20 = vsel %vm775_vm8, %v979_v26, %v7052_v48 }
 0x279   : > { %3107 = vadd.xlane.f32.xlu1 %v3106_v21  ;;  %v956_v21 = vsel %vm775_vm8, %v955_v15, %v6643_v23  ;;  %v883_v44 = vrot.slane %v874_v17, 4  ;;  %v7076_v9 = vperm.slane %v980_v20, %v6858_v51 }
 0x27a   : > { %v7056_v23 = vperm.slane %v956_v21, %v6830_v54  ;;  %v3118_v50 = vsel %vm3087_vm9, %v2969_v14, 0.0 }
 0x27b   : > { %3101 = vadd.xlane.f32.xlu2 %v3100_v40  ;;  %v942_v40 = vsel %vm775_vm8, 0.0, %v941_v60  ;;  %v3124_v60 = vsel %vm3087_vm9, %v2971_v31, 0.0  ;;  %v995_v26 = vrot.slane %v7076_v9, 4 }
 0x27c   : > { %v2982_v5 = vmul.f32 %v6996_v11, %v942_v40  ;;  %v970_v53 = vsel %vm775_vm8, %v7056_v23, %v969_v6  ;;  %v884_v40 = vsel %vm775_vm8, 0.0, %v883_v44 }
 0x27d   : > { %v7071_v15 = vperm.slane %v970_v53, %v6858_v51  ;;  %v2972_v31 = vmul.f32 %v6895_v59, %v884_v40  ;;  %v996_v20 = vsel %vm775_vm8, 0.0, %v995_v26  ;;  %v1067_v40 = vrot.slane %v6441_v61, 4 }
 0x27e   : > { %v3157_v33 = vsel %vm3087_vm9, %v2982_v5, 0.0  ;;  %v1018_v5 = vperm.slane %v1012_v7, %v6830_v54  ;;  %v2988_v44 = vmul.f32 %v6996_v11, %v996_v20 }
 0x27f   : > { %v2985_v21 = vmul.f32 %v6996_v11, %v7071_v15 }
 0x280   : > { %3149 = vadd.xlane.f32.xlu0 %v3148_v35  ;;  %v999_v35 = vrot.slane %v6657_v29, 4 }
 0x281   : > { %3116 = vadd.xlane.f32.xlu1 %v3115_v22  ;;  %v886_v22 = vsel %vm775_vm8, 0.0, %v885_v36  ;;  %v3166_v14 = vsel %vm3087_vm9, %v2985_v21, 0.0  ;;  %v3175_v21 = vsel %vm3087_vm9, %v2988_v44, 0.0 }
 0x282   : > { %v2974_v17 = vmul.f32 %v6895_v59, %v886_v22  ;;  %v1000_v6 = vsel %vm775_vm8, %v999_v35, %v6503_v27  ;;  %v7106_v22 = vperm.slane %v6885_v41, %v6858_v51 }
 0x283   : > { %3110 = vadd.xlane.f32.xlu2 %v3109_v55  ;;  %v913_v55 = vrot.slane %v6959_v1, 4  ;;  %v1006_v24 = vperm.slane %v1000_v6, %v6830_v54 }
 0x284   : > { %v3133_v1 = vsel %vm3087_vm9, %v2974_v17, 0.0 }
 0x285   : > { %v914_v53 = vsel %vm775_vm8, %v6941_v63, %v913_v55  ;;  %v2975_v63 = vmul.f32 %v6996_v11, %v6975_v52  ;;  %v939_v55 = vrot.slane %v7012_v34, 4 }
 0x286   : > { %v922_v36 = vperm.slane %v914_v53, %v6858_v51  ;;  %v1068_v53 = vsel %vm775_vm8, %v1067_v40, %v6376_v18 }
 0x287   : > { %v3136_v26 = vsel %vm3087_vm9, %v2975_v63, 0.0  ;;  %v940_v34 = vsel %vm775_vm8, 0.0, %v939_v55 }
 0x288   : > { %3158 = vadd.xlane.f32.xlu0 %v3157_v33  ;;  %v3127_v33 = vsel %vm3087_vm9, %v2972_v31, 0.0  ;;  %v2977_v35 = vmul.f32 %v6996_v11, %v922_v36  ;;  %v937_v31 = vrot.slane %v922_v36, 4  ;;  %v1013_v36 = vrot.slane %v6645_v62, 4 }
 0x289   : > { %3125 = vadd.xlane.f32.xlu1 %v3124_v60  ;;  %v1023_v60 = vrot.slane %v1018_v5, 4 }
 0x28a   : > { %v3142_v6 = vsel %vm3087_vm9, %v2977_v35, 0.0  ;;  %v938_v20 = vsel %vm775_vm8, 0.0, %v937_v31  ;;  %v7136_v35 = vperm.slane %v1068_v53, %v6830_v54  ;;  %v993_v53 = vrot.slane %v7071_v15, 4 }
 0x28b   : > { %3119 = vadd.xlane.f32.xlu2 %v3118_v50  ;;  %v1025_v50 = vrot.slane %v1006_v24, 4  ;;  %v1024_v7 = vsel %vm775_vm8, %v1023_v60, %v1006_v24  ;;  %v2980_v24 = vmul.f32 %v6996_v11, %v940_v34  ;;  %v2978_v60 = vmul.f32 %v6996_v11, %v938_v20 }
 0x28c   : > { %v7114_v52 = vperm.slane %v1024_v7, %v6858_v51 }
 0x28d   : > { %v1026_v17 = vsel %vm775_vm8, %v1018_v5, %v1025_v50  ;;  %v1014_v50 = vsel %vm775_vm8, %v6705_v2, %v1013_v36  ;;  %v3145_v2 = vsel %vm3087_vm9, %v2978_v60, 0.0  ;;  %v1057_v36 = vrot.slane %v6278_v0, 4 }
 0x28e   : > { %v7118_v41 = vperm.slane %v1026_v17, %v6858_v51  ;;  %v2991_v5 = vmul.f32 %v7106_v22, %v7114_v52 }
 0x290   : > { %3167 = vadd.xlane.f32.xlu0 %v3166_v14  ;;  %v1001_v14 = vrot.slane %v6503_v27, 4  ;;  %v1049_v44 = vrot.slane %v7118_v41, 4  ;;  %v3184_v63 = vsel %vm3087_vm9, %v2991_v5, 0.0 }
 0x291   : > { %3134 = vadd.xlane.f32.xlu1 %v3133_v1  ;;  %v1055_v1 = vrot.slane %v6443_v3, 4 }
 0x292   : > { %v1002_v27 = vsel %vm775_vm8, %v6657_v29, %v1001_v14  ;;  %v3151_v29 = vsel %vm3087_vm9, %v2980_v24, 0.0  ;;  %v1050_v17 = vsel %vm775_vm8, 0.0, %v1049_v44  ;;  %v2981_v14 = vmul.f32 %v6996_v11, %v7017_v19 }
 0x293   : > { %3128 = vadd.xlane.f32.xlu2 %v3127_v33  ;;  %v967_v33 = vrot.slane %v7056_v23, 4  ;;  %v7144_v23 = vperm.slane %v1002_v27, %v6830_v54  ;;  %v1056_v7 = vsel %vm775_vm8, %v1055_v1, %v6278_v0  ;;  %v2994_v40 = vmul.f32 %v7106_v22, %v1050_v17 }
 0x294   : > { %v1069_v24 = vrot.slane %v6376_v18, 4  ;;  %v3154_v15 = vsel %vm3087_vm9, %v2981_v14, 0.0  ;;  %v1058_v18 = vsel %vm775_vm8, %v6443_v3, %v1057_v36  ;;  %v981_v44 = vrot.slane %v7052_v48, 4 }
 0x295   : > { %v968_v62 = vsel %vm775_vm8, %v967_v33, %v7031_v32  ;;  %v1079_v32 = vrot.slane %v7136_v35, 4  ;;  %v3193_v5 = vsel %vm3087_vm9, %v2994_v40, 0.0  ;;  %v994_v0 = vsel %vm775_vm8, 0.0, %v993_v53 }
 0x296   : > { %v974_v55 = vperm.slane %v968_v62, %v6858_v51  ;;  %v1070_v20 = vsel %vm775_vm8, %v6441_v61, %v1069_v24  ;;  %v1047_v24 = vrot.slane %v7114_v52, 4 }
 0x297   : > { %v1078_v61 = vperm.slane %v1070_v20, %v6830_v54 }
 0x298   : > { %3176 = vadd.xlane.f32.xlu0 %v3175_v21  ;;  %v7150_v21 = vperm.slane %v1014_v50, %v6830_v54  ;;  %v2983_v31 = vmul.f32 %v6996_v11, %v974_v55  ;;  %v991_v27 = vrot.slane %v974_v55, 4  ;;  %v7220_v52 = vpop.permute.xlu0 %2895 }
 0x299   : > { %3143 = vadd.xlane.f32.xlu1 %v3142_v6  ;;  %v1037_v6 = vrot.slane %v7144_v23, 4  ;;  %v1091_v17 = vrot.slane %v1078_v61, 4  ;;  %10444 = vst [vmem:[#allocation98_spill] sm:$0xff] %v7220_v52 }
 0x29a   : > { %v3160_v33 = vsel %vm3087_vm9, %v2983_v31, 0.0  ;;  %v992_v62 = vsel %vm775_vm8, 0.0, %v991_v27  ;;  %v1111_v27 = vrot.slane %v6511_v56, 4 }
 0x29b   : > { %3137 = vadd.xlane.f32.xlu2 %v3136_v26  ;;  %v7160_v26 = vperm.slane %v1056_v7, %v6830_v54  ;;  %v1038_v34 = vsel %vm775_vm8, %v7150_v21, %v1037_v6  ;;  %v2984_v7 = vmul.f32 %v6996_v11, %v992_v62  ;;  %v1123_v62 = vrot.slane %v6480_v46, 4 }
 0x29c   : > { %v7174_v19 = vperm.slane %v1038_v34, %v6858_v51 }
 0x29d   : > { %v1080_v1 = vsel %vm775_vm8, %v1079_v32, %v7160_v26  ;;  %v3163_v40 = vsel %vm3087_vm9, %v2984_v7, 0.0 }
 0x29e   : > { %v7180_v60 = vperm.slane %v1080_v1, %v6858_v51  ;;  %v2997_v50 = vmul.f32 %v7106_v22, %v7174_v19 }
 0x2a0   : > { %3185 = vadd.xlane.f32.xlu0 %v3184_v63  ;;  %v2986_v63 = vmul.f32 %v6996_v11, %v994_v0  ;;  %v1103_v3 = vrot.slane %v7180_v60, 4  ;;  %v3202_v48 = vsel %vm3087_vm9, %v2997_v50, 0.0  ;;  %v1048_v0 = vsel %vm775_vm8, 0.0, %v1047_v24 }
 0x2a1   : > { %3152 = vadd.xlane.f32.xlu1 %v3151_v29  ;;  %v1066_v29 = vperm.slane %v1058_v18, %v6830_v54  ;;  %v2993_v24 = vmul.f32 %v7106_v22, %v7118_v41 }
 0x2a2   : > { %v3169_v55 = vsel %vm3087_vm9, %v2986_v63, 0.0  ;;  %v1104_v31 = vsel %vm775_vm8, 0.0, %v1103_v3 }
 0x2a3   : > { %3146 = vadd.xlane.f32.xlu2 %v3145_v2  ;;  %v982_v2 = vsel %vm775_vm8, %v7045_v25, %v981_v44  ;;  %v1093_v32 = vrot.slane %v1066_v29, 4  ;;  %v3000_v14 = vmul.f32 %v7106_v22, %v1104_v31  ;;  %v2987_v25 = vmul.f32 %v6996_v11, %v7076_v9 }
 0x2a4   : > { %v990_v6 = vperm.slane %v982_v2, %v6858_v51  ;;  %v1035_v44 = vrot.slane %v7150_v21, 4 }
 0x2a5   : > { %v1094_v53 = vsel %vm775_vm8, %v1078_v61, %v1093_v32  ;;  %v3211_v1 = vsel %vm3087_vm9, %v3000_v14, 0.0  ;;  %v3172_v18 = vsel %vm3087_vm9, %v2987_v25, 0.0  ;;  %v2992_v61 = vmul.f32 %v7106_v22, %v1048_v0 }
 0x2a6   : > { %v2989_v34 = vmul.f32 %v6996_v11, %v990_v6  ;;  %v997_v9 = vrot.slane %v990_v6, 4 }
 0x2a8   : > { %3194 = vadd.xlane.f32.xlu0 %v3193_v5  ;;  %v1092_v5 = vsel %vm775_vm8, %v1091_v17, %v1066_v29  ;;  %v3178_v36 = vsel %vm3087_vm9, %v2989_v34, 0.0  ;;  %v1112_v29 = vsel %vm775_vm8, %v1111_v27, %v6320_v8  ;;  %v998_v21 = vsel %vm775_vm8, 0.0, %v997_v9 }
 0x2a9   : > { %3161 = vadd.xlane.f32.xlu1 %v3160_v33  ;;  %v1125_v33 = vrot.slane %v6539_v13, 4  ;;  %v7213_v20 = vperm.slane %v1092_v5, %v6858_v51  ;;  %v2990_v3 = vmul.f32 %v6996_v11, %v998_v21  ;;  %v1113_v17 = vrot.slane %v6320_v8, 4 }
 0x2aa   : > { %v7244_v32 = vperm.slane %v1112_v29, %v6830_v54  ;;  %v1053_v9 = vrot.slane %v7174_v19, 4 }
 0x2ab   : > { %3155 = vadd.xlane.f32.xlu2 %v3154_v15  ;;  %v7216_v15 = vperm.slane %v1094_v53, %v6858_v51  ;;  %v3003_v50 = vmul.f32 %v7106_v22, %v7213_v20  ;;  %v1126_v63 = vsel %vm775_vm8, %v6480_v46, %v1125_v33  ;;  %v1036_v46 = vsel %vm775_vm8, %v1035_v44, %v7144_v23 }
 0x2ac   : > { %v7237_v2 = vperm.slane %v1126_v63, %v6830_v54  ;;  %v3181_v14 = vsel %vm3087_vm9, %v2990_v3, 0.0  ;;  %v1042_v23 = vperm.slane %v1036_v46, %v6858_v51  ;;  %v1137_v53 = vrot.slane %v7244_v32, 4 }
 0x2ad   : > { %v1109_v7 = vrot.slane %v7216_v15, 4  ;;  %v1167_v63 = vrot.slane %v6537_v10, 4  ;;  %v1081_v3 = vrot.slane %v7160_v26, 4 }
 0x2ae   : > { %v1147_v8 = vrot.slane %v7237_v2, 4  ;;  %v2995_v5 = vmul.f32 %v7106_v22, %v1042_v23 }
 0x2af   : > { %v1110_v6 = vsel %vm775_vm8, 0.0, %v1109_v7  ;;  %v1054_v7 = vsel %vm775_vm8, 0.0, %v1053_v9  ;;  %v1168_v46 = vsel %vm775_vm8, %v1167_v63, %v6362_v16  ;;  %v2999_v9 = vmul.f32 %v7106_v22, %v7180_v60 }
 0x2b0   : > { %3203 = vadd.xlane.f32.xlu0 %v3202_v48  ;;  %v1124_v48 = vsel %vm775_vm8, %v1123_v62, %v6539_v13  ;;  %v1114_v13 = vsel %vm775_vm8, %v6511_v56, %v1113_v17  ;;  %v3006_v25 = vmul.f32 %v7106_v22, %v1110_v6  ;;  %v2819_v56 = vrot.slane %v7106_v22, 4 }
 0x2b1   : > { %3170 = vadd.xlane.f32.xlu1 %v3169_v55  ;;  %v3220_v55 = vsel %vm3087_vm9, %v3003_v50, 0.0  ;;  %v7251_v31 = vperm.slane %v1124_v48, %v6830_v54  ;;  %v3196_v44 = vsel %vm3087_vm9, %v2995_v5, 0.0  ;;  %v1051_v50 = vrot.slane %v1042_v23, 4 }
 0x2b2   : > { %v3229_v27 = vsel %vm3087_vm9, %v3006_v25, 0.0  ;;  %v7276_v0 = vsel %vm775_vm8, 0.0, %v2819_v56  ;;  %v2998_v48 = vmul.f32 %v7106_v22, %v1054_v7  ;;  %v1174_v23 = vperm.slane %v1168_v46, %v6830_v54 }
 0x2b3   : > { %3164 = vadd.xlane.f32.xlu2 %v3163_v40  ;;  %v3187_v40 = vsel %vm3087_vm9, %v2992_v61, 0.0  ;;  %v1138_v33 = vsel %vm775_vm8, %v7251_v31, %v1137_v53  ;;  %v3190_v61 = vsel %vm3087_vm9, %v2993_v24, 0.0  ;;  %v1135_v60 = vrot.slane %v7251_v31, 4 }
 0x2b4   : > { %v7279_v41 = vperm.slane %v1138_v33, %v6858_v51  ;;  %v3205_v26 = vsel %vm3087_vm9, %v2998_v48, 0.0  ;;  %v7312_v33 = vpop.permute.xlu1 %2891 }
 0x2b5   : > { %10445 = vst [vmem:[#allocation99_spill] sm:$0xff] %v7312_v33 }
 0x2b6   : > { %v3009_v21 = vmul.f32 %v7276_v0, %v7279_v41 }
 0x2b8   : > { %3212 = vadd.xlane.f32.xlu0 %v3211_v1  ;;  %v7263_v1 = vperm.slane %v1114_v13, %v6830_v54  ;;  %v3238_v13 = vsel %vm3087_vm9, %v3009_v21, 0.0 }
 0x2b9   : > { %3179 = vadd.xlane.f32.xlu1 %v3178_v36  ;;  %v1179_v36 = vrot.slane %v6611_v42, 4 }
 0x2bb   : > { %3173 = vadd.xlane.f32.xlu2 %v3172_v18  ;;  %v1148_v18 = vsel %vm775_vm8, %v1147_v8, %v7263_v1  ;;  %v1180_v62 = vsel %vm775_vm8, %v1179_v36, %v6585_v37  ;;  %v1193_v36 = vrot.slane %v1174_v23, 4 }
 0x2bc   : > { %v7284_v19 = vperm.slane %v1148_v18, %v6858_v51  ;;  %v1186_v17 = vperm.slane %v1180_v62, %v6830_v54 }
 0x2be   : > { %v1163_v6 = vrot.slane %v7284_v19, 4  ;;  %v1191_v53 = vrot.slane %v1186_v17, 4  ;;  %v1194_v63 = vsel %vm775_vm8, %v1186_v17, %v1193_v36 }
 0x2bf   : > { %v7331_v48 = vperm.slane %v1194_v63, %v6858_v51 }
 0x2c0   : > { %3221 = vadd.xlane.f32.xlu0 %v3220_v55  ;;  %v1052_v55 = vsel %vm775_vm8, 0.0, %v1051_v50  ;;  %v1164_v25 = vsel %vm775_vm8, 0.0, %v1163_v6  ;;  %v1192_v18 = vsel %vm775_vm8, %v1191_v53, %v1174_v23  ;;  %v1107_v50 = vrot.slane %v7213_v20, 4  ;;  %v7341_v6 = vpop.permute.xlu1 %2897 }
 0x2c1   : > { %3188 = vadd.xlane.f32.xlu1 %v3187_v40  ;;  %v2996_v40 = vmul.f32 %v7106_v22, %v1052_v55  ;;  %v3012_v24 = vmul.f32 %v7276_v0, %v1164_v25  ;;  %v7326_v21 = vperm.slane %v1192_v18, %v6858_v51  ;;  %v1169_v20 = vrot.slane %v6362_v16, 4  ;;  %10447 = vst [vmem:[#allocation101_spill] sm:$0xff] %v7341_v6 }
 0x2c2   : > { %v1108_v17 = vsel %vm775_vm8, 0.0, %v1107_v50  ;;  %v1181_v16 = vrot.slane %v6585_v37, 4  ;;  %v1217_v25 = vrot.slane %v7331_v48, 4 }
 0x2c3   : > { %3182 = vadd.xlane.f32.xlu2 %v3181_v14  ;;  %v7256_v34 = vpop.xlane.xlu0 %3092  ;;  %v1082_v14 = vsel %vm775_vm8, %v7136_v35, %v1081_v3  ;;  %v3199_v8 = vsel %vm3087_vm9, %v2996_v40, 0.0  ;;  %v3208_v3 = vsel %vm3087_vm9, %v2999_v9, 0.0  ;;  %v3015_v46 = vmul.f32 %v7276_v0, %v7326_v21 }
 0x2c4   : > { %v1090_v5 = vperm.slane %v1082_v14, %v6858_v51  ;;  %v3004_v31 = vmul.f32 %v7106_v22, %v1108_v17  ;;  %v1182_v53 = vsel %vm775_vm8, %v6611_v42, %v1181_v16  ;;  %v1218_v18 = vsel %vm775_vm8, 0.0, %v1217_v25 }
 0x2c5   : > { %v3256_v37 = vsel %vm3087_vm9, %v3015_v46, 0.0  ;;  %v7367_v9 = vperm.slane %v1182_v53, %v6830_v54  ;;  %v3018_v63 = vmul.f32 %v7276_v0, %v1218_v18  ;;  %v1225_v53 = vrot.slane %v6428_v47, 4 }
 0x2c6   : > { %v3001_v35 = vmul.f32 %v7106_v22, %v1090_v5  ;;  %v1105_v7 = vrot.slane %v1090_v5, 4  ;;  %v1136_v5 = vsel %vm775_vm8, %v1135_v60, %v7244_v32 }
 0x2c7   : > { %v1142_v36 = vperm.slane %v1136_v5, %v6858_v51  ;;  %v3265_v17 = vsel %vm3087_vm9, %v3018_v63, 0.0 }
 0x2c8   : > { %3230 = vadd.xlane.f32.xlu0 %v3229_v27  ;;  %v7315_v27 = vpop.permute.xlu2 %2893  ;;  %v3214_v62 = vsel %vm3087_vm9, %v3001_v35, 0.0  ;;  %v1106_v14 = vsel %vm775_vm8, 0.0, %v1105_v7  ;;  %v3223_v35 = vsel %vm3087_vm9, %v3004_v31, 0.0 }
 0x2c9   : > { %3197 = vadd.xlane.f32.xlu1 %v3196_v44  ;;  %10446 = vst [vmem:[#allocation100_spill] sm:$0xff] %v7315_v27  ;;  %v3247_v44 = vsel %vm3087_vm9, %v3012_v24, 0.0  ;;  %v3007_v7 = vmul.f32 %v7276_v0, %v1142_v36 }
 0x2cb   : > { %3191 = vadd.xlane.f32.xlu2 %v3190_v61  ;;  %v7288_v29 = vpop.xlane.xlu0 %3104  ;;  %v1235_v61 = vrot.slane %v6667_v30, 4  ;;  %v3232_v16 = vsel %vm3087_vm9, %v3007_v7, 0.0 }
 0x2cd   : > { %v1236_v40 = vsel %vm775_vm8, %v1235_v61, %v6595_v39 }
 0x2d0   : > { %3239 = vadd.xlane.f32.xlu0 %v3238_v13  ;;  %v1170_v13 = vsel %vm775_vm8, %v6537_v10, %v1169_v20  ;;  %v7358_v10 = vperm.slane %v1236_v40, %v6830_v54  ;;  %v3005_v20 = vmul.f32 %v7106_v22, %v7216_v15  ;;  %v1161_v40 = vrot.slane %v7279_v41, 4 }
 0x2d1   : > { %3206 = vadd.xlane.f32.xlu1 %v3205_v26  ;;  %v1223_v26 = vrot.slane %v6659_v28, 4  ;;  %v7362_v24 = vperm.slane %v1170_v13, %v6830_v54  ;;  %v2805_v13 = vrot.slane %v6868_v12, 4 }
 0x2d3   : > { %3200 = vadd.xlane.f32.xlu2 %v3199_v8  ;;  %v7309_v56 = vpop.xlane.xlu0 %3113  ;;  %v3002_v8 = vmul.f32 %v7106_v22, %v1106_v14  ;;  %v1224_v42 = vsel %vm775_vm8, %v1223_v26, %v6428_v47  ;;  %v1205_v61 = vrot.slane %v7362_v24, 4  ;;  %v1237_v14 = vrot.slane %v6595_v39, 4 }
 0x2d4   : > { %v7382_v60 = vperm.slane %v1224_v42, %v6830_v54  ;;  %v1159_v26 = vrot.slane %v1142_v36, 4  ;;  %v1162_v39 = vsel %vm775_vm8, 0.0, %v1161_v40  ;;  %v1149_v42 = vrot.slane %v7263_v1, 4 }
 0x2d5   : > { %v3217_v32 = vsel %vm3087_vm9, %v3002_v8, 0.0  ;;  %v1206_v46 = vsel %vm775_vm8, %v7367_v9, %v1205_v61  ;;  %v3226_v8 = vsel %vm3087_vm9, %v3005_v20, 0.0  ;;  %v1238_v41 = vsel %vm775_vm8, %v6667_v30, %v1237_v14 }
 0x2d6   : > { %v7398_v15 = vperm.slane %v1206_v46, %v6858_v51  ;;  %v3010_v36 = vmul.f32 %v7276_v0, %v1162_v39  ;;  %v1160_v30 = vsel %vm775_vm8, 0.0, %v1159_v26  ;;  %v1246_v18 = vperm.slane %v1238_v41, %v6830_v54 }
 0x2d7   : > { %v3008_v47 = vmul.f32 %v7276_v0, %v1160_v30  ;;  %v1150_v1 = vsel %vm775_vm8, %v7237_v2, %v1149_v42 }
 0x2d8   : > { %3248 = vadd.xlane.f32.xlu0 %v3247_v44  ;;  %v1247_v44 = vrot.slane %v7358_v10, 4  ;;  %v3021_v5 = vmul.f32 %v7276_v0, %v7398_v15  ;;  %v3241_v7 = vsel %vm3087_vm9, %v3010_v36, 0.0  ;;  %v1259_v20 = vrot.slane %v1246_v18, 4 }
 0x2d9   : > { %3215 = vadd.xlane.f32.xlu1 %v3214_v62  ;;  %v3235_v46 = vsel %vm3087_vm9, %v3008_v47, 0.0  ;;  %v1158_v40 = vperm.slane %v1150_v1, %v6858_v51  ;;  %v1293_v36 = vrot.slane %v6483_v49, 4 }
 0x2da   : > { %v1248_v31 = vsel %vm775_vm8, %v1247_v44, %v7382_v60  ;;  %v3274_v61 = vsel %vm3087_vm9, %v3021_v5, 0.0  ;;  %v1279_v5 = vrot.slane %v6478_v45, 4 }
 0x2db   : > { %3209 = vadd.xlane.f32.xlu2 %v3208_v3  ;;  %v7334_v55 = vpop.xlane.xlu0 %3122  ;;  %v7402_v25 = vperm.slane %v1248_v31, %v6858_v51  ;;  %v3013_v2 = vmul.f32 %v7276_v0, %v1158_v40 }
 0x2dd   : > { %v1271_v63 = vrot.slane %v7402_v25, 4  ;;  %v3250_v42 = vsel %vm3087_vm9, %v3013_v2, 0.0 }
 0x2de   : > { %v7349_v23 = vpop.xlane.xlu2 %3089 }
 0x2e0   : > { %3257 = vadd.xlane.f32.xlu0 %v3256_v37  ;;  %v2806_v37 = vsel %vm775_vm8, %v2805_v13, %v6854_v43 }
 0x2e1   : > { %3224 = vadd.xlane.f32.xlu1 %v3223_v35  ;;  %v7427_v43 = vperm.slane %v2806_v37, %v6858_v51 }
 0x2e3   : > { %3218 = vadd.xlane.f32.xlu2 %v3217_v32  ;;  %v7374_v50 = vpop.xlane.xlu0 %3131  ;;  %v1226_v32 = vsel %vm775_vm8, %v6659_v28, %v1225_v53  ;;  %v1215_v53 = vrot.slane %v7326_v21, 4  ;;  %v1280_v21 = vsel %vm775_vm8, %v1279_v5, %v6302_v4 }
 0x2e4   : > { %v7378_v62 = vpop.xlane.xlu1 %3095  ;;  %v1234_v28 = vperm.slane %v1226_v32, %v6830_v54 }
 0x2e5   : > { %v1216_v1 = vsel %vm775_vm8, 0.0, %v1215_v53 }
 0x2e6   : > { %v7384_v3 = vpop.xlane.xlu2 %3098  ;;  %v1261_v14 = vrot.slane %v1234_v28, 4  ;;  %v1260_v41 = vsel %vm775_vm8, %v1259_v20, %v1234_v28  ;;  %v3016_v20 = vmul.f32 %v7276_v0, %v1216_v1  ;;  %v3017_v1 = vmul.f32 %v7276_v0, %v7331_v48 }
 0x2e7   : > { %v7455_v30 = vperm.slane %v1260_v41, %v6858_v51 }
 0x2e8   : > { %3266 = vadd.xlane.f32.xlu0 %v3265_v17  ;;  %v1272_v17 = vsel %vm775_vm8, 0.0, %v1271_v63  ;;  %v1262_v37 = vsel %vm775_vm8, %v1246_v18, %v1261_v14  ;;  %v1203_v18 = vrot.slane %v7367_v9, 4  ;;  %v7477_v9 = vperm.slane %v1280_v21, %v6830_v54 }
 0x2e9   : > { %3233 = vadd.xlane.f32.xlu1 %v3232_v16  ;;  %v3024_v13 = vmul.f32 %v7427_v43, %v1272_v17  ;;  %v7459_v47 = vperm.slane %v1262_v37, %v6858_v51  ;;  %v1281_v17 = vrot.slane %v6302_v4, 4  ;;  %v1291_v14 = vrot.slane %v6439_v58, 4 }
 0x2ea   : > { %v1204_v5 = vsel %vm775_vm8, %v1203_v18, %v7362_v24  ;;  %v3259_v4 = vsel %vm3087_vm9, %v3016_v20, 0.0  ;;  %v1347_v20 = vrot.slane %v6587_v38, 4 }
 0x2eb   : > { %3227 = vadd.xlane.f32.xlu2 %v3226_v8  ;;  %v7406_v12 = vpop.xlane.xlu0 %3140  ;;  %v3011_v8 = vmul.f32 %v7276_v0, %v7284_v19  ;;  %v3283_v39 = vsel %vm3087_vm9, %v3024_v13, 0.0  ;;  %v1165_v19 = vrot.slane %v1158_v40, 4  ;;  %v1277_v2 = vrot.slane %v7459_v47, 4 }
 0x2ec   : > { %v7414_v35 = vpop.xlane.xlu1 %3107  ;;  %v1292_v53 = vsel %vm775_vm8, %v1291_v14, %v6483_v49 }
 0x2ed   : > { %v3244_v32 = vsel %vm3087_vm9, %v3011_v8, 0.0  ;;  %v1278_v37 = vsel %vm775_vm8, 0.0, %v1277_v2 }
 0x2ee   : > { %v7422_v44 = vpop.xlane.xlu2 %3101 }
 0x2f0   : > { %3275 = vadd.xlane.f32.xlu0 %v3274_v61  ;;  %v3027_v61 = vmul.f32 %v7427_v43, %v7455_v30 }
 0x2f1   : > { %3242 = vadd.xlane.f32.xlu1 %v3241_v7  ;;  %v1294_v7 = vsel %vm775_vm8, %v6439_v58, %v1293_v36  ;;  %v1210_v36 = vperm.slane %v1204_v5, %v6858_v51  ;;  %v3262_v5 = vsel %vm3087_vm9, %v3017_v1, 0.0 }
 0x2f2   : > { %v7485_v8 = vperm.slane %v1294_v7, %v6830_v54  ;;  %v3292_v41 = vsel %vm3087_vm9, %v3027_v61, 0.0 }
 0x2f3   : > { %3236 = vadd.xlane.f32.xlu2 %v3235_v46  ;;  %v7437_v31 = vpop.xlane.xlu0 %3149  ;;  %v1166_v46 = vsel %vm775_vm8, 0.0, %v1165_v19  ;;  %v3019_v21 = vmul.f32 %v7276_v0, %v1210_v36  ;;  %v1219_v48 = vrot.slane %v1210_v36, 4 }
 0x2f4   : > { %10448 = vst [vmem:[#allocation102_spill] sm:$0xff] %v7437_v31  ;;  %v7440_v16 = vpop.xlane.xlu1 %3116  ;;  %v3014_v13 = vmul.f32 %v7276_v0, %v1166_v46  ;;  %v1315_v24 = vrot.slane %v7485_v8, 4  ;;  %v10518_v31 = vld [vmem:[#allocation95_spill] sm:$0xff] }
 0x2f5   : > { %v3268_v2 = vsel %vm3087_vm9, %v3019_v21, 0.0  ;;  %v10453_v21 = vld [vmem:[#allocation6_spill] sm:$0xff] }
 0x2f6   : > { %v7443_v26 = vpop.xlane.xlu2 %3110  ;;  %v3253_v58 = vsel %vm3087_vm9, %v3014_v13, 0.0 }
 0x2f8   : > { %3284 = vadd.xlane.f32.xlu0 %v3283_v39  ;;  %v1282_v39 = vsel %vm775_vm8, %v6478_v45, %v1281_v17  ;;  %v7504_v45 = vperm.slane %v1292_v53, %v6830_v54  ;;  %v1221_v17 = vrot.slane %v7398_v15, 4 }
 0x2f9   : > { %3251 = vadd.xlane.f32.xlu1 %v3250_v42  ;;  %v1305_v42 = vrot.slane %v7477_v9, 4  ;;  %v7510_v18 = vperm.slane %v1282_v39, %v6830_v54  ;;  %v10451_v39 = vld [vmem:[#allocation21_spill] sm:$0xff] }
 0x2fa   : > { %v1348_v15 = vsel %vm775_vm8, %v1347_v20, %v10451_v39 }
 0x2fb   : > { %3245 = vadd.xlane.f32.xlu2 %v3244_v32  ;;  %v7464_v63 = vpop.xlane.xlu0 %3158  ;;  %v3030_v32 = vmul.f32 %v7427_v43, %v1278_v37  ;;  %v1306_v7 = vsel %vm775_vm8, %v7504_v45, %v1305_v42  ;;  %v1316_v13 = vsel %vm775_vm8, %v1315_v24, %v7510_v18  ;;  %v1222_v37 = vsel %vm775_vm8, 0.0, %v1221_v17 }
 0x2fc   : > { %10449 = vst [vmem:[#allocation103_spill] sm:$0xff] %v7464_v63  ;;  %v7471_v28 = vpop.xlane.xlu1 %3125  ;;  %v7525_v14 = vperm.slane %v1306_v7, %v6858_v51  ;;  %v3022_v36 = vmul.f32 %v7276_v0, %v1222_v37  ;;  %v1220_v24 = vsel %vm775_vm8, 0.0, %v1219_v48  ;;  %v1354_v7 = vperm.slane %v1348_v15, %v6830_v54 }
 0x2fd   : > { %v3301_v46 = vsel %vm3087_vm9, %v3030_v32, 0.0  ;;  %v1249_v32 = vrot.slane %v7382_v60, 4 }
 0x2fe   : > { %v7479_v40 = vpop.xlane.xlu2 %3119  ;;  %v3277_v48 = vsel %vm3087_vm9, %v3022_v36, 0.0  ;;  %v1359_v37 = vrot.slane %v1354_v7, 4  ;;  %v2821_v36 = vrot.slane %v7427_v43, 4 }
 0x300   : > { %3293 = vadd.xlane.f32.xlu0 %v3292_v41  ;;  %v1335_v41 = vrot.slane %v6513_v57, 4  ;;  %v7577_v27 = vsel %vm775_vm8, 0.0, %v2821_v36  ;;  %v10458_v36 = vld [vmem:[#allocation25_spill] sm:$0xff] }
 0x301   : > { %3260 = vadd.xlane.f32.xlu1 %v3259_v4  ;;  %v7530_v4 = vperm.slane %v1316_v13, %v6858_v51 }
 0x302   : > { %v1336_v1 = vsel %vm775_vm8, %v1335_v41, %v10453_v21 }
 0x303   : > { %3254 = vadd.xlane.f32.xlu2 %v3253_v58  ;;  %v7500_v19 = vpop.xlane.xlu0 %3167  ;;  %v3033_v58 = vmul.f32 %v7427_v43, %v7525_v14  ;;  %v1331_v13 = vrot.slane %v7530_v4, 4  ;;  %v1342_v60 = vperm.slane %v1336_v1, %v6830_v54 }
 0x304   : > { %10450 = vst [vmem:[#allocation104_spill] sm:$0xff] %v7500_v19  ;;  %v7506_v49 = vpop.xlane.xlu1 %3134 }
 0x305   : > { %v3310_v17 = vsel %vm3087_vm9, %v3033_v58, 0.0 }
 0x306   : > { %v7512_v61 = vpop.xlane.xlu2 %3128 }
 0x308   : > { %3302 = vadd.xlane.f32.xlu0 %v3301_v46  ;;  %v3020_v46 = vmul.f32 %v7276_v0, %v1220_v24 }
 0x309   : > { %3269 = vadd.xlane.f32.xlu1 %v3268_v2  ;;  %v1250_v2 = vsel %vm775_vm8, %v7358_v10, %v1249_v32  ;;  %v1361_v32 = vrot.slane %v1342_v60, 4 }
 0x30a   : > { %v3271_v41 = vsel %vm3087_vm9, %v3020_v46, 0.0  ;;  %v1258_v15 = vperm.slane %v1250_v2, %v6858_v51  ;;  %v3023_v46 = vmul.f32 %v7427_v43, %v7402_v25  ;;  %v1275_v2 = vrot.slane %v7455_v30, 4 }
 0x30b   : > { %3263 = vadd.xlane.f32.xlu2 %v3262_v5  ;;  %v7534_v53 = vpop.xlane.xlu0 %3176  ;;  %v1332_v5 = vsel %vm775_vm8, 0.0, %v1331_v13  ;;  %v1360_v13 = vsel %vm775_vm8, %v1359_v37, %v1342_v60  ;;  %v1303_v60 = vrot.slane %v7504_v45, 4 }
 0x30c   : > { %10452 = vst [vmem:[#allocation21_spill] sm:$0xff] %v7534_v53  ;;  %v7539_v42 = vpop.xlane.xlu1 %3143  ;;  %v3036_v58 = vmul.f32 %v7427_v43, %v1332_v5  ;;  %v3025_v10 = vmul.f32 %v7427_v43, %v1258_v15  ;;  %v7580_v6 = vperm.slane %v1360_v13, %v6858_v51  ;;  %v1273_v25 = vrot.slane %v1258_v15, 4 }
 0x30d   : > { %v3280_v37 = vsel %vm3087_vm9, %v3023_v46, 0.0 }
 0x30e   : > { %v7547_v20 = vpop.xlane.xlu2 %3137  ;;  %v3286_v52 = vsel %vm3087_vm9, %v3025_v10, 0.0  ;;  %v3039_v10 = vmul.f32 %v7577_v27, %v7580_v6  ;;  %v1274_v13 = vsel %vm775_vm8, 0.0, %v1273_v25 }
 0x310   : > { %3311 = vadd.xlane.f32.xlu0 %v3310_v17  ;;  %v3319_v17 = vsel %vm3087_vm9, %v3036_v58, 0.0 }
 0x311   : > { %3278 = vadd.xlane.f32.xlu1 %v3277_v48  ;;  %v1362_v48 = vsel %vm775_vm8, %v1354_v7, %v1361_v32  ;;  %v1337_v7 = vrot.slane %v10453_v21, 4  ;;  %v1349_v21 = vrot.slane %v10451_v39, 4  ;;  %v3328_v39 = vsel %vm3087_vm9, %v3039_v10, 0.0 }
 0x312   : > { %v7585_v30 = vperm.slane %v1362_v48, %v6858_v51 }
 0x313   : > { %3272 = vadd.xlane.f32.xlu2 %v3271_v41  ;;  %v7559_v24 = vpop.xlane.xlu0 %3185  ;;  %v10456_v41 = vld [vmem:[#allocation34_spill] sm:$0xff]  ;;  %v1338_v46 = vsel %vm775_vm8, %v6513_v57, %v1337_v7 }
 0x314   : > { %10454 = vst [vmem:[#allocation6_spill] sm:$0xff] %v7559_v24  ;;  %v7562_v33 = vpop.xlane.xlu1 %3152  ;;  %v1403_v5 = vrot.slane %v10456_v41, 4  ;;  %v7616_v25 = vperm.slane %v1338_v46, %v6830_v54 }
 0x315   : > { %10455 = vst [vmem:[#allocation105_spill] sm:$0xff] %v7562_v33 }
 0x316   : > { %v7566_v1 = vpop.xlane.xlu2 %3146  ;;  %v1404_v15 = vsel %vm775_vm8, %v1403_v5, %v10458_v36  ;;  %v1304_v5 = vsel %vm775_vm8, %v1303_v60, %v7477_v9  ;;  %v10462_v9 = vld [vmem:[#allocation8_spill] sm:$0xff] }
 0x317   : > { %v7612_v57 = vperm.slane %v1404_v15, %v6830_v54 }
 0x318   : > { %3320 = vadd.xlane.f32.xlu0 %v3319_v17  ;;  %v10460_v17 = vld [vmem:[#allocation36_spill] sm:$0xff] }
 0x319   : > { %3287 = vadd.xlane.f32.xlu1 %v3286_v52  ;;  %v1276_v52 = vsel %vm775_vm8, 0.0, %v1275_v2  ;;  %v1391_v48 = vrot.slane %v10460_v17, 4  ;;  %v3026_v2 = vmul.f32 %v7427_v43, %v1274_v13  ;;  %v1310_v13 = vperm.slane %v1304_v5, %v6858_v51 }
 0x31a   : > { %v3028_v45 = vmul.f32 %v7427_v43, %v1276_v52  ;;  %v1350_v52 = vsel %vm775_vm8, %v6587_v38, %v1349_v21  ;;  %v1415_v10 = vrot.slane %v7612_v57, 4  ;;  %v1373_v21 = vrot.slane %v7616_v25, 4 }
 0x31b   : > { %3281 = vadd.xlane.f32.xlu2 %v3280_v37  ;;  %v7588_v58 = vpop.xlane.xlu0 %3194  ;;  %v7621_v24 = vperm.slane %v1350_v52, %v6830_v54  ;;  %v1392_v38 = vsel %vm775_vm8, %v1391_v48, %v10462_v9  ;;  %v3289_v60 = vsel %vm3087_vm9, %v3026_v2, 0.0  ;;  %v3031_v52 = vmul.f32 %v7427_v43, %v1310_v13 }
 0x31c   : > { %10457 = vst [vmem:[#allocation34_spill] sm:$0xff] %v7588_v58  ;;  %v7595_v32 = vpop.xlane.xlu1 %3161  ;;  %v1385_v58 = vrot.slane %v7585_v30, 4  ;;  %v3295_v7 = vsel %vm3087_vm9, %v3028_v45, 0.0 }
 0x31d   : > { %10459 = vst [vmem:[#allocation25_spill] sm:$0xff] %v7595_v32  ;;  %v1374_v2 = vsel %vm775_vm8, %v7621_v24, %v1373_v21 }
 0x31e   : > { %v7603_v37 = vpop.xlane.xlu2 %3155  ;;  %v1386_v15 = vsel %vm775_vm8, 0.0, %v1385_v58  ;;  %v3029_v58 = vmul.f32 %v7427_v43, %v7459_v47  ;;  %v1327_v47 = vrot.slane %v1310_v13, 4 }
 0x31f   : > { %10461 = vst [vmem:[#allocation36_spill] sm:$0xff] %v7603_v37  ;;  %v3042_v45 = vmul.f32 %v7577_v27, %v1386_v15  ;;  %v1393_v37 = vrot.slane %v10462_v9, 4 }
 0x320   : > { %3329 = vadd.xlane.f32.xlu0 %v3328_v39  ;;  %v7636_v39 = vperm.slane %v1392_v38, %v6830_v54  ;;  %v1405_v38 = vrot.slane %v10458_v36, 4  ;;  %v3298_v21 = vsel %vm3087_vm9, %v3029_v58, 0.0 }
 0x321   : > { %3296 = vadd.xlane.f32.xlu1 %v3295_v7  ;;  %v3337_v7 = vsel %vm3087_vm9, %v3042_v45, 0.0  ;;  %v1394_v9 = vsel %vm775_vm8, %v10460_v17, %v1393_v37 }
 0x322   : > { %v1416_v15 = vsel %vm775_vm8, %v1415_v10, %v7636_v39  ;;  %v1406_v10 = vsel %vm775_vm8, %v10456_v41, %v1405_v38  ;;  %v1402_v38 = vperm.slane %v1394_v9, %v6830_v54 }
 0x323   : > { %3290 = vadd.xlane.f32.xlu2 %v3289_v60  ;;  %v7628_v46 = vpop.xlane.xlu0 %3203  ;;  %v1329_v60 = vrot.slane %v7525_v14, 4  ;;  %v7656_v45 = vperm.slane %v1416_v15, %v6858_v51  ;;  %v1317_v14 = vrot.slane %v7510_v18, 4  ;;  %v1328_v18 = vsel %vm775_vm8, 0.0, %v1327_v47 }
 0x324   : > { %10463 = vst [vmem:[#allocation8_spill] sm:$0xff] %v7628_v46  ;;  %v7632_v5 = vpop.xlane.xlu1 %3170  ;;  %v3304_v46 = vsel %vm3087_vm9, %v3031_v52, 0.0 }
 0x325   : > { %10464 = vst [vmem:[#allocation106_spill] sm:$0xff] %v7632_v5  ;;  %v7651_v5 = vperm.slane %v1374_v2, %v6858_v51  ;;  %v1330_v13 = vsel %vm775_vm8, 0.0, %v1329_v60  ;;  %v1414_v2 = vperm.slane %v1406_v10, %v6830_v54  ;;  %v1439_v15 = vrot.slane %v7656_v45, 4 }
 0x326   : > { %v7638_v48 = vpop.xlane.xlu2 %3164  ;;  %v3034_v58 = vmul.f32 %v7427_v43, %v1330_v13  ;;  %v1318_v17 = vsel %vm775_vm8, %v7485_v8, %v1317_v14 }
 0x327   : > { %v3045_v36 = vmul.f32 %v7577_v27, %v7651_v5  ;;  %v1427_v47 = vrot.slane %v1414_v2, 4  ;;  %v1440_v10 = vsel %vm775_vm8, 0.0, %v1439_v15  ;;  %v1326_v13 = vperm.slane %v1318_v17, %v6858_v51  ;;  %v10471_v15 = vld [vmem:[#allocation40_spill] sm:$0xff] }
 0x328   : > { %3338 = vadd.xlane.f32.xlu0 %v3337_v7  ;;  %v3032_v7 = vmul.f32 %v7427_v43, %v1328_v18  ;;  %v3313_v37 = vsel %vm3087_vm9, %v3034_v58, 0.0  ;;  %v1429_v18 = vrot.slane %v1402_v38, 4  ;;  %v3035_v58 = vmul.f32 %v7427_v43, %v7530_v4 }
 0x329   : > { %3305 = vadd.xlane.f32.xlu1 %v3304_v46  ;;  %v3346_v60 = vsel %vm3087_vm9, %v3045_v36, 0.0  ;;  %v3048_v36 = vmul.f32 %v7577_v27, %v1440_v10  ;;  %v3037_v8 = vmul.f32 %v7427_v43, %v1326_v13  ;;  %v10472_v10 = vld [vmem:[#allocation42_spill] sm:$0xff]  ;;  %v1333_v4 = vrot.slane %v1326_v13, 4 }
 0x32b   : > { %3299 = vadd.xlane.f32.xlu2 %v3298_v21  ;;  %v7661_v52 = vpop.xlane.xlu0 %3212  ;;  %v3307_v21 = vsel %vm3087_vm9, %v3032_v7, 0.0  ;;  %v1428_v7 = vsel %vm775_vm8, %v1427_v47, %v1402_v38  ;;  %v3355_v17 = vsel %vm3087_vm9, %v3048_v36, 0.0  ;;  %v1371_v38 = vrot.slane %v7621_v24, 4 }
 0x32c   : > { %10465 = vst [vmem:[#allocation107_spill] sm:$0xff] %v7661_v52  ;;  %v7668_v46 = vpop.xlane.xlu1 %3179  ;;  %v3316_v47 = vsel %vm3087_vm9, %v3035_v58, 0.0 }
 0x32d   : > { %10466 = vst [vmem:[#allocation108_spill] sm:$0xff] %v7668_v46  ;;  %v3322_v46 = vsel %vm3087_vm9, %v3037_v8, 0.0 }
 0x32e   : > { %v7673_v41 = vpop.xlane.xlu2 %3173 }
 0x32f   : > { %10467 = vst [vmem:[#allocation109_spill] sm:$0xff] %v7673_v41 }
 0x330   : > { %3347 = vadd.xlane.f32.xlu0 %v3346_v60  ;;  %v1447_v60 = vrot.slane %v10471_v15, 4 }
 0x331   : > { %3314 = vadd.xlane.f32.xlu1 %v3313_v37  ;;  %v1383_v37 = vrot.slane %v7580_v6, 4  ;;  %v10473_v6 = vld [vmem:[#allocation14_spill] sm:$0xff] }
 0x333   : > { %3308 = vadd.xlane.f32.xlu2 %v3307_v21  ;;  %v7685_v52 = vpop.xlane.xlu0 %3221  ;;  %v1430_v21 = vsel %vm775_vm8, %v1414_v2, %v1429_v18  ;;  %v1448_v2 = vsel %vm775_vm8, %v1447_v60, %v10473_v6  ;;  %v1384_v8 = vsel %vm775_vm8, 0.0, %v1383_v37  ;;  %v1372_v37 = vsel %vm775_vm8, %v1371_v38, %v7616_v25 }
 0x334   : > { %10468 = vst [vmem:[#allocation110_spill] sm:$0xff] %v7685_v52  ;;  %v7688_v9 = vpop.xlane.xlu1 %3188  ;;  %v1461_v52 = vrot.slane %v10472_v10, 4  ;;  %v7708_v36 = vperm.slane %v1430_v21, %v6858_v51  ;;  %v3040_v58 = vmul.f32 %v7577_v27, %v1384_v8  ;;  %v7724_v21 = vperm.slane %v1448_v2, %v6830_v54 }
 0x335   : > { %10469 = vst [vmem:[#allocation111_spill] sm:$0xff] %v7688_v9 }
 0x336   : > { %v7691_v14 = vpop.xlane.xlu2 %3182  ;;  %v3331_v2 = vsel %vm3087_vm9, %v3040_v58, 0.0 }
 0x337   : > { %10470 = vst [vmem:[#allocation112_spill] sm:$0xff] %v7691_v14  ;;  %v7703_v14 = vperm.slane %v1428_v7, %v6858_v51  ;;  %v10475_v7 = vld [vmem:[#allocation35_spill] sm:$0xff] }
 0x338   : > { %3356 = vadd.xlane.f32.xlu0 %v3355_v17  ;;  %v1462_v13 = vsel %vm775_vm8, %v10475_v7, %v1461_v52  ;;  %v1334_v17 = vsel %vm775_vm8, 0.0, %v1333_v4  ;;  %v1459_v52 = vrot.slane %v10475_v7, 4  ;;  %v1449_v4 = vrot.slane %v10473_v6, 4 }
 0x339   : > { %3323 = vadd.xlane.f32.xlu1 %v3322_v46  ;;  %v3051_v46 = vmul.f32 %v7577_v27, %v7703_v14 }
 0x33a   : > { %v1450_v25 = vsel %vm775_vm8, %v10471_v15, %v1449_v4  ;;  %v3041_v4 = vmul.f32 %v7577_v27, %v7585_v30 }
 0x33b   : > { %3317 = vadd.xlane.f32.xlu2 %v3316_v47  ;;  %v7712_v18 = vpop.xlane.xlu0 %3230  ;;  %v3038_v47 = vmul.f32 %v7427_v43, %v1334_v17  ;;  %v3364_v8 = vsel %vm3087_vm9, %v3051_v46, 0.0  ;;  %v1460_v17 = vsel %vm775_vm8, %v1459_v52, %v10472_v10  ;;  %v1473_v46 = vrot.slane %v7724_v21, 4 }
 0x33c   : > { %10474 = vst [vmem:[#allocation40_spill] sm:$0xff] %v7712_v18  ;;  %v7719_v24 = vpop.xlane.xlu1 %3197  ;;  %v1445_v18 = vrot.slane %v7708_v36, 4  ;;  %v7752_v10 = vperm.slane %v1460_v17, %v6830_v54  ;;  %v10482_v17 = vld [vmem:[#allocation96_spill] sm:$0xff] }
 0x33d   : > { %10476 = vst [vmem:[#allocation42_spill] sm:$0xff] %v7719_v24  ;;  %v7734_v24 = vperm.slane %v1462_v13, %v6830_v54  ;;  %v3325_v38 = vsel %vm3087_vm9, %v3038_v47, 0.0  ;;  %v7758_v47 = vperm.slane %v1450_v25, %v6830_v54 }
 0x33e   : > { %v7726_v60 = vpop.xlane.xlu2 %3191  ;;  %v1446_v7 = vsel %vm775_vm8, 0.0, %v1445_v18  ;;  %v10480_v18 = vld [vmem:[#allocation17_spill] sm:$0xff] }
 0x33f   : > { %10477 = vst [vmem:[#allocation14_spill] sm:$0xff] %v7726_v60  ;;  %v1378_v60 = vperm.slane %v1372_v37, %v6858_v51  ;;  %v1483_v6 = vrot.slane %v7734_v24, 4  ;;  %v3054_v58 = vmul.f32 %v7577_v27, %v1446_v7  ;;  %v1515_v52 = vrot.slane %v10480_v18, 4 }
 0x340   : > { %3365 = vadd.xlane.f32.xlu0 %v3364_v8 }
 0x341   : > { %3332 = vadd.xlane.f32.xlu1 %v3331_v2  ;;  %v3043_v15 = vmul.f32 %v7577_v27, %v1378_v60  ;;  %v1474_v2 = vsel %vm775_vm8, %v7752_v10, %v1473_v46  ;;  %v3373_v7 = vsel %vm3087_vm9, %v3054_v58, 0.0  ;;  %v1484_v25 = vsel %vm775_vm8, %v1483_v6, %v7758_v47  ;;  %v10483_v46 = vld [vmem:[#allocation11_spill] sm:$0xff]  ;;  %v10484_v58 = vld [vmem:[#allocation12_spill] sm:$0xff] }
 0x342   : > { %v7777_v30 = vperm.slane %v1474_v2, %v6858_v51  ;;  %v1387_v9 = vrot.slane %v1378_v60, 4  ;;  %v7782_v41 = vperm.slane %v1484_v25, %v6858_v51  ;;  %v1417_v60 = vrot.slane %v7636_v39, 4  ;;  %v10487_v25 = vld [vmem:[#allocation5_spill] sm:$0xff] }
 0x343   : > { %3326 = vadd.xlane.f32.xlu2 %v3325_v38  ;;  %v7748_v13 = vpop.xlane.xlu0 %3239  ;;  %v7769_v38 = vperm.slane %v10482_v17, %v6858_v51  ;;  %v3334_v17 = vsel %vm3087_vm9, %v3041_v4, 0.0 }
 0x344   : > { %10478 = vst [vmem:[#allocation35_spill] sm:$0xff] %v7748_v13  ;;  %v7754_v37 = vpop.xlane.xlu1 %3206  ;;  %v1503_v13 = vrot.slane %v10483_v46, 4  ;;  %v1499_v53 = vrot.slane %v7782_v41, 4  ;;  %v1418_v39 = vsel %vm775_vm8, %v7612_v57, %v1417_v60 }
 0x345   : > { %10479 = vst [vmem:[#allocation113_spill] sm:$0xff] %v7754_v37  ;;  %v1389_v37 = vrot.slane %v7651_v5, 4  ;;  %v1516_v5 = vsel %vm775_vm8, %v1515_v52, %v10484_v58 }
 0x346   : > { %v7761_v8 = vpop.xlane.xlu2 %3200  ;;  %v1504_v33 = vsel %vm775_vm8, %v1503_v13, %v10487_v25  ;;  %v1522_v52 = vperm.slane %v1516_v5, %v6830_v54  ;;  %v1500_v5 = vsel %vm775_vm8, 0.0, %v1499_v53 }
 0x347   : > { %10481 = vst [vmem:[#allocation17_spill] sm:$0xff] %v7761_v8  ;;  %v3340_v8 = vsel %vm3087_vm9, %v3043_v15, 0.0  ;;  %v3057_v15 = vmul.f32 %v7769_v38, %v7777_v30 }
 0x348   : > { %3374 = vadd.xlane.f32.xlu0 %v3373_v7  ;;  %v1388_v7 = vsel %vm775_vm8, 0.0, %v1387_v9  ;;  %v1510_v9 = vperm.slane %v1504_v33, %v6830_v54  ;;  %v3047_v33 = vmul.f32 %v7577_v27, %v7656_v45 }
 0x349   : > { %3341 = vadd.xlane.f32.xlu1 %v3340_v8  ;;  %v1390_v8 = vsel %vm775_vm8, 0.0, %v1389_v37  ;;  %v3382_v37 = vsel %vm3087_vm9, %v3057_v15, 0.0  ;;  %v3060_v15 = vmul.f32 %v7769_v38, %v1500_v5 }
 0x34a   : > { %v3046_v4 = vmul.f32 %v7577_v27, %v1390_v8  ;;  %v1529_v60 = vrot.slane %v1510_v9, 4  ;;  %v3352_v45 = vsel %vm3087_vm9, %v3047_v33, 0.0 }
 0x34b   : > { %3335 = vadd.xlane.f32.xlu2 %v3334_v17  ;;  %v7786_v6 = vpop.xlane.xlu0 %3248 }
 0x34c   : > { %10485 = vst [vmem:[#allocation96_spill] sm:$0xff] %v7786_v6  ;;  %v7792_v2 = vpop.xlane.xlu1 %3215  ;;  %v3044_v6 = vmul.f32 %v7577_v27, %v1388_v7  ;;  %v3349_v8 = vsel %vm3087_vm9, %v3046_v4, 0.0  ;;  %v1527_v7 = vrot.slane %v1522_v52, 4 }
 0x34d   : > { %10486 = vst [vmem:[#allocation11_spill] sm:$0xff] %v7792_v2  ;;  %v1426_v2 = vperm.slane %v1418_v39, %v6858_v51  ;;  %v1530_v39 = vsel %vm775_vm8, %v1522_v52, %v1529_v60 }
 0x34e   : > { %v7799_v17 = vpop.xlane.xlu2 %3209  ;;  %v3343_v13 = vsel %vm3087_vm9, %v3044_v6, 0.0  ;;  %v1528_v53 = vsel %vm775_vm8, %v1527_v7, %v1510_v9  ;;  %v3391_v6 = vsel %vm3087_vm9, %v3060_v15, 0.0  ;;  %v7832_v9 = vperm.slane %v1530_v39, %v6858_v51  ;;  %v10496_v39 = vld [vmem:[#allocation16_spill] sm:$0xff] }
 0x34f   : > { %10488 = vst [vmem:[#allocation12_spill] sm:$0xff] %v7799_v17  ;;  %v3049_v57 = vmul.f32 %v7577_v27, %v1426_v2  ;;  %v1441_v5 = vrot.slane %v1426_v2, 4  ;;  %v1505_v7 = vrot.slane %v10487_v25, 4  ;;  %v10494_v2 = vld [vmem:[#allocation28_spill] sm:$0xff]  ;;  %v1517_v25 = vrot.slane %v10484_v58, 4 }
 0x350   : > { %3383 = vadd.xlane.f32.xlu0 %v3382_v37  ;;  %v1443_v37 = vrot.slane %v7703_v14, 4  ;;  %v1471_v14 = vrot.slane %v7752_v10, 4  ;;  %v1559_v60 = vrot.slane %v10494_v2, 4 }
 0x351   : > { %3350 = vadd.xlane.f32.xlu1 %v3349_v8  ;;  %v3358_v8 = vsel %vm3087_vm9, %v3049_v57, 0.0  ;;  %v1442_v10 = vsel %vm775_vm8, 0.0, %v1441_v5  ;;  %v10498_v5 = vld [vmem:[#allocation7_spill] sm:$0xff] }
 0x352   : > { %v1444_v57 = vsel %vm775_vm8, 0.0, %v1443_v37  ;;  %v3050_v37 = vmul.f32 %v7577_v27, %v1442_v10 }
 0x353   : > { %3344 = vadd.xlane.f32.xlu2 %v3343_v13  ;;  %v7811_v17 = vpop.xlane.xlu0 %3257  ;;  %v7827_v13 = vperm.slane %v1528_v53, %v6858_v51  ;;  %v3052_v33 = vmul.f32 %v7577_v27, %v1444_v57 }
 0x354   : > { %10489 = vst [vmem:[#allocation5_spill] sm:$0xff] %v7811_v17  ;;  %v7814_v19 = vpop.xlane.xlu1 %3224 }
 0x355   : > { %10490 = vst [vmem:[#allocation114_spill] sm:$0xff] %v7814_v19  ;;  %v10492_v19 = vld [vmem:[#allocation22_spill] sm:$0xff]  ;;  %v3063_v15 = vmul.f32 %v7769_v38, %v7827_v13 }
 0x356   : > { %v7817_v4 = vpop.xlane.xlu2 %3218 }
 0x357   : > { %10491 = vst [vmem:[#allocation115_spill] sm:$0xff] %v7817_v4  ;;  %v1571_v4 = vrot.slane %v10492_v19, 4  ;;  %v3400_v57 = vsel %vm3087_vm9, %v3063_v15, 0.0  ;;  %v3361_v15 = vsel %vm3087_vm9, %v3050_v37, 0.0 }
 0x358   : > { %3392 = vadd.xlane.f32.xlu0 %v3391_v6  ;;  %v1506_v6 = vsel %vm775_vm8, %v10483_v46, %v1505_v7  ;;  %v1472_v46 = vsel %vm775_vm8, %v1471_v14, %v7724_v21  ;;  %v3367_v7 = vsel %vm3087_vm9, %v3052_v33, 0.0 }
 0x359   : > { %3359 = vadd.xlane.f32.xlu1 %v3358_v8  ;;  %v1572_v8 = vsel %vm775_vm8, %v1571_v4, %v10496_v39  ;;  %v7861_v58 = vperm.slane %v1506_v6, %v6830_v54  ;;  %v1560_v4 = vsel %vm775_vm8, %v1559_v60, %v10498_v5  ;;  %v1478_v14 = vperm.slane %v1472_v46, %v6858_v51 }
 0x35a   : > { %v7867_v10 = vperm.slane %v1572_v8, %v6830_v54  ;;  %v7876_v6 = vperm.slane %v1560_v4, %v6830_v54 }
 0x35b   : > { %3353 = vadd.xlane.f32.xlu2 %v3352_v45  ;;  %v7836_v52 = vpop.xlane.xlu0 %3266 }
 0x35c   : > { %10493 = vst [vmem:[#allocation22_spill] sm:$0xff] %v7836_v52  ;;  %v7842_v53 = vpop.xlane.xlu1 %3233  ;;  %v1553_v52 = vrot.slane %v7832_v9, 4  ;;  %v1583_v37 = vrot.slane %v7867_v10, 4 }
 0x35d   : > { %10495 = vst [vmem:[#allocation28_spill] sm:$0xff] %v7842_v53  ;;  %v1518_v53 = vsel %vm775_vm8, %v10480_v18, %v1517_v25  ;;  %v1541_v25 = vrot.slane %v7861_v58, 4 }
 0x35e   : > { %v7851_v45 = vpop.xlane.xlu2 %3227  ;;  %v7870_v18 = vperm.slane %v1518_v53, %v6830_v54  ;;  %v1554_v21 = vsel %vm775_vm8, 0.0, %v1553_v52  ;;  %v3055_v53 = vmul.f32 %v7769_v38, %v1478_v14  ;;  %v3053_v52 = vmul.f32 %v7577_v27, %v7708_v36 }
 0x35f   : > { %10497 = vst [vmem:[#allocation16_spill] sm:$0xff] %v7851_v45  ;;  %v3066_v33 = vmul.f32 %v7769_v38, %v1554_v21  ;;  %v1561_v36 = vrot.slane %v10498_v5, 4 }
 0x360   : > { %3401 = vadd.xlane.f32.xlu0 %v3400_v57  ;;  %v1542_v46 = vsel %vm775_vm8, %v7870_v18, %v1541_v25  ;;  %v3376_v21 = vsel %vm3087_vm9, %v3055_v53, 0.0 }
 0x361   : > { %3368 = vadd.xlane.f32.xlu1 %v3367_v7  ;;  %v3409_v4 = vsel %vm3087_vm9, %v3066_v33, 0.0  ;;  %v1497_v7 = vrot.slane %v7777_v30, 4  ;;  %v7898_v45 = vperm.slane %v1542_v46, %v6858_v51  ;;  %v1573_v30 = vrot.slane %v10496_v39, 4 }
 0x362   : > { %v1485_v33 = vrot.slane %v7758_v47, 4  ;;  %v1562_v5 = vsel %vm775_vm8, %v10494_v2, %v1561_v36 }
 0x363   : > { %3362 = vadd.xlane.f32.xlu2 %v3361_v15  ;;  %v7878_v60 = vpop.xlane.xlu0 %3275  ;;  %v1584_v15 = vsel %vm775_vm8, %v1583_v37, %v7876_v6  ;;  %v3069_v53 = vmul.f32 %v7769_v38, %v7898_v45  ;;  %v1498_v46 = vsel %vm775_vm8, 0.0, %v1497_v7  ;;  %v1574_v47 = vsel %vm775_vm8, %v10492_v19, %v1573_v30 }
 0x364   : > { %10499 = vst [vmem:[#allocation7_spill] sm:$0xff] %v7878_v60  ;;  %v7882_v8 = vpop.xlane.xlu1 %3242  ;;  %v1495_v60 = vrot.slane %v1478_v14, 4  ;;  %v7903_v25 = vperm.slane %v1584_v15, %v6858_v51  ;;  %v1486_v36 = vsel %vm775_vm8, %v7734_v24, %v1485_v33 }
 0x365   : > { %10500 = vst [vmem:[#allocation116_spill] sm:$0xff] %v7882_v8  ;;  %v3370_v8 = vsel %vm3087_vm9, %v3053_v52, 0.0  ;;  %v3058_v52 = vmul.f32 %v7769_v38, %v1498_v46  ;;  %v3418_v2 = vsel %vm3087_vm9, %v3069_v53, 0.0  ;;  %v1582_v46 = vperm.slane %v1574_v47, %v6830_v54 }
 0x366   : > { %v7886_v57 = vpop.xlane.xlu2 %3236  ;;  %v1496_v39 = vsel %vm775_vm8, 0.0, %v1495_v60  ;;  %v1607_v7 = vrot.slane %v7903_v25, 4 }
 0x367   : > { %10501 = vst [vmem:[#allocation117_spill] sm:$0xff] %v7886_v57  ;;  %v3056_v15 = vmul.f32 %v7769_v38, %v1496_v39  ;;  %v3385_v19 = vsel %vm3087_vm9, %v3058_v52, 0.0  ;;  %v1595_v33 = vrot.slane %v1582_v46, 4 }
 0x368   : > { %3410 = vadd.xlane.f32.xlu0 %v3409_v4  ;;  %v2823_v4 = vrot.slane %v7769_v38, 4  ;;  %v1608_v39 = vsel %vm775_vm8, 0.0, %v1607_v7 }
 0x369   : > { %3377 = vadd.xlane.f32.xlu1 %v3376_v21  ;;  %v1570_v21 = vperm.slane %v1562_v5, %v6830_v54  ;;  %v3379_v30 = vsel %vm3087_vm9, %v3056_v15, 0.0  ;;  %v1494_v5 = vperm.slane %v1486_v36, %v6858_v51  ;;  %v3059_v15 = vmul.f32 %v7769_v38, %v7782_v41 }
 0x36a   : > { %v7932_v60 = vsel %vm775_vm8, 0.0, %v2823_v4 }
 0x36b   : > { %3371 = vadd.xlane.f32.xlu2 %v3370_v8  ;;  %v7907_v37 = vpop.xlane.xlu0 %3284  ;;  %v3072_v24 = vmul.f32 %v7932_v60, %v1608_v39  ;;  %v3061_v52 = vmul.f32 %v7769_v38, %v1494_v5  ;;  %v1596_v7 = vsel %vm775_vm8, %v1595_v33, %v1570_v21  ;;  %v1501_v41 = vrot.slane %v1494_v5, 4 }
 0x36c   : > { %10502 = vst [vmem:[#allocation118_spill] sm:$0xff] %v7907_v37  ;;  %v7914_v14 = vpop.xlane.xlu1 %3251  ;;  %v1597_v37 = vrot.slane %v1570_v21, 4  ;;  %v1539_v21 = vrot.slane %v7870_v18, 4  ;;  %v3388_v33 = vsel %vm3087_vm9, %v3059_v15, 0.0 }
 0x36d   : > { %10503 = vst [vmem:[#allocation119_spill] sm:$0xff] %v7914_v14 }
 0x36e   : > { %v7921_v8 = vpop.xlane.xlu2 %3245  ;;  %v1598_v39 = vsel %vm775_vm8, %v1582_v46, %v1597_v37 }
 0x36f   : > { %10504 = vst [vmem:[#allocation120_spill] sm:$0xff] %v7921_v8  ;;  %v3394_v8 = vsel %vm3087_vm9, %v3061_v52, 0.0 }
 0x370   : > { %3419 = vadd.xlane.f32.xlu0 %v3418_v2  ;;  %v10507_v2 = vld [vmem:[#allocation31_spill] sm:$0xff] }
 0x371   : > { %3386 = vadd.xlane.f32.xlu1 %v3385_v19  ;;  %v1615_v36 = vrot.slane %v10507_v2, 4  ;;  %v3427_v19 = vsel %vm3087_vm9, %v3072_v24, 0.0  ;;  %v7960_v24 = vperm.slane %v1598_v39, %v6858_v51 }
 0x373   : > { %3380 = vadd.xlane.f32.xlu2 %v3379_v30  ;;  %v7937_v53 = vpop.xlane.xlu0 %3293  ;;  %v1551_v30 = vrot.slane %v7827_v13, 4  ;;  %v10509_v13 = vld [vmem:[#allocation9_spill] sm:$0xff] }
 0x374   : > { %10505 = vst [vmem:[#allocation121_spill] sm:$0xff] %v7937_v53  ;;  %v7940_v47 = vpop.xlane.xlu1 %3260  ;;  %v10508_v53 = vld [vmem:[#allocation33_spill] sm:$0xff]  ;;  %v1616_v37 = vsel %vm775_vm8, %v1615_v36, %v10509_v13 }
 0x375   : > { %v1629_v14 = vrot.slane %v10508_v53, 4  ;;  %v1552_v52 = vsel %vm775_vm8, 0.0, %v1551_v30  ;;  %v7976_v39 = vperm.slane %v1616_v37, %v6830_v54  ;;  %v1540_v30 = vsel %vm775_vm8, %v1539_v21, %v7861_v58 }
 0x376   : > { %v7943_v4 = vpop.xlane.xlu2 %3254  ;;  %v3064_v15 = vmul.f32 %v7769_v38, %v1552_v52  ;;  %v1546_v63 = vperm.slane %v1540_v30, %v6858_v51 }
 0x377   : > { %10506 = vst [vmem:[#allocation122_spill] sm:$0xff] %v7943_v4  ;;  %v7955_v4 = vperm.slane %v1596_v7, %v6858_v51  ;;  %v10511_v7 = vld [vmem:[#allocation27_spill] sm:$0xff] }
 0x378   : > { %3428 = vadd.xlane.f32.xlu0 %v3427_v19  ;;  %v1630_v5 = vsel %vm775_vm8, %v10511_v7, %v1629_v14  ;;  %v1502_v19 = vsel %vm775_vm8, 0.0, %v1501_v41  ;;  %v1627_v14 = vrot.slane %v10511_v7, 4  ;;  %v1617_v41 = vrot.slane %v10509_v13, 4 }
 0x379   : > { %3395 = vadd.xlane.f32.xlu1 %v3394_v8  ;;  %v3075_v8 = vmul.f32 %v7932_v60, %v7955_v4  ;;  %v3403_v37 = vsel %vm3087_vm9, %v3064_v15, 0.0 }
 0x37a   : > { %v1618_v58 = vsel %vm775_vm8, %v10507_v2, %v1617_v41  ;;  %v3067_v2 = vmul.f32 %v7769_v38, %v1546_v63  ;;  %v3065_v41 = vmul.f32 %v7769_v38, %v7832_v9 }
 0x37b   : > { %3389 = vadd.xlane.f32.xlu2 %v3388_v33  ;;  %v7964_v46 = vpop.xlane.xlu0 %3302  ;;  %v3062_v33 = vmul.f32 %v7769_v38, %v1502_v19  ;;  %v3436_v52 = vsel %vm3087_vm9, %v3075_v8, 0.0  ;;  %v1628_v19 = vsel %vm775_vm8, %v1627_v14, %v10508_v53  ;;  %v1641_v8 = vrot.slane %v7976_v39, 4 }
 0x37c   : > { %10510 = vst [vmem:[#allocation31_spill] sm:$0xff] %v7964_v46  ;;  %v7971_v18 = vpop.xlane.xlu1 %3269  ;;  %v1613_v46 = vrot.slane %v7960_v24, 4  ;;  %v8004_v53 = vperm.slane %v1628_v19, %v6830_v54 }
 0x37d   : > { %10512 = vst [vmem:[#allocation33_spill] sm:$0xff] %v7971_v18  ;;  %v7986_v18 = vperm.slane %v1630_v5, %v6830_v54  ;;  %v3397_v21 = vsel %vm3087_vm9, %v3062_v33, 0.0  ;;  %v8010_v33 = vperm.slane %v1618_v58, %v6830_v54 }
 0x37e   : > { %v7978_v36 = vpop.xlane.xlu2 %3263  ;;  %v1614_v7 = vsel %vm775_vm8, 0.0, %v1613_v46  ;;  %v10515_v46 = vld [vmem:[#allocation97_spill] sm:$0xff] }
 0x37f   : > { %v1651_v13 = vrot.slane %v7986_v18, 4  ;;  %v3078_v15 = vmul.f32 %v7932_v60, %v1614_v7  ;;  %v2847_v14 = vrot.slane %v10515_v46, 4 }
 0x380   : > { %3437 = vadd.xlane.f32.xlu0 %v3436_v52 }
 0x381   : > { %3404 = vadd.xlane.f32.xlu1 %v3403_v37  ;;  %v1642_v37 = vsel %vm775_vm8, %v8004_v53, %v1641_v8  ;;  %v3445_v19 = vsel %vm3087_vm9, %v3078_v15, 0.0  ;;  %v1652_v7 = vsel %vm775_vm8, %v1651_v13, %v8010_v33  ;;  %v1555_v8 = vrot.slane %v1546_v63, 4 }
 0x382   : > { %v8028_v9 = vperm.slane %v1642_v37, %v6858_v51  ;;  %v3406_v15 = vsel %vm3087_vm9, %v3065_v41, 0.0 }
 0x383   : > { %3398 = vadd.xlane.f32.xlu2 %v3397_v21  ;;  %v8000_v5 = vpop.xlane.xlu0 %3311  ;;  %v1557_v21 = vrot.slane %v7898_v45, 4  ;;  %v8032_v45 = vperm.slane %v1652_v7, %v6858_v51  ;;  %v1556_v7 = vsel %vm775_vm8, 0.0, %v1555_v8 }
 0x384   : > { %10513 = vst [vmem:[#allocation9_spill] sm:$0xff] %v8000_v5  ;;  %v8006_v30 = vpop.xlane.xlu1 %3278  ;;  %v10517_v5 = vld [vmem:[#allocation87_spill] sm:$0xff] }
 0x385   : > { %10514 = vst [vmem:[#allocation27_spill] sm:$0xff] %v8006_v30  ;;  %v2835_v58 = vrot.slane %v10517_v5, 4  ;;  %v3412_v30 = vsel %vm3087_vm9, %v3067_v2, 0.0  ;;  %v1558_v2 = vsel %vm775_vm8, 0.0, %v1557_v21  ;;  %v1667_v17 = vrot.slane %v8032_v45, 4 }
 0x386   : > { %v8013_v52 = vpop.xlane.xlu2 %3272  ;;  %v3070_v41 = vmul.f32 %v7769_v38, %v1558_v2 }
 0x387   : > { %10516 = vst [vmem:[#allocation97_spill] sm:$0xff] %v8013_v52  ;;  %v2848_v52 = vsel %vm775_vm8, %v2847_v14, %v10518_v31  ;;  %v1585_v14 = vrot.slane %v7876_v6, 4  ;;  %v1668_v2 = vsel %vm775_vm8, 0.0, %v1667_v17  ;;  %v3071_v17 = vmul.f32 %v7932_v60, %v7903_v25 }
 0x388   : > { %3446 = vadd.xlane.f32.xlu0 %v3445_v19  ;;  %v3081_v19 = vmul.f32 %v7932_v60, %v8028_v9  ;;  %v2854_v63 = vperm.slane %v2848_v52, %v6830_v54  ;;  %v3421_v52 = vsel %vm3087_vm9, %v3070_v41, 0.0 }
 0x389   : > { %3413 = vadd.xlane.f32.xlu1 %v3412_v30  ;;  %v10520_v30 = vld [vmem:[#allocation54_spill] sm:$0xff]  ;;  %v1586_v6 = vsel %vm775_vm8, %v7867_v10, %v1585_v14  ;;  %v3424_v25 = vsel %vm3087_vm9, %v3071_v17, 0.0 }
 0x38a   : > { %v2836_v37 = vsel %vm775_vm8, %v2835_v58, %v10520_v30  ;;  %v3454_v21 = vsel %vm3087_vm9, %v3081_v19, 0.0  ;;  %v3084_v19 = vmul.f32 %v7932_v60, %v1668_v2 }
 0x38b   : > { %3407 = vadd.xlane.f32.xlu2 %v3406_v15  ;;  %v8034_v13 = vpop.xlane.xlu0 %3320  ;;  %v2842_v58 = vperm.slane %v2836_v37, %v6830_v54 }
 0x38c   : > { %10519 = vst [vmem:[#allocation87_spill] sm:$0xff] %v8034_v13  ;;  %v8043_v57 = vpop.xlane.xlu1 %3287  ;;  %v3068_v13 = vmul.f32 %v7769_v38, %v1556_v7  ;;  %v1594_v7 = vperm.slane %v1586_v6, %v6858_v51 }
 0x38d   : > { %10521 = vst [vmem:[#allocation95_spill] sm:$0xff] %v8043_v57  ;;  %v2859_v57 = vrot.slane %v2854_v63, 4  ;;  %v2861_v32 = vrot.slane %v2842_v58, 4 }
 0x38e   : > { %v8047_v15 = vpop.xlane.xlu2 %3281  ;;  %v3415_v8 = vsel %vm3087_vm9, %v3068_v13, 0.0  ;;  %v3073_v14 = vmul.f32 %v7932_v60, %v1594_v7  ;;  %v3463_v13 = vsel %vm3087_vm9, %v3084_v19, 0.0  ;;  %v2849_v19 = vrot.slane %v10518_v31, 4 }
 0x38f   : > { %10522 = vst [vmem:[#allocation54_spill] sm:$0xff] %v8047_v15  ;;  %v2860_v37 = vsel %vm775_vm8, %v2859_v57, %v2842_v58  ;;  %v2862_v41 = vsel %vm775_vm8, %v2854_v63, %v2861_v32  ;;  %v2837_v32 = vrot.slane %v10520_v30, 4  ;;  %v1609_v57 = vrot.slane %v1594_v7, 4 }
 0x390   : > { %3455 = vadd.xlane.f32.xlu0 %v3454_v21  ;;  %v8073_v6 = vperm.slane %v2860_v37, %v6858_v51  ;;  %v8078_v2 = vperm.slane %v2862_v41, %v6858_v51  ;;  %v1639_v63 = vrot.slane %v8004_v53, 4  ;;  %v2850_v41 = vsel %vm775_vm8, %v10515_v46, %v2849_v19 }
 0x391   : > { %3422 = vadd.xlane.f32.xlu1 %v3421_v52  ;;  %v1611_v52 = vrot.slane %v7955_v4, 4  ;;  %v2838_v58 = vsel %vm775_vm8, %v10517_v5, %v2837_v32  ;;  %v1610_v5 = vsel %vm775_vm8, 0.0, %v1609_v57 }
 0x392   : > { %v2885_v53 = vrot.slane %v8078_v2, 4  ;;  %v8099_v31 = vperm.slane %v2838_v58, %v6830_v54 }
 0x393   : > { %3416 = vadd.xlane.f32.xlu2 %v3415_v8  ;;  %v8059_v15 = vpop.xlane.xlu0 %3329  ;;  %v3430_v8 = vsel %vm3087_vm9, %v3073_v14, 0.0  ;;  %v3472_v14 = vmul.f32 %v8073_v6, %v6895_v59  ;;  %v1612_v37 = vsel %vm775_vm8, 0.0, %v1611_v52  ;;  %v3074_v59 = vmul.f32 %v7932_v60, %v1610_v5 }
 0x394   : > { %v8062_v10 = vpop.xlane.xlu1 %3296  ;;  %v3076_v7 = vmul.f32 %v7932_v60, %v1612_v37  ;;  %v1640_v52 = vsel %vm775_vm8, %v1639_v63, %v7976_v39  ;;  %v2886_v46 = vsel %vm775_vm8, 0.0, %v2885_v53  ;;  %v2873_v57 = vrot.slane %v8099_v31, 4 }
 0x395   : > { %v1646_v58 = vperm.slane %v1640_v52, %v6858_v51  ;;  %v3077_v53 = vmul.f32 %v7932_v60, %v7960_v24 }
 0x396   : > { %v8067_v21 = vpop.xlane.xlu2 %3290  ;;  %v3439_v32 = vsel %vm3087_vm9, %v3076_v7, 0.0 }
 0x397   : > { %v3079_v63 = vmul.f32 %v7932_v60, %v1646_v58  ;;  %v3442_v52 = vsel %vm3087_vm9, %v3077_v53, 0.0 }
 0x398   : > { %3464 = vadd.xlane.f32.xlu0 %v3463_v13  ;;  %v3480_v13 = vsel %vm3087_vm9, %v3472_v14, 0.0  ;;  %v3475_v14 = vmul.f32 %v2886_v46, %v7276_v0 }
 0x399   : > { %3431 = vadd.xlane.f32.xlu1 %v3430_v8  ;;  %v2858_v8 = vperm.slane %v2850_v41, %v6830_v54  ;;  %v3448_v0 = vsel %vm3087_vm9, %v3079_v63, 0.0  ;;  %v10544_v54 = vld [vmem:[#allocation120_spill] sm:$0xff] }
 0x39a   : > { %v3489_v41 = vsel %vm3087_vm9, %v3475_v14, 0.0 }
 0x39b   : > { %3425 = vadd.xlane.f32.xlu2 %v3424_v25  ;;  %v8086_v4 = vpop.xlane.xlu0 %3338  ;;  %v3433_v25 = vsel %vm3087_vm9, %v3074_v59, 0.0  ;;  %v2874_v37 = vsel %vm775_vm8, %v2858_v8, %v2873_v57  ;;  %v1665_v59 = vrot.slane %v8028_v9, 4 }
 0x39c   : > { %v8091_v30 = vpop.xlane.xlu1 %3305  ;;  %v2882_v5 = vperm.slane %v2874_v37, %v6858_v51 }
 0x39d   : > { %v1666_v57 = vsel %vm775_vm8, 0.0, %v1665_v59 }
 0x39e   : > { %v8101_v17 = vpop.xlane.xlu2 %3299  ;;  %v3478_v24 = vmul.f32 %v2882_v5, %v7769_v38  ;;  %v3082_v9 = vmul.f32 %v7932_v60, %v1666_v57  ;;  %v2871_v57 = vrot.slane %v2858_v8, 4 }
 0x3a0   : > { %3481 = vadd.xlane.f32.xlu0 %v3480_v13  ;;  %v1663_v13 = vrot.slane %v1646_v58, 4  ;;  %v3498_v37 = vsel %vm3087_vm9, %v3478_v24, 0.0  ;;  %v3457_v38 = vsel %vm3087_vm9, %v3082_v9, 0.0 }
 0x3a1   : > { %3440 = vadd.xlane.f32.xlu1 %v3439_v32  ;;  %v1653_v32 = vrot.slane %v8010_v33, 4 }
 0x3a2   : > { %v1664_v14 = vsel %vm775_vm8, 0.0, %v1663_v13 }
 0x3a3   : > { %3434 = vadd.xlane.f32.xlu2 %v3433_v25  ;;  %v8113_v19 = vpop.xlane.xlu0 %3347  ;;  %v3080_v58 = vmul.f32 %v7932_v60, %v1664_v14  ;;  %v1654_v33 = vsel %vm775_vm8, %v7986_v18, %v1653_v32  ;;  %v3083_v18 = vmul.f32 %v7932_v60, %v8032_v45  ;;  %v2872_v45 = vsel %vm775_vm8, %v2871_v57, %v8099_v31 }
 0x3a4   : > { %v8116_v39 = vpop.xlane.xlu1 %3314  ;;  %v3474_v57 = vmul.f32 %v8078_v2, %v7106_v22 }
 0x3a5   : > { %v3451_v53 = vsel %vm3087_vm9, %v3080_v58, 0.0  ;;  %v3460_v58 = vsel %vm3087_vm9, %v3083_v18, 0.0 }
 0x3a6   : > { %v8120_v7 = vpop.xlane.xlu2 %3308 }
 0x3a8   : > { %3490 = vadd.xlane.f32.xlu0 %v3489_v41  ;;  %v1662_v41 = vperm.slane %v1654_v33, %v6858_v51 }
 0x3a9   : > { %3449 = vadd.xlane.f32.xlu1 %v3448_v0 }
 0x3aa   : > { %v3085_v13 = vmul.f32 %v7932_v60, %v1662_v41  ;;  %v1669_v14 = vrot.slane %v1662_v41, 4 }
 0x3ab   : > { %3443 = vadd.xlane.f32.xlu2 %v3442_v52  ;;  %v8130_v46 = vpop.xlane.xlu0 %3356  ;;  %v2883_v52 = vrot.slane %v8073_v6, 4 }
 0x3ac   : > { %v8134_v25 = vpop.xlane.xlu1 %3323  ;;  %v3466_v32 = vsel %vm3087_vm9, %v3085_v13, 0.0  ;;  %v2878_v13 = vperm.slane %v2872_v45, %v6858_v51 }
 0x3ad   : > { %v2884_v9 = vsel %vm775_vm8, 0.0, %v2883_v52 }
 0x3ae   : > { %v8138_v63 = vpop.xlane.xlu2 %3317  ;;  %v3473_v6 = vmul.f32 %v2884_v9, %v6996_v11  ;;  %v2889_v9 = vrot.slane %v2882_v5, 4 }
 0x3b0   : > { %3499 = vadd.xlane.f32.xlu0 %v3498_v37  ;;  %v3483_v41 = vsel %vm3087_vm9, %v3473_v6, 0.0  ;;  %v2890_v6 = vsel %vm775_vm8, 0.0, %v2889_v9  ;;  %v10332_v9 = vlaneseq }
 0x3b1   : > { %3458 = vadd.xlane.f32.xlu1 %v3457_v38  ;;  %v1670_v38 = vsel %vm775_vm8, 0.0, %v1669_v14  ;;  %v2887_v14 = vrot.slane %v2878_v13, 4  ;;  %v3479_v5 = vmul.f32 %v2890_v6, %v7932_v60 }
 0x3b2   : > { %v3086_v8 = vmul.f32 %v7932_v60, %v1670_v38  ;;  %v3486_v38 = vsel %vm3087_vm9, %v3474_v57, 0.0 }
 0x3b3   : > { %3452 = vadd.xlane.f32.xlu2 %v3451_v53  ;;  %v8147_v59 = vpop.xlane.xlu0 %3365  ;;  %v3501_v2 = vsel %vm3087_vm9, %v3479_v5, 0.0 }
 0x3b4   : > { %v8149_v0 = vpop.xlane.xlu1 %3332  ;;  %v3469_v52 = vsel %vm3087_vm9, %v3086_v8, 0.0  ;;  %v2888_v8 = vsel %vm775_vm8, 0.0, %v2887_v14  ;;  %v8204_v14 = vand.u32 127, %v10332_v9 }
 0x3b5   : > { %v3477_v22 = vmul.f32 %v2888_v8, %v7577_v27 }
 0x3b6   : > { %v8153_v24 = vpop.xlane.xlu2 %3326  ;;  %v3648_v60 = vperm.slane %v7440_v16, %v8204_v14  ;;  %v3639_v8 = vperm.slane %v7349_v23, %v8204_v14  ;;  %v3642_v23 = vperm.slane %v7384_v3, %v8204_v14 }
 0x3b9   : > { %3467 = vadd.xlane.f32.xlu1 %v3466_v32  ;;  %v3476_v32 = vmul.f32 %v2878_v13, %v7427_v43  ;;  %v3495_v13 = vsel %vm3087_vm9, %v3477_v22, 0.0  ;;  %v3641_v22 = vperm.slane %v7378_v62, %v8204_v14  ;;  %v3643_v62 = vperm.slane %v7422_v44, %v8204_v14 }
 0x3bb   : > { %3461 = vadd.xlane.f32.xlu2 %v3460_v58  ;;  %v8160_v37 = vpop.xlane.xlu0 %3374  ;;  %v3492_v58 = vsel %vm3087_vm9, %v3476_v32, 0.0 }
 0x3bc   : > { %v8162_v33 = vpop.xlane.xlu1 %3341 }
 0x3be   : > { %v8168_v53 = vpop.xlane.xlu2 %3335 }
 0x3c1   : > { %3484 = vadd.xlane.f32.xlu1 %v3483_v41 }
 0x3c3   : > { %3470 = vadd.xlane.f32.xlu2 %v3469_v52  ;;  %v8174_v18 = vpop.xlane.xlu0 %3383 }
 0x3c4   : > { %v8176_v11 = vpop.xlane.xlu1 %3350 }
 0x3c5   : > { %10523 = vst [vmem:[#allocation123_spill] sm:$0xff] %v8176_v11 }
 0x3c6   : > { %v8179_v31 = vpop.xlane.xlu2 %3344 }
 0x3c9   : > { %3493 = vadd.xlane.f32.xlu1 %v3492_v58  ;;  %v3649_v58 = vperm.slane %v7479_v40, %v8204_v14 }
 0x3cb   : > { %3487 = vadd.xlane.f32.xlu2 %v3486_v38  ;;  %v8186_v45 = vpop.xlane.xlu0 %3392  ;;  %v3647_v38 = vperm.slane %v7309_v56, %v8204_v14 }
 0x3cc   : > { %v8189_v43 = vpop.xlane.xlu1 %3359 }
 0x3cd   : > { %v3774_v16 = vsel %vm554_vm1, %v3648_v60, %v3647_v38 }
 0x3ce   : > { %v8192_v41 = vpop.xlane.xlu2 %3353  ;;  %v3775_v40 = vsel %vm556_vm2, %v3649_v58, %v3774_v16 }
 0x3d1   : > { %3502 = vadd.xlane.f32.xlu1 %v3501_v2  ;;  %v3640_v2 = vperm.slane %v7256_v34, %v8204_v14  ;;  %v3652_v34 = vperm.slane %v7512_v61, %v8204_v14  ;;  %v3655_v61 = vperm.slane %v7547_v20, %v8204_v14  ;;  %v3654_v20 = vperm.slane %v7506_v49, %v8204_v14 }
 0x3d3   : > { %3496 = vadd.xlane.f32.xlu2 %v3495_v13  ;;  %v8197_v52 = vpop.xlane.xlu0 %3401  ;;  %v3650_v13 = vperm.slane %v7334_v55, %v8204_v14  ;;  %v3767_v56 = vsel %vm554_vm1, %v3640_v2, %v3639_v8  ;;  %v3651_v55 = vperm.slane %v7471_v28, %v8204_v14  ;;  %v3644_v2 = vperm.slane %v7288_v29, %v8204_v14 }
 0x3d4   : > { %v8199_v32 = vpop.xlane.xlu1 %3368  ;;  %v3768_v9 = vsel %vm556_vm2, %v3641_v22, %v3767_v56  ;;  %v3653_v28 = vperm.slane %v7374_v50, %v8204_v14  ;;  %v3658_v50 = vperm.slane %v7566_v1, %v8204_v14  ;;  %v3697_v1 = vperm.slane %v7978_v36, %v8204_v14  ;;  %v10530_v36 = vld [vmem:[#allocation103_spill] sm:$0xff] }
 0x3d5   : > { %v3776_v60 = vsel %vm558_vm3, %v3650_v13, %v3775_v40  ;;  %v3769_v8 = vsel %vm558_vm3, %v3642_v23, %v3768_v9  ;;  %v3656_v9 = vperm.slane %v7406_v12, %v8204_v14  ;;  %v3645_v40 = vperm.slane %v7414_v35, %v8204_v14 }
 0x3d6   : > { %v8201_v57 = vpop.xlane.xlu2 %3362  ;;  %v3777_v3 = vsel %vm560_vm4, %v3651_v55, %v3776_v60  ;;  %v3770_v44 = vsel %vm560_vm4, %v3643_v62, %v3769_v8  ;;  %v3646_v23 = vperm.slane %v7443_v26, %v8204_v14  ;;  %v3657_v12 = vperm.slane %v7539_v42, %v8204_v14  ;;  %v10525_v42 = vld [vmem:[#allocation25_spill] sm:$0xff] }
 0x3d7   : > { %v3778_v16 = vsel %vm562_vm5, %v3652_v34, %v3777_v3  ;;  %v3771_v13 = vsel %vm562_vm5, %v3644_v2, %v3770_v44  ;;  %v3781_v29 = vsel %vm554_vm1, %v3656_v9, %v3655_v61  ;;  %v3664_v35 = vperm.slane %v7638_v48, %v8204_v14  ;;  %v10526_v48 = vld [vmem:[#allocation5_spill] sm:$0xff]  ;;  %v10528_v61 = vld [vmem:[#allocation102_spill] sm:$0xff] }
 0x3d8   : > { %v3779_v56 = vsel %vm564_vm6, %v3653_v28, %v3778_v16  ;;  %v3696_v60 = vperm.slane %v7940_v47, %v8204_v14  ;;  %v3772_v49 = vsel %vm564_vm6, %v3645_v40, %v3771_v13  ;;  %v3782_v55 = vsel %vm556_vm2, %v3657_v12, %v3781_v29  ;;  %v10527_v47 = vld [vmem:[#allocation117_spill] sm:$0xff]  ;;  %v10531_v13 = vld [vmem:[#allocation104_spill] sm:$0xff] }
 0x3d9   : > { %v8280_v34 = vsel %vm566_vm7, %v3654_v20, %v3779_v56  ;;  %v3663_v8 = vperm.slane %v10525_v42, %v8204_v14  ;;  %v3695_v3 = vperm.slane %v10526_v48, %v8204_v14  ;;  %v3688_v44 = vperm.slane %v10527_v47, %v8204_v14  ;;  %v10532_v29 = vld [vmem:[#allocation28_spill] sm:$0xff] }
 0x3da   : > { %10524 = vst [vmem:[#allocation124_spill] sm:$0xff] %v8280_v34  ;;  %v3659_v2 = vperm.slane %v10528_v61, %v8204_v14  ;;  %v8296_v28 = vsel %vm566_vm7, %v3646_v23, %v3772_v49  ;;  %v3783_v40 = vsel %vm558_vm3, %v3658_v50, %v3782_v55  ;;  %v3665_v56 = vperm.slane %v10531_v13, %v8204_v14  ;;  %v10533_v23 = vld [vmem:[#allocation21_spill] sm:$0xff] }
 0x3db   : > { %v8208_v27 = vpop.xlane.xlu0 %3410  ;;  %10529 = vst [vmem:[#allocation25_spill] sm:$0xff] %v8296_v28  ;;  %v3788_v20 = vsel %vm554_vm1, %v3664_v35, %v3663_v8  ;;  %v3687_v12 = vperm.slane %v10532_v29, %v8204_v14  ;;  %v3816_v42 = vsel %vm554_vm1, %v3696_v60, %v3695_v3  ;;  %v3913_v48 = vsel %vm3911_vm10, %v8280_v34, -inf  ;;  %v10536_v55 = vld [vmem:[#allocation105_spill] sm:$0xff]  ;;  %v10537_v8 = vld [vmem:[#allocation22_spill] sm:$0xff] }
 0x3dc   : > { %v8212_v6 = vpop.xlane.xlu1 %3377  ;;  %v3668_v49 = vperm.slane %v10533_v23, %v8204_v14  ;;  %v3817_v47 = vsel %vm556_vm2, %v3697_v1, %v3816_v42  ;;  %v10534_v61 = vlaneseq  ;;  %v3660_v13 = vperm.slane %v10536_v55, %v8204_v14  ;;  %v10538_v1 = vld [vmem:[#allocation109_spill] sm:$0xff] }
 0x3dd   : > { %v3784_v35 = vsel %vm560_vm4, %v3659_v2, %v3783_v40  ;;  %v3698_v29 = vperm.slane %v10537_v8, %v8204_v14  ;;  %v3809_v60 = vsel %vm554_vm1, %v3688_v44, %v3687_v12  ;;  %v3912_v3 = vsel %vm3911_vm10, %v8296_v28, -inf  ;;  %v10541_v2 = vld [vmem:[#allocation36_spill] sm:$0xff]  ;;  %v10542_v40 = vld [vmem:[#allocation106_spill] sm:$0xff]  ;;  %v10545_v28 = vld [vmem:[#allocation33_spill] sm:$0xff] }
 0x3de   : > { %v8218_v5 = vpop.xlane.xlu2 %3371  ;;  %v8313_v50 = vshrl.u32 %v10534_v61, 7  ;;  %v3789_v23 = vsel %vm556_vm2, %v3665_v56, %v3788_v20  ;;  %v3667_v42 = vperm.slane %v10538_v1, %v8204_v14  ;;  %v10539_v61 = vld [vmem:[#allocation35_spill] sm:$0xff]  ;;  %v3661_v44 = vperm.slane %v10541_v2, %v8204_v14  ;;  %v10543_v20 = vld [vmem:[#allocation97_spill] sm:$0xff] }
 0x3df   : > { %v3689_v9 = vperm.slane %v10539_v61, %v8204_v14  ;;  %v3666_v12 = vperm.slane %v10542_v40, %v8204_v14  ;;  %v3818_v56 = vsel %vm558_vm3, %v3698_v29, %v3817_v47  ;;  %v3700_v55 = vperm.slane %v10543_v20, %v8204_v14  ;;  %v10547_v20 = vld [vmem:[#allocation116_spill] sm:$0xff] }
 0x3e0   : > { %10535 = vst [vmem:[#allocation5_spill] sm:$0xff] %v8313_v50  ;;  %5936 = vset.pattern.permute.xlu2 %v8313_v50  ;;  %5937 = vset.pattern.permute.xlu0 %v8313_v50  ;;  %v3914_v1 = vmax.f32 %v3912_v3, %v3913_v48  ;;  %v3691_v34 = vperm.slane %v10544_v54, %v8204_v14  ;;  %v10548_v48 = vld [vmem:[#allocation111_spill] sm:$0xff] }
 0x3e1   : > { %5938 = vset.pattern.permute.xlu1 %v8313_v50  ;;  %v3810_v61 = vsel %vm556_vm2, %v3689_v9, %v3809_v60  ;;  %v3699_v2 = vperm.slane %v10545_v28, %v8204_v14  ;;  %v3785_v47 = vsel %vm562_vm5, %v3660_v13, %v3784_v35  ;;  %v3790_v29 = vsel %vm558_vm3, %v3666_v12, %v3789_v23 }
 0x3e2   : > { %v3690_v11 = vperm.slane %v10547_v20, %v8204_v14  ;;  %v3791_v9 = vsel %vm560_vm4, %v3667_v42, %v3790_v29  ;;  %v3672_v54 = vperm.slane %v10548_v48, %v8204_v14  ;;  %v8362_v35 = vsel %vm564_vm6, %v3661_v44, %v3785_v47  ;;  %v10550_v42 = vld [vmem:[#allocation14_spill] sm:$0xff]  ;;  %v10551_v29 = vld [vmem:[#allocation7_spill] sm:$0xff] }
 0x3e3   : > { %v8237_v38 = vpop.xlane.xlu0 %3419  ;;  %v3819_v60 = vsel %vm560_vm4, %v3699_v2, %v3818_v56  ;;  %v3673_v12 = vperm.slane %v10550_v42, %v8204_v14  ;;  %v3701_v20 = vperm.slane %v10551_v29, %v8204_v14  ;;  %v10552_v2 = vld [vmem:[#allocation108_spill] sm:$0xff]  ;;  %v10553_v44 = vld [vmem:[#allocation107_spill] sm:$0xff] }
 0x3e4   : > { %v8241_v58 = vpop.xlane.xlu1 %3386  ;;  %v3811_v3 = vsel %vm558_vm3, %v3690_v11, %v3810_v61  ;;  %v3820_v23 = vsel %vm562_vm5, %v3700_v55, %v3819_v60  ;;  %v3669_v48 = vperm.slane %v10552_v2, %v8204_v14  ;;  %v3680_v47 = vperm.slane %v10553_v44, %v8204_v14  ;;  %v10554_v55 = vld [vmem:[#allocation96_spill] sm:$0xff]  ;;  %v10556_v2 = vld [vmem:[#allocation122_spill] sm:$0xff] }
 0x3e5   : > { %v3812_v56 = vsel %vm560_vm4, %v3691_v34, %v3811_v3  ;;  %v3792_v11 = vsel %vm562_vm5, %v3668_v49, %v3791_v9  ;;  %v3692_v61 = vperm.slane %v10554_v55, %v8204_v14  ;;  %v3821_v34 = vsel %vm564_vm6, %v3701_v20, %v3820_v23  ;;  %v10557_v49 = vld [vmem:[#allocation27_spill] sm:$0xff] }
 0x3e6   : > { %v8245_v22 = vpop.xlane.xlu2 %3380  ;;  %v3694_v44 = vperm.slane %v10556_v2, %v8204_v14  ;;  %v3702_v9 = vperm.slane %v10557_v49, %v8204_v14  ;;  %v3793_v55 = vsel %vm564_vm6, %v3669_v48, %v3792_v11  ;;  %v3738_v48 = vperm.slane %v8241_v58, %v8204_v14  ;;  %v10559_v11 = vld [vmem:[#allocation112_spill] sm:$0xff] }
 0x3e7   : > { %v3736_v28 = vperm.slane %v8245_v22, %v8204_v14  ;;  %v3735_v22 = vperm.slane %v8212_v6, %v8204_v14  ;;  %v3813_v29 = vsel %vm562_vm5, %v3692_v61, %v3812_v56 }
 0x3e8   : > { %v8400_v56 = vsel %vm566_vm7, %v3702_v9, %v3821_v34 }
 0x3e9   : > { %v3851_v6 = vsel %vm554_vm1, %v3736_v28, %v3735_v22  ;;  %v10558_v28 = vld [vmem:[#allocation119_spill] sm:$0xff] }
 0x3ea   : > { %v3693_v20 = vperm.slane %v10558_v28, %v8204_v14 }
 0x3eb   : > { %v8268_v62 = vpop.xlane.xlu0 %3428 }
 0x3ec   : > { %v8276_v26 = vpop.xlane.xlu1 %3395  ;;  %v3814_v49 = vsel %vm564_vm6, %v3693_v20, %v3813_v29  ;;  %v10561_v29 = vld [vmem:[#allocation11_spill] sm:$0xff] }
 0x3ed   : > { %v8417_v9 = vsel %vm566_vm7, %v3694_v44, %v3814_v49 }
 0x3ee   : > { %v8291_v16 = vpop.xlane.xlu2 %3389  ;;  %v3939_v49 = vsel %vm3911_vm10, %v8417_v9, -inf }
 0x3f3   : > { %v8328_v51 = vpop.xlane.xlu0 %3437 }
 0x3f4   : > { %10540 = vst [vmem:[#allocation117_spill] sm:$0xff] %v8328_v51  ;;  %v3405_v8 = vpop.xlane.xlu1 %3404  ;;  %v10546_v51 = vld [vmem:[#allocation6_spill] sm:$0xff] }
 0x3f5   : > { %v3671_v40 = vperm.slane %v10546_v51, %v8204_v14  ;;  %v10549_v51 = vld [vmem:[#allocation34_spill] sm:$0xff]  ;;  %v3744_v22 = vperm.slane %v3405_v8, %v8204_v14 }
 0x3f6   : > { %v8351_v50 = vpop.xlane.xlu2 %3398  ;;  %v3674_v13 = vperm.slane %v10549_v51, %v8204_v14  ;;  %v10555_v51 = vld [vmem:[#allocation12_spill] sm:$0xff] }
 0x3f7   : > { %v3795_v60 = vsel %vm554_vm1, %v3672_v54, %v3671_v40  ;;  %v3679_v42 = vperm.slane %v10555_v51, %v8204_v14  ;;  %v3737_v40 = vperm.slane %v8174_v18, %v8204_v14  ;;  %v3739_v51 = vperm.slane %v8291_v16, %v8204_v14 }
 0x3f8   : > { %v3796_v23 = vsel %vm556_vm2, %v3673_v12, %v3795_v60  ;;  %v3915_v18 = vrot.slane %v3914_v1, 4  ;;  %v3743_v12 = vperm.slane %v8197_v52, %v8204_v14  ;;  %v3670_v60 = vperm.slane %v10559_v11, %v8204_v14 }
 0x3f9   : > { %v3852_v61 = vsel %vm556_vm2, %v3737_v40, %v3851_v6  ;;  %v3802_v34 = vsel %vm554_vm1, %v3680_v47, %v3679_v42  ;;  %v10560_v6 = vld [vmem:[#allocation115_spill] sm:$0xff]  ;;  %v3681_v40 = vperm.slane %v10561_v29, %v8204_v14  ;;  %v3940_v52 = vsel %vm3911_vm10, %v8400_v56, -inf  ;;  %v10564_v29 = vld [vmem:[#allocation17_spill] sm:$0xff] }
 0x3fa   : > { %v3682_v16 = vperm.slane %v10560_v6, %v8204_v14  ;;  %v3853_v58 = vsel %vm558_vm3, %v3738_v48, %v3852_v61  ;;  %v3858_v28 = vsel %vm554_vm1, %v3744_v22, %v3743_v12  ;;  %v3797_v20 = vsel %vm558_vm3, %v3674_v13, %v3796_v23  ;;  %v10562_v13 = vld [vmem:[#allocation110_spill] sm:$0xff] }
 0x3fb   : > { %v8385_v3 = vpop.xlane.xlu0 %3446  ;;  %v3854_v47 = vsel %vm560_vm4, %v3739_v51, %v3853_v58  ;;  %v3803_v44 = vsel %vm556_vm2, %v3681_v40, %v3802_v34  ;;  %v3740_v11 = vperm.slane %v8186_v45, %v8204_v14  ;;  %v3746_v61 = vperm.slane %v8208_v27, %v8204_v14  ;;  %v10563_v22 = vld [vmem:[#allocation42_spill] sm:$0xff] }
 0x3fc   : > { %v3414_v54 = vpop.xlane.xlu1 %3413  ;;  %v3683_v23 = vperm.slane %v10562_v13, %v8204_v14  ;;  %v3675_v51 = vperm.slane %v10563_v22, %v8204_v14  ;;  %v3742_v27 = vperm.slane %v8351_v50, %v8204_v14  ;;  %v3676_v40 = vperm.slane %v10564_v29, %v8204_v14  ;;  %v10568_v22 = vld [vmem:[#allocation8_spill] sm:$0xff] }
 0x3fd   : > { %v3855_v45 = vsel %vm562_vm5, %v3740_v11, %v3854_v47 }
 0x3fe   : > { %v3408_v2 = vpop.xlane.xlu2 %3407  ;;  %v3798_v6 = vsel %vm560_vm4, %v3675_v51, %v3797_v20  ;;  %v3749_v20 = vperm.slane %v8237_v38, %v8204_v14  ;;  %v3677_v51 = vperm.slane %v10568_v22, %v8204_v14 }
 0x3ff   : > { %v3745_v8 = vperm.slane %v3408_v2, %v8204_v14  ;;  %v3916_v2 = vmax.f32 %v3914_v1, %v3915_v18  ;;  %v3804_v1 = vsel %vm558_vm3, %v3682_v16, %v3803_v44  ;;  %v3941_v18 = vmax.f32 %v3939_v49, %v3940_v52 }
 0x400   : > { %v3741_v16 = vperm.slane %v8276_v26, %v8204_v14  ;;  %v3747_v52 = vperm.slane %v3414_v54, %v8204_v14  ;;  %v10566_v26 = vld [vmem:[#allocation114_spill] sm:$0xff] }
 0x401   : > { %v3859_v42 = vsel %vm556_vm2, %v3745_v8, %v3858_v28  ;;  %v8443_v8 = vsel %vm566_vm7, %v3670_v60, %v3793_v55  ;;  %v3805_v55 = vsel %vm560_vm4, %v3683_v23, %v3804_v1  ;;  %v10565_v60 = vld [vmem:[#allocation16_spill] sm:$0xff]  ;;  %v3917_v47 = vrot.slane %v3916_v2, 2 }
 0x402   : > { %v3860_v34 = vsel %vm558_vm3, %v3746_v61, %v3859_v42  ;;  %v3685_v28 = vperm.slane %v10565_v60, %v8204_v14  ;;  %v3856_v42 = vsel %vm564_vm6, %v3741_v16, %v3855_v45  ;;  %v3942_v49 = vrot.slane %v3941_v18, 4 }
 0x403   : > { %v8435_v48 = vpop.xlane.xlu0 %3455  ;;  %v3861_v44 = vsel %vm560_vm4, %v3747_v52, %v3860_v34  ;;  %v3684_v54 = vperm.slane %v10566_v26, %v8204_v14  ;;  %v8466_v11 = vsel %vm566_vm7, %v3742_v27, %v3856_v42  ;;  %v10567_v23 = vperm.slane %v10530_v36, %v8204_v14 }
 0x404   : > { %v3423_v12 = vpop.xlane.xlu1 %3422  ;;  %v3799_v1 = vsel %vm562_vm5, %v3676_v40, %v3798_v6  ;;  %v3922_v27 = vsel %vm3911_vm10, %v8443_v8, -inf  ;;  %v3918_v36 = vmax.f32 %v3916_v2, %v3917_v47  ;;  %v3966_v16 = vsel %vm3911_vm10, %v8466_v11, -inf }
 0x405   : > { %v3750_v61 = vperm.slane %v3423_v12, %v8204_v14  ;;  %v8475_v38 = vsel %vm566_vm7, %v10567_v23, %v8362_v35  ;;  %v3806_v12 = vsel %vm562_vm5, %v3684_v54, %v3805_v55  ;;  %v3943_v52 = vmax.f32 %v3941_v18, %v3942_v49 }
 0x406   : > { %v3417_v58 = vpop.xlane.xlu2 %3416  ;;  %v3807_v35 = vsel %vm564_vm6, %v3685_v28, %v3806_v12  ;;  %v3800_v60 = vsel %vm564_vm6, %v3677_v51, %v3799_v1  ;;  %v3921_v2 = vsel %vm3911_vm10, %v8475_v38, -inf  ;;  %v10570_v28 = vld [vmem:[#allocation113_spill] sm:$0xff]  ;;  %v3919_v26 = vrot.slane %v3918_v36, 1  ;;  %v10572_v1 = vld [vmem:[#allocation118_spill] sm:$0xff] }
 0x407   : > { %v3748_v50 = vperm.slane %v3417_v58, %v8204_v14  ;;  %v10569_v58 = vld [vmem:[#allocation40_spill] sm:$0xff]  ;;  %v3678_v47 = vperm.slane %v10570_v28, %v8204_v14  ;;  %v3923_v42 = vmax.f32 %v3921_v2, %v3922_v27  ;;  %v3944_v49 = vrot.slane %v3943_v52, 2 }
 0x408   : > { %v3686_v55 = vperm.slane %v10569_v58, %v8204_v14  ;;  %v3920_v27 = vmax.f32 %v3918_v36, %v3919_v26  ;;  %v3706_v28 = vperm.slane %v8067_v21, %v8204_v14  ;;  %v3711_v36 = vperm.slane %v8091_v30, %v8204_v14 }
 0x409   : > { %v3862_v13 = vsel %vm562_vm5, %v3748_v50, %v3861_v44  ;;  %v8509_v18 = vsel %vm566_vm7, %v3678_v47, %v3800_v60  ;;  %v3924_v22 = vrot.slane %v3923_v42, 4  ;;  %v3945_v58 = vmax.f32 %v3943_v52, %v3944_v49 }
 0x40a   : > { %v3863_v45 = vsel %vm564_vm6, %v3749_v20, %v3862_v13  ;;  %v8506_v44 = vsel %vm566_vm7, %v3686_v55, %v3807_v35  ;;  %v10571_v13 = vld [vmem:[#allocation54_spill] sm:$0xff]  ;;  %v3930_v51 = vsel %vm3911_vm10, %v8509_v18, -inf  ;;  %v3712_v35 = vperm.slane %v8120_v7, %v8204_v14 }
 0x40b   : > { %v8485_v34 = vsel %vm566_vm7, %v3750_v61, %v3863_v45  ;;  %v8487_v29 = vpop.xlane.xlu0 %3464  ;;  %v3931_v61 = vsel %vm3911_vm10, %v8506_v44, -inf  ;;  %v3703_v23 = vperm.slane %v10571_v13, %v8204_v14  ;;  %v3704_v45 = vperm.slane %v10572_v1, %v8204_v14  ;;  %v10573_v13 = vld [vmem:[#allocation95_spill] sm:$0xff] }
 0x40c   : > { %v3967_v6 = vsel %vm3911_vm10, %v8485_v34, -inf  ;;  %v8494_v40 = vpop.xlane.xlu1 %3431  ;;  %v8527_v60 = vmax.f32 %v3930_v51, %v3931_v61  ;;  %v8536_v7 = vmax.f32 %v3923_v42, %v3924_v22  ;;  %v3705_v1 = vperm.slane %v10573_v13, %v8204_v14  ;;  %v10574_v61 = vld [vmem:[#allocation9_spill] sm:$0xff] }
 0x40d   : > { %v3968_v50 = vmax.f32 %v3966_v16, %v3967_v6  ;;  %v3823_v2 = vsel %vm554_vm1, %v3704_v45, %v3703_v23  ;;  %v3727_v52 = vperm.slane %v8192_v41, %v8204_v14  ;;  %v3713_v30 = vperm.slane %v10574_v61, %v8204_v14  ;;  %v10575_v13 = vld [vmem:[#allocation121_spill] sm:$0xff] }
 0x40e   : > { %v8503_v20 = vpop.xlane.xlu2 %3425  ;;  %v3824_v23 = vsel %vm556_vm2, %v3705_v1, %v3823_v2  ;;  %v3728_v42 = vperm.slane %v8130_v46, %v8204_v14  ;;  %v3720_v22 = vperm.slane %v8149_v0, %v8204_v14  ;;  %v3933_v51 = vrot.slane %v8527_v60, 4  ;;  %v10576_v1 = vld [vmem:[#allocation31_spill] sm:$0xff] }
 0x40f   : > { %v3969_v54 = vrot.slane %v3968_v50, 4  ;;  %v3719_v41 = vperm.slane %v8059_v15, %v8204_v14  ;;  %v3825_v45 = vsel %vm558_vm3, %v3706_v28, %v3824_v23  ;;  %v3715_v46 = vperm.slane %v8138_v63, %v8204_v14 }
 0x410   : > { %v3730_v0 = vperm.slane %v8201_v57, %v8204_v14  ;;  %v3729_v15 = vperm.slane %v8189_v43, %v8204_v14  ;;  %v3707_v63 = vperm.slane %v10575_v13, %v8204_v14  ;;  %v3714_v57 = vperm.slane %v8116_v39, %v8204_v14  ;;  %v10577_v43 = vld [vmem:[#allocation87_spill] sm:$0xff] }
 0x411   : > { %v3970_v55 = vmax.f32 %v3968_v50, %v3969_v54  ;;  %v3830_v50 = vsel %vm554_vm1, %v3712_v35, %v3711_v36  ;;  %v3946_v54 = vrot.slane %v3945_v58, 1  ;;  %v3722_v23 = vperm.slane %v8086_v4, %v8204_v14 }
 0x412   : > { %v3831_v35 = vsel %vm556_vm2, %v3713_v30, %v3830_v50  ;;  %v3837_v50 = vsel %vm554_vm1, %v3720_v22, %v3719_v41  ;;  %v3731_v41 = vperm.slane %v8147_v59, %v8204_v14  ;;  %v3733_v59 = vperm.slane %v8218_v5, %v8204_v14 }
 0x413   : > { %v8519_v12 = vpop.xlane.xlu0 %3481  ;;  %v3971_v21 = vrot.slane %v3970_v55, 2  ;;  %v3947_v28 = vmax.f32 %v3945_v58, %v3946_v54  ;;  %v3716_v58 = vperm.slane %v10577_v43, %v8204_v14  ;;  %v3717_v13 = vperm.slane %v8134_v25, %v8204_v14 }
 0x414   : > { %v3992_v16 = vperm.slane %v8519_v12, %v8204_v14  ;;  %v8525_v6 = vpop.xlane.xlu1 %3440 }
 0x416   : > { %v4008_v47 = vmax.f32 %v3920_v27, %v3992_v16  ;;  %v8534_v26 = vpop.xlane.xlu2 %3434  ;;  %v3721_v27 = vperm.slane %v8168_v53, %v8204_v14  ;;  %v3844_v16 = vsel %vm554_vm1, %v3728_v42, %v3727_v52  ;;  %v3710_v52 = vperm.slane %v10576_v1, %v8204_v14 }
 0x417   : > { %v3845_v61 = vsel %vm556_vm2, %v3729_v15, %v3844_v16  ;;  %v3832_v42 = vsel %vm558_vm3, %v3714_v57, %v3831_v35  ;;  %v3708_v15 = vperm.slane %v8062_v10, %v8204_v14  ;;  %v3724_v35 = vperm.slane %v8179_v31, %v8204_v14 }
 0x418   : > { %v8543_v49 = vperm.slane %v4008_v47, 0  ;;  %v3972_v47 = vmax.f32 %v3970_v55, %v3971_v21  ;;  %v3838_v54 = vsel %vm556_vm2, %v3721_v27, %v3837_v50  ;;  %v3826_v21 = vsel %vm560_vm4, %v3707_v63, %v3825_v45 }
 0x419   : > { %v3846_v39 = vsel %vm558_vm3, %v3730_v0, %v3845_v61  ;;  %v3833_v22 = vsel %vm560_vm4, %v3715_v46, %v3832_v42  ;;  %v3709_v45 = vperm.slane %v8101_v17, %v8204_v14  ;;  %v3839_v4 = vsel %vm558_vm3, %v3722_v23, %v3838_v54 }
 0x41a   : > { %4085 = vperm.xlu2 %5936, %v8543_v49   ;;  %v3973_v16 = vrot.slane %v3972_v47, 1  ;;  %v3723_v46 = vperm.slane %v8162_v33, %v8204_v14  ;;  %v3847_v0 = vsel %vm560_vm4, %v3731_v41, %v3846_v39  ;;  %v3926_v10 = vrot.slane %v8536_v7, 2 }
 0x41b   : > { %v8565_v2 = vpop.xlane.xlu0 %3490  ;;  %v3834_v17 = vsel %vm562_vm5, %v3716_v58, %v3833_v22  ;;  %v3732_v31 = vperm.slane %v8199_v32, %v8204_v14  ;;  %v3751_v32 = vperm.slane %v8503_v20, %v8204_v14  ;;  %v3725_v58 = vperm.slane %v8113_v19, %v8204_v14  ;;  %v10578_v19 = vld [vmem:[#allocation123_spill] sm:$0xff] }
 0x41c   : > { %v3995_v53 = vperm.slane %v8565_v2, %v8204_v14  ;;  %v8571_v36 = vpop.xlane.xlu1 %3449  ;;  %v3840_v5 = vsel %vm560_vm4, %v3723_v46, %v3839_v4  ;;  %v3974_v63 = vmax.f32 %v3972_v47, %v3973_v16  ;;  %v3835_v25 = vsel %vm564_vm6, %v3717_v13, %v3834_v17 }
 0x41d   : > { %v3841_v43 = vsel %vm562_vm5, %v3724_v35, %v3840_v5  ;;  %v3752_v23 = vperm.slane %v8268_v62, %v8204_v14  ;;  %v3726_v39 = vperm.slane %v10578_v19, %v8204_v14  ;;  %v3754_v62 = vperm.slane %v8534_v26, %v8204_v14 }
 0x41e   : > { %v4011_v30 = vmax.f32 %v3947_v28, %v3995_v53  ;;  %v8584_v55 = vpop.xlane.xlu2 %3443  ;;  %v3827_v28 = vsel %vm562_vm5, %v3708_v15, %v3826_v21  ;;  %v3718_v53 = vperm.slane %v8153_v24, %v8204_v14  ;;  %v3848_v24 = vsel %vm562_vm5, %v3732_v31, %v3847_v0 }
 0x41f   : > { %v3828_v50 = vsel %vm564_vm6, %v3709_v45, %v3827_v28  ;;  %v3849_v47 = vsel %vm564_vm6, %v3733_v59, %v3848_v24  ;;  %v3734_v21 = vperm.slane %v8160_v37, %v8204_v14  ;;  %v3842_v22 = vsel %vm564_vm6, %v3725_v58, %v3841_v43 }
 0x420   : > { %v8594_v27 = vperm.slane %v4011_v30, 0  ;;  %v8633_v30 = vsel %vm566_vm7, %v3718_v53, %v3835_v25  ;;  %v8641_v42 = vsel %vm566_vm7, %v3710_v52, %v3828_v50  ;;  %v3865_v37 = vsel %vm554_vm1, %v3752_v23, %v3751_v32 }
 0x421   : > { %v8649_v16 = vsel %vm566_vm7, %v3734_v21, %v3849_v47  ;;  %v3759_v15 = vperm.slane %v8571_v36, %v8204_v14  ;;  %v3949_v52 = vsel %vm3911_vm10, %v8633_v30, -inf  ;;  %v3753_v45 = vperm.slane %v8494_v40, %v8204_v14 }
 0x422   : > { %4106 = vperm.xlu2 %5936, %v8594_v27   ;;  %v8665_v46 = vsel %vm566_vm7, %v3726_v39, %v3842_v22  ;;  %v3927_v0 = vmax.f32 %v8536_v7, %v3926_v10  ;;  %v3948_v36 = vsel %vm3911_vm10, %v8641_v42, -inf  ;;  %v3958_v59 = vsel %vm3911_vm10, %v8649_v16, -inf  ;;  %v10579_v7 = vld [vmem:[#allocation117_spill] sm:$0xff] }
 0x423   : > { %v8616_v33 = vpop.xlane.xlu0 %3499  ;;  %v3761_v40 = vperm.slane %v8435_v48, %v8204_v14  ;;  %v3866_v28 = vsel %vm556_vm2, %v3753_v45, %v3865_v37  ;;  %v3950_v53 = vmax.f32 %v3948_v36, %v3949_v52  ;;  %v3957_v13 = vsel %vm3911_vm10, %v8665_v46, -inf }
 0x424   : > { %v3998_v1 = vperm.slane %v8616_v33, %v8204_v14  ;;  %v3459_v57 = vpop.xlane.xlu1 %3458  ;;  %v3867_v31 = vsel %vm558_vm3, %v3754_v62, %v3866_v28  ;;  %v3755_v10 = vperm.slane %v10579_v7, %v8204_v14  ;;  %v3959_v48 = vmax.f32 %v3957_v13, %v3958_v59 }
 0x425   : > { %v3762_v50 = vperm.slane %v3459_v57, %v8204_v14  ;;  %v3757_v32 = vperm.slane %v8584_v55, %v8204_v14  ;;  %v3928_v58 = vrot.slane %v3927_v0, 1  ;;  %v3951_v25 = vrot.slane %v3950_v53, 4 }
 0x426   : > { %v4014_v54 = vmax.f32 %v3974_v63, %v3998_v1  ;;  %v3453_v61 = vpop.xlane.xlu2 %3452  ;;  %v3934_v1 = vmax.f32 %v8527_v60, %v3933_v51  ;;  %v3868_v24 = vsel %vm560_vm4, %v3755_v10, %v3867_v31  ;;  %v3756_v47 = vperm.slane %v8525_v6, %v8204_v14 }
 0x427   : > { %v3760_v20 = vperm.slane %v3453_v61, %v8204_v14  ;;  %v3960_v51 = vrot.slane %v3959_v48, 4  ;;  %v3764_v57 = vperm.slane %v8487_v29, %v8204_v14  ;;  %v3952_v19 = vmax.f32 %v3950_v53, %v3951_v25 }
 0x428   : > { %v8646_v41 = vperm.slane %v4014_v54, 0  ;;  %v3935_v60 = vrot.slane %v3934_v1, 2  ;;  %v3869_v21 = vsel %vm562_vm5, %v3756_v47, %v3868_v24  ;;  %v3758_v6 = vperm.slane %v8385_v3, %v8204_v14 }
 0x429   : > { %v3872_v26 = vsel %vm554_vm1, %v3760_v20, %v3759_v15  ;;  %v3870_v23 = vsel %vm564_vm6, %v3757_v32, %v3869_v21  ;;  %v3929_v20 = vmax.f32 %v3927_v0, %v3928_v58  ;;  %v3953_v59 = vrot.slane %v3952_v19, 2 }
 0x42a   : > { %v3873_v5 = vsel %vm556_vm2, %v3761_v40, %v3872_v26  ;;  %v3936_v29 = vmax.f32 %v3934_v1, %v3935_v60  ;;  %v8707_v15 = vsel %vm566_vm7, %v3758_v6, %v3870_v23  ;;  %v3961_v26 = vmax.f32 %v3959_v48, %v3960_v51 }
 0x42b   : > { %v3874_v54 = vsel %vm558_vm3, %v3762_v50, %v3873_v5  ;;  %v3975_v40 = vsel %vm3911_vm10, %v8707_v15, -inf  ;;  %v3954_v10 = vmax.f32 %v3952_v19, %v3953_v59  ;;  %v10581_v59 = vld [vmem:[#allocation124_spill] sm:$0xff] }
 0x42c   : > { %v3468_v17 = vpop.xlane.xlu1 %3467  ;;  %v3937_v53 = vrot.slane %v3936_v29, 1  ;;  %v3962_v31 = vrot.slane %v3961_v26, 2 }
 0x42d   : > { %v3765_v37 = vperm.slane %v3468_v17, %v8204_v14 }
 0x42e   : > { %v3462_v63 = vpop.xlane.xlu2 %3461  ;;  %v3938_v1 = vmax.f32 %v3936_v29, %v3937_v53  ;;  %v3963_v50 = vmax.f32 %v3961_v26, %v3962_v31  ;;  %v10580_v26 = vld [vmem:[#allocation25_spill] sm:$0xff] }
 0x42f   : > { %v3763_v43 = vperm.slane %v3462_v63, %v8204_v14 }
 0x431   : > { %v3875_v61 = vsel %vm560_vm4, %v3763_v43, %v3874_v54  ;;  %v3955_v43 = vrot.slane %v3954_v10, 1  ;;  %v3964_v54 = vrot.slane %v3963_v50, 1 }
 0x432   : > { %v3876_v39 = vsel %vm562_vm5, %v3764_v57, %v3875_v61 }
 0x433   : > { %v3877_v0 = vsel %vm564_vm6, %v3765_v37, %v3876_v39  ;;  %v3956_v61 = vmax.f32 %v3954_v10, %v3955_v43  ;;  %v3965_v23 = vmax.f32 %v3963_v50, %v3964_v54 }
 0x434   : > { %v8698_v55 = vpop.xlane.xlu1 %3484 }
 0x435   : > { %v3993_v22 = vperm.slane %v8698_v55, %v8204_v14 }
 0x436   : > { %v3471_v62 = vpop.xlane.xlu2 %3470 }
 0x437   : > { %v4009_v52 = vmax.f32 %v3929_v20, %v3993_v22  ;;  %v3766_v45 = vperm.slane %v3471_v62, %v8204_v14 }
 0x439   : > { %v8711_v36 = vperm.slane %v4009_v52, 0  ;;  %v8714_v3 = vsel %vm566_vm7, %v3766_v45, %v3877_v0  ;;  %v4024_v0 = vsub.f32 %v10580_v26, %v8543_v49 }
 0x43a   : > { %v3976_v28 = vsel %vm3911_vm10, %v8714_v3, -inf }
 0x43b   : > { %v3977_v17 = vmax.f32 %v3975_v40, %v3976_v28  ;;  %4092 = vperm.xlu0 %5937, %v8711_v36   ;;  %v4025_v40 = vsub.f32 %v10581_v59, %v8543_v49  ;;  %v4040_v28 = vmul.f32 1.442695, %v4024_v0 }
 0x43c   : > { %v8721_v13 = vpop.xlane.xlu1 %3493 }
 0x43d   : > { %v3978_v7 = vrot.slane %v3977_v17, 4  ;;  %v3996_v58 = vperm.slane %v8721_v13, %v8204_v14  ;;  %5948 = vpow2.f32 %v4040_v28 }
 0x43e   : > { %v8723_v5 = vpop.xlane.xlu2 %3487 }
 0x43f   : > { %v3979_v63 = vmax.f32 %v3977_v17, %v3978_v7  ;;  %v3994_v48 = vperm.slane %v8723_v5, %v8204_v14  ;;  %v4012_v21 = vmax.f32 %v3956_v61, %v3996_v58  ;;  %v4042_v17 = vmul.f32 1.442695, %v4025_v40 }
 0x440   : > { %v6082_v7 = vmov 0  }
 0x441   : > { %v4010_v24 = vmax.f32 %v3938_v1, %v3994_v48  ;;  %v3980_v32 = vrot.slane %v3979_v63, 2  ;;  %v8737_v37 = vperm.slane %v4012_v21, 0  ;;  %5950 = vpow2.f32 %v4042_v17 }
 0x442   : > { %v4026_v1 = vsub.f32 %v8475_v38, %v8711_v36  ;;  %v4027_v48 = vsub.f32 %v8443_v8, %v8711_v36 }
 0x443   : > { %v4018_v25 = vperm.slane %v4010_v24, 0  ;;  %v3981_v47 = vmax.f32 %v3979_v63, %v3980_v32  ;;  %v8755_v53 = vpop.eup %5948  ;;  %5939 = vset.pattern.permute.xlu0 %v6082_v7 }
 0x444   : > { %v8729_v60 = vpop.xlane.xlu1 %3502  ;;  %v4168_v10 = vsel %vm3911_vm10, %v8755_v53, 0.0  ;;  %v4044_v24 = vmul.f32 1.442695, %v4026_v1  ;;  %v4046_v32 = vmul.f32 1.442695, %v4027_v48 }
 0x445   : > { %4099 = vperm.xlu1 %5938, %v4018_v25   ;;  %v3982_v51 = vrot.slane %v3981_v47, 1  ;;  %v3999_v6 = vperm.slane %v8729_v60, %v8204_v14  ;;  %v4029_v54 = vsub.f32 %v8506_v44, %v4018_v25 }
 0x446   : > { %v8731_v57 = vpop.xlane.xlu2 %3496 }
 0x447   : > { %v3997_v20 = vperm.slane %v8731_v57, %v8204_v14  ;;  %v3983_v19 = vmax.f32 %v3981_v47, %v3982_v51  ;;  %v8757_v31 = vpop.eup %5950  ;;  %v4028_v47 = vsub.f32 %v8509_v18, %v4018_v25  ;;  %v4050_v51 = vmul.f32 1.442695, %v4029_v54 }
 0x448   : > { %v4169_v49 = vsel %vm3911_vm10, %v8757_v31, 0.0 }
 0x449   : > { %v4013_v39 = vmax.f32 %v3965_v23, %v3997_v20  ;;  %v4015_v22 = vmax.f32 %v3983_v19, %v3999_v6  ;;  %v8763_v63 = vadd.f32 %v4169_v49, %v4168_v10  ;;  %v4048_v61 = vmul.f32 1.442695, %v4028_v47 }
 0x44b   : > { %v8739_v62 = vperm.slane %v4013_v39, 0  ;;  %v8741_v29 = vperm.slane %v4015_v22, 0 }
 0x44d   : > { %4113 = vperm.xlu1 %5938, %v8737_v37   ;;  %4120 = vperm.xlu2 %5936, %v8739_v62  }
 0x455   : > { %4127 = vperm.xlu1 %5938, %v8646_v41   ;;  %4134 = vperm.xlu2 %5936, %v8741_v29  }
 0x45d   : > { %5940 = vset.pattern.permute.xlu1 %v6082_v7  ;;  %5941 = vset.pattern.permute.xlu2 %v6082_v7 }
 0x474   : > { %v4086_v50 = vpop.permute.xlu2 %4085 }
 0x475   : > { %v4144_v43 = vsub.f32 %v8519_v12, %v4086_v50 }
 0x477   : > { %v4152_v58 = vmul.f32 1.442695, %v4144_v43 }
 0x479   : > { %5952 = vpow2.f32 %v4152_v58 }
 0x47a   : > { %5954 = vpow2.f32 %v4044_v24 }
 0x47b   : > { %5956 = vpow2.f32 %v4046_v32 }
 0x47c   : > { %5958 = vpow2.f32 %v4048_v61  ;;  %v4107_v6 = vpop.permute.xlu2 %4106 }
 0x47d   : > { %5960 = vpow2.f32 %v4050_v51  ;;  %v4147_v17 = vsub.f32 %v8565_v2, %v4107_v6  ;;  %v4296_v2 = vperm.slane %v8755_v53, 0  ;;  %v4331_v51 = vperm.slane %v8755_v53, 5 }
 0x47e   : > { %v4394_v6 = vperm.slane %v8757_v31, 6 }
 0x47f   : > { %v5953_v21 = vpop.eup %5952  ;;  %v4158_v7 = vmul.f32 1.442695, %v4147_v17 }
 0x480   : > { %v8772_v38 = vpop.eup %5954  ;;  %4249 = vperm.xlu0 %5939, %v5953_v21  }
 0x481   : > { %v8774_v8 = vpop.eup %5956  ;;  %v4177_v12 = vsel %vm3911_vm10, %v8772_v38, 0.0 }
 0x482   : > { %v4178_v18 = vsel %vm3911_vm10, %v8774_v8, 0.0  ;;  %v8782_v44 = vpop.eup %5958 }
 0x483   : > { %v8780_v36 = vadd.f32 %v4178_v18, %v4177_v12  ;;  %v8784_v25 = vpop.eup %5960  ;;  %v4186_v23 = vsel %vm3911_vm10, %v8782_v44, 0.0 }
 0x484   : > { %v4187_v20 = vsel %vm3911_vm10, %v8784_v25, 0.0 }
 0x485   : > { %v8790_v19 = vadd.f32 %v4187_v20, %v4186_v23  ;;  %v4303_v20 = vperm.slane %v8755_v53, 1 }
 0x4a7   : > { %v4121_v39 = vpop.permute.xlu2 %4120 }
 0x4a8   : > { %v4149_v22 = vsub.f32 %v8731_v57, %v4121_v39  ;;  %v10582_v57 = vld [vmem:[#allocation5_spill] sm:$0xff]  ;;  %v4310_v39 = vperm.slane %v8755_v53, 2 }
 0x4aa   : > { %v4162_v26 = vmul.f32 1.442695, %v4149_v22 }
 0x4ac   : > { %5962 = vpow2.f32 %v4162_v26 }
 0x4ad   : > { %v4093_v0 = vpop.permute.xlu0 %4092 }
 0x4ae   : > { %v4145_v59 = vsub.f32 %v8698_v55, %v4093_v0  ;;  %v4317_v0 = vperm.slane %v8755_v53, 3 }
 0x4af   : > { %v4135_v32 = vpop.permute.xlu2 %4134 }
 0x4b0   : > { %v4154_v40 = vmul.f32 1.442695, %v4145_v59  ;;  %v4415_v59 = vperm.slane %v8772_v38, 1 }
 0x4b2   : > { %v5963_v28 = vpop.eup %5962  ;;  %5964 = vpow2.f32 %v4154_v40  ;;  %v4324_v40 = vperm.slane %v8755_v53, 4 }
 0x4b3   : > { %4264 = vperm.xlu0 %5939, %v5963_v28   ;;  %5966 = vpow2.f32 %v4158_v7  ;;  %v4338_v7 = vperm.slane %v8755_v53, 6 }
 0x4b7   : > { %v4100_v10 = vpop.permute.xlu1 %4099 }
 0x4b8   : > { %v5965_v49 = vpop.eup %5964  ;;  %v4146_v1 = vsub.f32 %v8723_v5, %v4100_v10  ;;  %v4151_v5 = vsub.f32 %v8729_v60, %v4135_v32  ;;  %v4373_v60 = vperm.slane %v8757_v31, 3  ;;  %v4436_v10 = vperm.slane %v8772_v38, 4 }
 0x4b9   : > { %4252 = vperm.xlu1 %5940, %v5965_v49   ;;  %v5967_v43 = vpop.eup %5966  ;;  %v4030_v32 = vsub.f32 %v8417_v9, %v8594_v27  ;;  %v4422_v9 = vperm.slane %v8772_v38, 2 }
 0x4ba   : > { %v4156_v48 = vmul.f32 1.442695, %v4146_v1  ;;  %v4166_v61 = vmul.f32 1.442695, %v4151_v5  ;;  %v4401_v5 = vperm.slane %v8757_v31, 7 }
 0x4bb   : > { %5942 = vset.pattern.permute.xlu0 %v10582_v57 }
 0x4bc   : > { %5968 = vpow2.f32 %v4156_v48 }
 0x4bf   : > { %v4114_v50 = vpop.permute.xlu1 %4113 }
 0x4c0   : > { %v4148_v55 = vsub.f32 %v8721_v13, %v4114_v50  ;;  %v4352_v13 = vperm.slane %v8757_v31, 0  ;;  %v4359_v50 = vperm.slane %v8757_v31, 1 }
 0x4c1   : > { %4258 = vperm.xlu1 %5940, %v5967_v43   ;;  %v4457_v43 = vperm.slane %v8772_v38, 7 }
 0x4c2   : > { %v5969_v24 = vpop.eup %5968  ;;  %v4160_v58 = vmul.f32 1.442695, %v4148_v55  ;;  %v4366_v55 = vperm.slane %v8757_v31, 2 }
 0x4c3   : > { %4255 = vperm.xlu2 %5941, %v5969_v24   ;;  %4301 = vperm.xlu0 %5942, %v4296_v2   ;;  %v4478_v2 = vperm.slane %v8774_v8, 2  ;;  %v4387_v24 = vperm.slane %v8757_v31, 5 }
 0x4c4   : > { %5970 = vpow2.f32 %v4160_v58  ;;  %v4031_v58 = vsub.f32 %v8400_v56, %v8594_v27  ;;  %v4520_v56 = vperm.slane %v8782_v44, 0  ;;  %v4429_v27 = vperm.slane %v8772_v38, 3 }
 0x4c7   : > { %v4128_v47 = vpop.permute.xlu1 %4127 }
 0x4c8   : > { %v4150_v54 = vsub.f32 %v8616_v33, %v4128_v47  ;;  %v4171_v33 = vrot.slane %v8763_v63, 4  ;;  %v4499_v47 = vperm.slane %v8774_v8, 5 }
 0x4ca   : > { %v5971_v21 = vpop.eup %5970  ;;  %v4164_v12 = vmul.f32 1.442695, %v4150_v54  ;;  %v4172_v22 = vadd.f32 %v4171_v33, %v8763_v63  ;;  %v4345_v63 = vperm.slane %v8755_v53, 7  ;;  %v4380_v53 = vperm.slane %v8757_v31, 4 }
 0x4cb   : > { %4261 = vperm.xlu2 %5941, %v5971_v21   ;;  %4336 = vperm.xlu0 %5942, %v4331_v51   ;;  %v4408_v54 = vperm.slane %v8772_v38, 0  ;;  %v4052_v51 = vmul.f32 1.442695, %v4030_v32  ;;  %v4054_v21 = vmul.f32 1.442695, %v4031_v58  ;;  %v4506_v32 = vperm.slane %v8774_v8, 6 }
 0x4cc   : > { %5972 = vpow2.f32 %v4164_v12  ;;  %v4173_v26 = vrot.slane %v4172_v22, 2  ;;  %v4604_v58 = vperm.slane %v8784_v25, 4 }
 0x4cd   : > { %5974 = vpow2.f32 %v4166_v61  ;;  %v4189_v61 = vrot.slane %v8790_v19, 4 }
 0x4ce   : > { %v4174_v28 = vadd.f32 %v4173_v26, %v4172_v22  ;;  %5976 = vpow2.f32 %v4052_v51 }
 0x4cf   : > { %v4190_v12 = vadd.f32 %v4189_v61, %v8790_v19  ;;  %5978 = vpow2.f32 %v4054_v21  ;;  %v4541_v19 = vperm.slane %v8782_v44, 3 }
 0x4d0   : > { %v4175_v17 = vrot.slane %v4174_v28, 1 }
 0x4d1   : > { %v4191_v31 = vrot.slane %v4190_v12, 2 }
 0x4d2   : > { %v5973_v18 = vpop.eup %5972  ;;  %v4176_v1 = vadd.f32 %v4175_v17, %v4174_v28  ;;  %v4464_v17 = vperm.slane %v8774_v8, 0 }
 0x4d3   : > { %v5975_v23 = vpop.eup %5974  ;;  %4267 = vperm.xlu1 %5940, %v5973_v18   ;;  %4357 = vperm.xlu0 %5942, %v4352_v13  }
 0x4d4   : > { %4270 = vperm.xlu2 %5941, %v5975_v23   ;;  %v8841_v13 = vpop.eup %5976  ;;  %v4192_v23 = vadd.f32 %v4191_v31, %v4190_v12 }
 0x4d5   : > { %v8843_v18 = vpop.eup %5978  ;;  %v4195_v33 = vsel %vm3911_vm10, %v8841_v13, 0.0 }
 0x4db   : > { %5943 = vset.pattern.permute.xlu1 %v10582_v57  ;;  %4378 = vperm.xlu0 %5942, %v4373_v60   ;;  %v4443_v60 = vperm.slane %v8772_v38, 5 }
 0x4dc   : > { %5944 = vset.pattern.permute.xlu2 %v10582_v57 }
 0x4e3   : > { %4308 = vperm.xlu1 %5943, %v4303_v20   ;;  %4399 = vperm.xlu0 %5942, %v4394_v6   ;;  %v4196_v20 = vsel %vm3911_vm10, %v8843_v18, 0.0  ;;  %v4450_v6 = vperm.slane %v8772_v38, 6  ;;  %v4471_v38 = vperm.slane %v8774_v8, 1 }
 0x4e4   : > { %4315 = vperm.xlu2 %5944, %v4310_v39   ;;  %v4193_v39 = vrot.slane %v4192_v23, 1  ;;  %v4197_v22 = vadd.f32 %v4196_v20, %v4195_v33  ;;  %v10592_v20 = vld [vmem:[#allocation46_spill] sm:$0xff] }
 0x4e6   : > { %v4198_v28 = vrot.slane %v4197_v22, 4 }
 0x4eb   : > { %4322 = vperm.xlu1 %5943, %v4317_v0   ;;  %4420 = vperm.xlu0 %5942, %v4415_v59   ;;  %v4194_v0 = vadd.f32 %v4193_v39, %v4192_v23  ;;  %v4548_v39 = vperm.slane %v8782_v44, 4 }
 0x4ec   : > { %4329 = vperm.xlu2 %5944, %v4324_v40  }
 0x4f2   : > { %v8816_v49 = vpop.permute.xlu0 %4249 }
 0x4f3   : > { %10583 = vst [vmem:[#allocation102_spill] sm:$0xff] %v8816_v49  ;;  %v4272_v48 = vperm.slane %v8816_v49, %v8204_v14  ;;  %4343 = vperm.xlu1 %5943, %v4338_v7   ;;  %4441 = vperm.xlu0 %5942, %v4436_v10   ;;  %v4562_v7 = vperm.slane %v8782_v44, 6  ;;  %v4199_v10 = vadd.f32 %v4198_v28, %v4197_v22  ;;  %v4646_v22 = vperm.slane %v8841_v13, 2 }
 0x4f4   : > { %4350 = vperm.xlu2 %5944, %v4345_v63   ;;  %v4555_v28 = vperm.slane %v8782_v44, 5 }
 0x4f5   : > { %v8821_v57 = vadd.f32 %v4272_v48, %v4176_v1  ;;  %v4200_v63 = vrot.slane %v4199_v10, 2  ;;  %v4485_v1 = vperm.slane %v8774_v8, 3  ;;  %v4583_v48 = vperm.slane %v8784_v25, 1 }
 0x4fb   : > { %4364 = vperm.xlu1 %5943, %v4359_v50   ;;  %4462 = vperm.xlu0 %5942, %v4457_v43   ;;  %v4492_v50 = vperm.slane %v8774_v8, 4 }
 0x4fc   : > { %4371 = vperm.xlu2 %5944, %v4366_v55  }
 0x503   : > { %4385 = vperm.xlu1 %5943, %v4380_v53   ;;  %4483 = vperm.xlu0 %5942, %v4478_v2   ;;  %v4201_v53 = vadd.f32 %v4200_v63, %v4199_v10 }
 0x504   : > { %4392 = vperm.xlu2 %5944, %v4387_v24  }
 0x505   : > { %v4202_v24 = vrot.slane %v4201_v53, 1 }
 0x50b   : > { %4406 = vperm.xlu1 %5943, %v4401_v5   ;;  %4504 = vperm.xlu0 %5942, %v4499_v47   ;;  %v4513_v5 = vperm.slane %v8774_v8, 7  ;;  %v4534_v8 = vperm.slane %v8782_v44, 2 }
 0x50c   : > { %4413 = vperm.xlu2 %5944, %v4408_v54   ;;  %v4203_v54 = vadd.f32 %v4202_v24, %v4201_v53  ;;  %v4569_v53 = vperm.slane %v8782_v44, 7  ;;  %v4667_v24 = vperm.slane %v8841_v13, 5 }
 0x513   : > { %4427 = vperm.xlu1 %5943, %v4422_v9   ;;  %4525 = vperm.xlu0 %5942, %v4520_v56   ;;  %v4527_v9 = vperm.slane %v8782_v44, 1  ;;  %v4625_v56 = vperm.slane %v8784_v25, 7 }
 0x514   : > { %4434 = vperm.xlu2 %5944, %v4429_v27   ;;  %v10590_v27 = vld [vmem:[#allocation50_spill] sm:$0xff] }
 0x515   : > { %v1875_v31 = vrot.slane %v10590_v27, 4 }
 0x51b   : > { %4448 = vperm.xlu1 %5943, %v4443_v60   ;;  %4546 = vperm.xlu0 %5942, %v4541_v19   ;;  %v10591_v19 = vld [vmem:[#allocation38_spill] sm:$0xff] }
 0x51c   : > { %4455 = vperm.xlu2 %5944, %v4450_v6   ;;  %v1876_v33 = vsel %vm775_vm8, %v1875_v31, %v10591_v19  ;;  %v1863_v6 = vrot.slane %v10592_v20, 4 }
 0x51d   : > { %v8852_v26 = vpop.permute.xlu2 %4255 }
 0x51e   : > { %10584 = vst [vmem:[#allocation103_spill] sm:$0xff] %v8852_v26  ;;  %v4274_v59 = vperm.slane %v8852_v26, %v8204_v14 }
 0x520   : > { %v8856_v40 = vadd.f32 %v4274_v59, %v4194_v0  ;;  %v10593_v0 = vld [vmem:[#allocation92_spill] sm:$0xff] }
 0x521   : > { %v1882_v59 = vperm.slane %v1876_v33, %v10593_v0 }
 0x523   : > { %4469 = vperm.xlu1 %5943, %v4464_v17   ;;  %4567 = vperm.xlu0 %5942, %v4562_v7   ;;  %v10594_v17 = vld [vmem:[#allocation13_spill] sm:$0xff]  ;;  %v1887_v10 = vrot.slane %v1882_v59, 4 }
 0x524   : > { %4476 = vperm.xlu2 %5944, %v4471_v38   ;;  %v1864_v7 = vsel %vm775_vm8, %v1863_v6, %v10594_v17  ;;  %v10599_v6 = vld [vmem:[#allocation72_spill] sm:$0xff] }
 0x525   : > { %v8866_v55 = vpop.permute.xlu2 %4261  ;;  %v8868_v2 = vpop.permute.xlu0 %4264 }
 0x526   : > { %10586 = vst [vmem:[#allocation28_spill] sm:$0xff] %v8866_v55 }
 0x527   : > { %10587 = vst [vmem:[#allocation21_spill] sm:$0xff] %v8868_v2 }
 0x52b   : > { %v8864_v43 = vpop.permute.xlu1 %4252  ;;  %4490 = vperm.xlu1 %5943, %v4485_v1   ;;  %4588 = vperm.xlu0 %5942, %v4583_v48   ;;  %v1877_v1 = vrot.slane %v10591_v19, 4  ;;  %v1870_v48 = vperm.slane %v1864_v7, %v10593_v0 }
 0x52c   : > { %10585 = vst [vmem:[#allocation104_spill] sm:$0xff] %v8864_v43  ;;  %4497 = vperm.xlu2 %5944, %v4492_v50  }
 0x52d   : > { %v1878_v50 = vsel %vm775_vm8, %v10590_v27, %v1877_v1  ;;  %v10597_v27 = vld [vmem:[#allocation94_spill] sm:$0xff]  ;;  %v4590_v1 = vperm.slane %v8784_v25, 2 }
 0x52e   : > { %v8877_v21 = vpop.permute.xlu2 %4270 }
 0x52f   : > { %10589 = vst [vmem:[#allocation22_spill] sm:$0xff] %v8877_v21 }
 0x533   : > { %4511 = vperm.xlu1 %5943, %v4506_v32   ;;  %v8873_v47 = vpop.permute.xlu1 %4258  ;;  %4609 = vperm.xlu0 %5942, %v4604_v58   ;;  %v1888_v32 = vsel %vm775_vm8, %v1887_v10, %v1870_v48  ;;  %v4576_v58 = vperm.slane %v8784_v25, 0 }
 0x534   : > { %10588 = vst [vmem:[#allocation105_spill] sm:$0xff] %v8873_v47  ;;  %v4275_v61 = vperm.slane %v8873_v47, %v8204_v14  ;;  %4518 = vperm.xlu2 %5944, %v4513_v5   ;;  %v1865_v5 = vrot.slane %v10594_v17, 4  ;;  %v1894_v31 = vperm.slane %v1888_v32, %v10597_v27 }
 0x535   : > { %v4302_v51 = vpop.permute.xlu0 %4301 }
 0x536   : > { %v8879_v12 = vadd.f32 %v4275_v61, %v4203_v54  ;;  %v10595_v54 = vld [vmem:[#allocation59_spill] sm:$0xff] }
 0x537   : > { %v1987_v61 = vrot.slane %v10595_v54, 4 }
 0x53b   : > { %4532 = vperm.xlu1 %5943, %v4527_v9   ;;  %4630 = vperm.xlu0 %5942, %v4625_v56   ;;  %v1886_v9 = vperm.slane %v1878_v50, %v10593_v0  ;;  %v1866_v56 = vsel %vm775_vm8, %v10592_v20, %v1865_v5  ;;  %v4688_v50 = vperm.slane %v8843_v18, 0 }
 0x53c   : > { %4539 = vperm.xlu2 %5944, %v4534_v8   ;;  %v10596_v8 = vld [vmem:[#allocation70_spill] sm:$0xff]  ;;  %v1874_v17 = vperm.slane %v1866_v56, %v10593_v0 }
 0x53d   : > { %v8885_v23 = vpop.permute.xlu0 %4336  ;;  %v1988_v44 = vsel %vm775_vm8, %v1987_v61, %v10596_v8  ;;  %v1899_v7 = vrot.slane %v1886_v9, 4  ;;  %v10602_v61 = vld [vmem:[#allocation63_spill] sm:$0xff] }
 0x53e   : > { %v4316_v60 = vpop.permute.xlu2 %4315  ;;  %v8925_v10 = vperm.slane %v1988_v44, %v10593_v0  ;;  %v5192_v44 = vmul.f32 %v4302_v51, %v1894_v31  ;;  %v1901_v45 = vrot.slane %v1874_v17, 4 }
 0x540   : > { %v1999_v35 = vrot.slane %v8925_v10, 4 }
 0x543   : > { %4553 = vperm.xlu1 %5943, %v4548_v39   ;;  %4651 = vperm.xlu0 %5942, %v4646_v22   ;;  %v1975_v39 = vrot.slane %v10599_v6, 4 }
 0x544   : > { %4560 = vperm.xlu2 %5944, %v4555_v28   ;;  %v1889_v28 = vrot.slane %v1870_v48, 4  ;;  %v4597_v48 = vperm.slane %v8784_v25, 3 }
 0x545   : > { %v8896_v38 = vpop.permute.xlu0 %4357  ;;  %v8916_v19 = vpop.permute.xlu1 %4267 }
 0x546   : > { %v8898_v63 = vpop.permute.xlu2 %4329  ;;  %10598 = vst [vmem:[#allocation109_spill] sm:$0xff] %v8916_v19  ;;  %v1890_v20 = vsel %vm775_vm8, %v1882_v59, %v1889_v28  ;;  %v1900_v59 = vsel %vm775_vm8, %v1899_v7, %v1874_v17 }
 0x547   : > { %v1898_v28 = vperm.slane %v1890_v20, %v10597_v27  ;;  %v1906_v17 = vperm.slane %v1900_v59, %v10597_v27  ;;  %v1902_v20 = vsel %vm775_vm8, %v1886_v9, %v1901_v45  ;;  %v1933_v9 = vrot.slane %v10602_v61, 4 }
 0x549   : > { %v1913_v47 = vrot.slane %v1898_v28, 4 }
 0x54b   : > { %4574 = vperm.xlu1 %5943, %v4569_v53   ;;  %4672 = vperm.xlu0 %5942, %v4667_v24   ;;  %v1911_v53 = vrot.slane %v1894_v31, 4  ;;  %v10600_v24 = vld [vmem:[#allocation58_spill] sm:$0xff]  ;;  %v1914_v2 = vsel %vm775_vm8, 0.0, %v1913_v47 }
 0x54c   : > { %4581 = vperm.xlu2 %5944, %v4576_v58   ;;  %v1931_v32 = vrot.slane %v10600_v24, 4  ;;  %v10601_v58 = vld [vmem:[#allocation23_spill] sm:$0xff] }
 0x54d   : > { %v8918_v33 = vpop.permute.xlu0 %4378  ;;  %v1976_v5 = vsel %vm775_vm8, %v1975_v39, %v10601_v58  ;;  %v1912_v39 = vsel %vm775_vm8, 0.0, %v1911_v53  ;;  %v5320_v53 = vsel %vm3087_vm9, %v5192_v44, 0.0  ;;  %v1915_v44 = vrot.slane %v1906_v17, 4 }
 0x54e   : > { %v8921_v22 = vpop.permute.xlu2 %4350  ;;  %v1932_v56 = vsel %vm775_vm8, %v1931_v32, %v10602_v61  ;;  %v8940_v52 = vperm.slane %v1976_v5, %v10593_v0  ;;  %v5194_v32 = vmul.f32 %v4316_v60, %v1898_v28  ;;  %v4032_v5 = vsub.f32 %v8641_v42, %v8737_v37 }
 0x54f   : > { %v1938_v7 = vperm.slane %v1932_v56, %v10593_v0  ;;  %v4611_v60 = vperm.slane %v8784_v25, 5  ;;  %v4618_v42 = vperm.slane %v8784_v25, 6  ;;  %v1910_v28 = vperm.slane %v1902_v20, %v10597_v27 }
 0x550   : > { %v2000_v56 = vsel %vm775_vm8, %v1999_v35, %v8940_v52  ;;  %v5323_v45 = vsel %vm3087_vm9, %v5194_v32, 0.0  ;;  %v5196_v25 = vmul.f32 %v8898_v63, %v1906_v17  ;;  %v4730_v17 = vperm.slane %v8843_v18, 6 }
 0x551   : > { %v1943_v35 = vrot.slane %v1938_v7, 4 }
 0x553   : > { %4595 = vperm.xlu1 %5943, %v4590_v1   ;;  %4693 = vperm.xlu0 %5942, %v4688_v50   ;;  %v10603_v50 = vld [vmem:[#allocation49_spill] sm:$0xff] }
 0x554   : > { %4602 = vperm.xlu2 %5944, %v4597_v48   ;;  %v1919_v26 = vrot.slane %v10603_v50, 4 }
 0x555   : > { %v4309_v4 = vpop.permute.xlu1 %4308  ;;  %v8943_v1 = vpop.permute.xlu0 %4399 }
 0x556   : > { %v5193_v51 = vmul.f32 %v4309_v4, %v1912_v39  ;;  %v8946_v31 = vpop.permute.xlu2 %4371  ;;  %v4709_v4 = vperm.slane %v8843_v18, 3  ;;  %v10604_v39 = vld [vmem:[#allocation19_spill] sm:$0xff] }
 0x557   : > { %v1920_v59 = vsel %vm775_vm8, %v1919_v26, %v10604_v39  ;;  %v1921_v20 = vrot.slane %v10604_v39, 4 }
 0x558   : > { %v5321_v48 = vsel %vm3087_vm9, %v5193_v51, 0.0  ;;  %v1926_v32 = vperm.slane %v1920_v59, %v10593_v0 }
 0x559   : > { %v5322_v49 = vadd.f32 %v5321_v48, %v5320_v53  ;;  %v4056_v53 = vmul.f32 1.442695, %v4032_v5  ;;  %v2006_v48 = vperm.slane %v2000_v56, %v10597_v27  ;;  %v1916_v5 = vsel %vm775_vm8, 0.0, %v1915_v44 }
 0x55a   : > { %v5197_v47 = vmul.f32 %v8885_v23, %v1916_v5  ;;  %v1944_v59 = vsel %vm775_vm8, %v1943_v35, %v1926_v32  ;;  %v1945_v39 = vrot.slane %v1926_v32, 4  ;;  %v1922_v23 = vsel %vm775_vm8, %v10603_v50, %v1921_v20 }
 0x55b   : > { %4616 = vperm.xlu1 %5943, %v4611_v60   ;;  %4714 = vperm.xlu0 %5942, %v4709_v4   ;;  %v5324_v51 = vadd.f32 %v5323_v45, %v5322_v49  ;;  %v1934_v49 = vsel %vm775_vm8, %v10600_v24, %v1933_v9  ;;  %v1917_v60 = vrot.slane %v1910_v28, 4  ;;  %5980 = vpow2.f32 %v4056_v53 }
 0x55c   : > { %4623 = vperm.xlu2 %5944, %v4618_v42   ;;  %v2023_v56 = vrot.slane %v2006_v48, 4  ;;  %v5327_v45 = vsel %vm3087_vm9, %v5196_v25, 0.0  ;;  %v1942_v24 = vperm.slane %v1934_v49, %v10593_v0  ;;  %v4639_v42 = vperm.slane %v8841_v13, 1 }
 0x55d   : > { %v4323_v26 = vpop.permute.xlu1 %4322  ;;  %v4421_v21 = vpop.permute.xlu0 %4420  ;;  %v5329_v44 = vsel %vm3087_vm9, %v5197_v47, 0.0  ;;  %v1946_v53 = vsel %vm775_vm8, %v1938_v7, %v1945_v39 }
 0x55e   : > { %v5195_v61 = vmul.f32 %v4323_v26, %v1914_v2  ;;  %v8969_v55 = vpop.permute.xlu2 %4392  ;;  %v4632_v2 = vperm.slane %v8841_v13, 0  ;;  %v2024_v35 = vsel %vm775_vm8, 0.0, %v2023_v56  ;;  %v1918_v26 = vsel %vm775_vm8, 0.0, %v1917_v60 }
 0x55f   : > { %v5209_v32 = vmul.f32 %v4421_v21, %v2024_v35  ;;  %v5199_v20 = vmul.f32 %v8921_v22, %v1918_v26  ;;  %v1955_v5 = vrot.slane %v1942_v24, 4  ;;  %v1954_v7 = vperm.slane %v1946_v53, %v10597_v27 }
 0x560   : > { %v5325_v4 = vsel %vm3087_vm9, %v5195_v61, 0.0  ;;  %v4653_v60 = vperm.slane %v8841_v13, 3 }
 0x561   : > { %v5326_v63 = vadd.f32 %v5325_v4, %v5324_v51  ;;  %v1950_v51 = vperm.slane %v1944_v59, %v10597_v27  ;;  %v8992_v50 = vpop.eup %5980  ;;  %v1930_v59 = vperm.slane %v1922_v23, %v10593_v0 }
 0x563   : > { %v5328_v9 = vadd.f32 %v5327_v45, %v5326_v63  ;;  %4637 = vperm.xlu1 %5943, %v4632_v2   ;;  %4735 = vperm.xlu0 %5942, %v4730_v17   ;;  %v5200_v63 = vmul.f32 %v8896_v38, %v1950_v51  ;;  %v1967_v2 = vrot.slane %v1950_v51, 4  ;;  %v5352_v17 = vsel %vm3087_vm9, %v5209_v32, 0.0 }
 0x564   : > { %4644 = vperm.xlu2 %5944, %v4639_v42   ;;  %v5333_v45 = vsel %vm3087_vm9, %v5199_v20, 0.0  ;;  %v1956_v42 = vsel %vm775_vm8, %v1955_v5, %v1930_v59  ;;  %v4660_v38 = vperm.slane %v8841_v13, 4 }
 0x565   : > { %v4344_v25 = vpop.permute.xlu1 %4343  ;;  %v5330_v61 = vadd.f32 %v5329_v44, %v5328_v9  ;;  %v8990_v49 = vpop.permute.xlu0 %4441  ;;  %v5335_v44 = vsel %vm3087_vm9, %v5200_v63, 0.0  ;;  %v1962_v51 = vperm.slane %v1956_v42, %v10597_v27  ;;  %v1968_v53 = vsel %vm775_vm8, 0.0, %v1967_v2 }
 0x566   : > { %v5198_v47 = vmul.f32 %v4344_v25, %v1910_v28  ;;  %v4414_v4 = vpop.permute.xlu2 %4413  ;;  %v4751_v28 = vperm.slane %v8992_v50, 1  ;;  %v5202_v25 = vmul.f32 %v8946_v31, %v1954_v7  ;;  %v4674_v2 = vperm.slane %v8841_v13, 6 }
 0x567   : > { %v5208_v56 = vmul.f32 %v4414_v4, %v2006_v48  ;;  %v1969_v48 = vrot.slane %v1954_v7, 4  ;;  %v4033_v4 = vsub.f32 %v8633_v30, %v8737_v37 }
 0x568   : > { %v5331_v21 = vsel %vm3087_vm9, %v5198_v47, 0.0  ;;  %v1957_v47 = vrot.slane %v1930_v59, 4  ;;  %v5339_v7 = vsel %vm3087_vm9, %v5202_v25, 0.0  ;;  %v1989_v59 = vrot.slane %v10596_v8, 4 }
 0x569   : > { %v5332_v39 = vadd.f32 %v5331_v21, %v5330_v61  ;;  %v5351_v22 = vsel %vm3087_vm9, %v5208_v56, 0.0  ;;  %v1970_v5 = vsel %vm775_vm8, 0.0, %v1969_v48  ;;  %v1971_v21 = vrot.slane %v1962_v51, 4 }
 0x56a   : > { %v9005_v23 = vadd.f32 %v5352_v17, %v5351_v22  ;;  %v5203_v56 = vmul.f32 %v8918_v33, %v1970_v5  ;;  %v4772_v17 = vperm.slane %v8992_v50, 4  ;;  %v1958_v31 = vsel %vm775_vm8, %v1942_v24, %v1957_v47  ;;  %v10605_v5 = vld [vmem:[#allocation81_spill] sm:$0xff] }
 0x56b   : > { %v5334_v9 = vadd.f32 %v5333_v45, %v5332_v39  ;;  %4658 = vperm.xlu1 %5943, %v4653_v60   ;;  %4756 = vperm.xlu0 %5942, %v4751_v28   ;;  %v4681_v39 = vperm.slane %v8841_v13, 7  ;;  %v4058_v30 = vmul.f32 1.442695, %v4033_v4  ;;  %v1966_v33 = vperm.slane %v1958_v31, %v10597_v27 }
 0x56c   : > { %4665 = vperm.xlu2 %5944, %v4660_v38   ;;  %v5341_v37 = vsel %vm3087_vm9, %v5203_v56, 0.0  ;;  %v1972_v28 = vsel %vm775_vm8, 0.0, %v1971_v21  ;;  %v1977_v38 = vrot.slane %v10601_v58, 4  ;;  %v2001_v8 = vrot.slane %v8940_v52, 4 }
 0x56d   : > { %v4365_v35 = vpop.permute.xlu1 %4364  ;;  %v5336_v26 = vadd.f32 %v5335_v44, %v5334_v9  ;;  %v9011_v32 = vpop.permute.xlu0 %4462  ;;  %v5205_v13 = vmul.f32 %v8969_v55, %v1972_v28  ;;  %v1990_v44 = vsel %vm775_vm8, %v10595_v54, %v1989_v59  ;;  %5982 = vpow2.f32 %v4058_v30  ;;  %v10606_v59 = vld [vmem:[#allocation71_spill] sm:$0xff] }
 0x56e   : > { %v5201_v61 = vmul.f32 %v4365_v35, %v1968_v53  ;;  %v9014_v20 = vpop.permute.xlu2 %4434  ;;  %v1978_v53 = vsel %vm775_vm8, %v10599_v6, %v1977_v38  ;;  %v5206_v35 = vmul.f32 %v8943_v1, %v1966_v33  ;;  %v4695_v58 = vperm.slane %v8843_v18, 1 }
 0x56f   : > { %v4793_v55 = vperm.slane %v8992_v50, 7  ;;  %v1973_v52 = vrot.slane %v1966_v33, 4  ;;  %v2002_v54 = vsel %vm775_vm8, %v8925_v10, %v2001_v8  ;;  %v4702_v6 = vperm.slane %v8843_v18, 2 }
 0x570   : > { %v5337_v63 = vsel %vm3087_vm9, %v5201_v61, 0.0  ;;  %v5345_v61 = vsel %vm3087_vm9, %v5205_v13, 0.0  ;;  %v2043_v47 = vrot.slane %v10605_v5, 4  ;;  %v1986_v4 = vperm.slane %v1978_v53, %v10593_v0 }
 0x571   : > { %v5338_v60 = vadd.f32 %v5337_v63, %v5336_v26  ;;  %v5347_v56 = vsel %vm3087_vm9, %v5206_v35, 0.0  ;;  %v2010_v63 = vperm.slane %v2002_v54, %v10597_v27  ;;  %v1974_v21 = vsel %vm775_vm8, 0.0, %v1973_v52 }
 0x572   : > { %v2013_v30 = vrot.slane %v1986_v4, 4  ;;  %v4034_v28 = vsub.f32 %v8665_v46, %v8739_v62  ;;  %v4716_v13 = vperm.slane %v8843_v18, 4  ;;  %v4723_v53 = vperm.slane %v8843_v18, 5 }
 0x573   : > { %v5340_v22 = vadd.f32 %v5339_v7, %v5338_v60  ;;  %4679 = vperm.xlu1 %5943, %v4674_v2   ;;  %4777 = vperm.xlu0 %5942, %v4772_v17   ;;  %v9057_v10 = vpop.eup %5982 }
 0x574   : > { %4686 = vperm.xlu2 %5944, %v4681_v39   ;;  %v4814_v8 = vperm.slane %v9057_v10, 2  ;;  %v4060_v35 = vmul.f32 1.442695, %v4034_v28 }
 0x575   : > { %v4386_v45 = vpop.permute.xlu1 %4385  ;;  %v5342_v42 = vadd.f32 %v5341_v37, %v5340_v22  ;;  %v9030_v24 = vpop.permute.xlu0 %4483  ;;  %v2044_v22 = vsel %vm775_vm8, %v2043_v47, %v10606_v59  ;;  %v10607_v37 = vld [vmem:[#allocation79_spill] sm:$0xff] }
 0x576   : > { %v5204_v48 = vmul.f32 %v4386_v45, %v1962_v51  ;;  %v9035_v9 = vpop.permute.xlu2 %4455  ;;  %v1998_v51 = vperm.slane %v1990_v44, %v10593_v0  ;;  %v2031_v33 = vrot.slane %v10607_v37, 4  ;;  %v2050_v44 = vperm.slane %v2044_v22, %v10593_v0 }
 0x577   : > { %5984 = vpow2.f32 %v4060_v35  ;;  %v4744_v22 = vperm.slane %v8992_v50, 0 }
 0x578   : > { %v5343_v26 = vsel %vm3087_vm9, %v5204_v48, 0.0  ;;  %v2011_v31 = vrot.slane %v1998_v51, 4  ;;  %v2014_v46 = vsel %vm775_vm8, %v1998_v51, %v2013_v30  ;;  %v2055_v47 = vrot.slane %v2050_v44, 4 }
 0x579   : > { %v5344_v25 = vadd.f32 %v5343_v26, %v5342_v42  ;;  %v2025_v42 = vrot.slane %v2010_v63, 4  ;;  %v2045_v26 = vrot.slane %v10606_v59, 4 }
 0x57a   : > { %v2012_v48 = vsel %vm775_vm8, %v2011_v31, %v1986_v4 }
 0x57b   : > { %v5346_v1 = vadd.f32 %v5345_v61, %v5344_v25  ;;  %4700 = vperm.xlu1 %5943, %v4695_v58   ;;  %4798 = vperm.xlu0 %5942, %v4793_v55   ;;  %v10608_v25 = vld [vmem:[#allocation39_spill] sm:$0xff]  ;;  %v2018_v55 = vperm.slane %v2012_v48, %v10597_v27  ;;  %v2026_v52 = vsel %vm775_vm8, 0.0, %v2025_v42  ;;  %v2046_v51 = vsel %vm775_vm8, %v10605_v5, %v2045_v26 }
 0x57c   : > { %4707 = vperm.xlu2 %5944, %v4702_v6   ;;  %v2032_v58 = vsel %vm775_vm8, %v2031_v33, %v10608_v25  ;;  %v5211_v6 = vmul.f32 %v9014_v20, %v2026_v52  ;;  %v4737_v20 = vperm.slane %v8843_v18, 7  ;;  %v2033_v18 = vrot.slane %v10608_v25, 4 }
 0x57d   : > { %v4407_v60 = vpop.permute.xlu1 %4406  ;;  %v5348_v2 = vadd.f32 %v5347_v56, %v5346_v1  ;;  %v9055_v17 = vpop.permute.xlu0 %4504  ;;  %v2022_v56 = vperm.slane %v2014_v46, %v10597_v27 }
 0x57e   : > { %v5207_v7 = vmul.f32 %v4407_v60, %v1974_v21  ;;  %v9059_v39 = vpop.permute.xlu2 %4476  ;;  %v2038_v21 = vperm.slane %v2032_v58, %v10593_v0  ;;  %v5212_v60 = vmul.f32 %v8990_v49, %v2018_v55  ;;  %v5356_v59 = vsel %vm3087_vm9, %v5211_v6, 0.0  ;;  %v9106_v48 = vpop.eup %5984 }
 0x57f   : > { %v2029_v30 = vrot.slane %v2022_v56, 4  ;;  %v9098_v49 = vperm.slane %v2046_v51, %v10593_v0  ;;  %v5214_v35 = vmul.f32 %v9035_v9, %v2022_v56  ;;  %v2034_v58 = vsel %vm775_vm8, %v10607_v37, %v2033_v18 }
 0x580   : > { %v5349_v45 = vsel %vm3087_vm9, %v5207_v7, 0.0  ;;  %v2027_v7 = vrot.slane %v2018_v55, 4  ;;  %v2056_v5 = vsel %vm775_vm8, %v2055_v47, %v2038_v21  ;;  %v4856_v9 = vperm.slane %v9106_v48, 0 }
 0x581   : > { %v9067_v38 = vadd.f32 %v5349_v45, %v5348_v2  ;;  %v2062_v28 = vperm.slane %v2056_v5, %v10597_v27  ;;  %v2030_v25 = vsel %vm775_vm8, 0.0, %v2029_v30  ;;  %v2067_v55 = vrot.slane %v9098_v49, 4 }
 0x582   : > { %v2028_v45 = vsel %vm775_vm8, 0.0, %v2027_v7  ;;  %v5215_v52 = vmul.f32 %v9011_v32, %v2030_v25  ;;  %v2042_v51 = vperm.slane %v2034_v58, %v10593_v0  ;;  %v5362_v37 = vsel %vm3087_vm9, %v5214_v35, 0.0 }
 0x583   : > { %4721 = vperm.xlu1 %5943, %v4716_v13   ;;  %4819 = vperm.xlu0 %5942, %v4814_v8   ;;  %v2079_v6 = vrot.slane %v2062_v28, 4  ;;  %v4035_v35 = vsub.f32 %v8649_v16, %v8739_v62  ;;  %v4877_v25 = vperm.slane %v9106_v48, 3 }
 0x584   : > { %4728 = vperm.xlu2 %5944, %v4723_v53   ;;  %v2057_v53 = vrot.slane %v2038_v21, 4  ;;  %v4765_v21 = vperm.slane %v8992_v50, 3  ;;  %v5364_v32 = vsel %vm3087_vm9, %v5215_v52, 0.0 }
 0x585   : > { %v4428_v61 = vpop.permute.xlu1 %4427  ;;  %v9080_v54 = vpop.permute.xlu0 %4525  ;;  %v2080_v7 = vsel %vm775_vm8, 0.0, %v2079_v6  ;;  %v4786_v6 = vperm.slane %v8992_v50, 6 }
 0x586   : > { %v5210_v1 = vmul.f32 %v4428_v61, %v2010_v63  ;;  %v9083_v4 = vpop.permute.xlu2 %4497  ;;  %v4835_v63 = vperm.slane %v9057_v10, 5  ;;  %v2058_v56 = vsel %vm775_vm8, %v2050_v44, %v2057_v53 }
 0x588   : > { %v5354_v2 = vsel %vm3087_vm9, %v5210_v1, 0.0  ;;  %v4758_v1 = vperm.slane %v8992_v50, 2 }
 0x589   : > { %v5355_v31 = vadd.f32 %v5354_v2, %v9005_v23  ;;  %v5358_v23 = vsel %vm3087_vm9, %v5212_v60, 0.0  ;;  %v10610_v60 = vld [vmem:[#allocation89_spill] sm:$0xff] }
 0x58a   : > { %v2099_v2 = vrot.slane %v10610_v60, 4 }
 0x58b   : > { %v5357_v33 = vadd.f32 %v5356_v59, %v5355_v31  ;;  %4742 = vperm.xlu1 %5943, %v4737_v20   ;;  %4840 = vperm.xlu0 %5942, %v4835_v63   ;;  %v2068_v20 = vsel %vm775_vm8, %v2067_v55, %v2042_v51  ;;  %v2066_v63 = vperm.slane %v2058_v56, %v10597_v27  ;;  %v2069_v56 = vrot.slane %v2042_v51, 4 }
 0x58c   : > { %4749 = vperm.xlu2 %5944, %v4744_v22   ;;  %v5217_v22 = vmul.f32 %v9059_v39, %v2080_v7 }
 0x58d   : > { %v4449_v42 = vpop.permute.xlu1 %4448  ;;  %v5359_v13 = vadd.f32 %v5358_v23, %v5357_v33  ;;  %v9104_v8 = vpop.permute.xlu0 %4546  ;;  %v10611_v23 = vld [vmem:[#allocation80_spill] sm:$0xff]  ;;  %v2081_v55 = vrot.slane %v2066_v63, 4 }
 0x58e   : > { %v5213_v46 = vmul.f32 %v4449_v42, %v2028_v45  ;;  %v9109_v26 = vpop.permute.xlu2 %4518  ;;  %v2087_v18 = vrot.slane %v10611_v23, 4  ;;  %v10612_v45 = vld [vmem:[#allocation88_spill] sm:$0xff] }
 0x58f   : > { %10609 = vst [vmem:[#allocation35_spill] sm:$0xff] %v9109_v26  ;;  %v2100_v42 = vsel %vm775_vm8, %v2099_v2, %v10612_v45  ;;  %v2101_v53 = vrot.slane %v10612_v45, 4 }
 0x590   : > { %v5360_v61 = vsel %vm3087_vm9, %v5213_v46, 0.0  ;;  %v5218_v46 = vmul.f32 %v9030_v24, %v2066_v63  ;;  %v2106_v52 = vperm.slane %v2100_v42, %v10593_v0  ;;  %v4062_v24 = vmul.f32 1.442695, %v4035_v35 }
 0x591   : > { %v5361_v47 = vadd.f32 %v5360_v61, %v5359_v13  ;;  %v2074_v13 = vperm.slane %v2068_v20, %v10597_v27  ;;  %v5368_v61 = vsel %vm3087_vm9, %v5217_v22, 0.0  ;;  %v4800_v42 = vperm.slane %v9057_v10, 0 }
 0x592   : > { %v2111_v63 = vrot.slane %v2106_v52, 4  ;;  %5986 = vpow2.f32 %v4062_v24 }
 0x593   : > { %v5363_v31 = vadd.f32 %v5362_v37, %v5361_v47  ;;  %4763 = vperm.xlu1 %5943, %v4758_v1   ;;  %4861 = vperm.xlu0 %5942, %v4856_v9   ;;  %v10613_v47 = vld [vmem:[#allocation43_spill] sm:$0xff]  ;;  %v2083_v16 = vrot.slane %v2074_v13, 4  ;;  %v5370_v9 = vsel %vm3087_vm9, %v5218_v46, 0.0  ;;  %v2102_v37 = vsel %vm775_vm8, %v10610_v60, %v2101_v53 }
 0x594   : > { %4770 = vperm.xlu2 %5944, %v4765_v21   ;;  %v2088_v1 = vsel %vm775_vm8, %v2087_v18, %v10613_v47  ;;  %v2082_v21 = vsel %vm775_vm8, 0.0, %v2081_v55  ;;  %v5220_v7 = vmul.f32 %v9083_v4, %v2074_v13  ;;  %v9161_v51 = vperm.slane %v2102_v37, %v10593_v0  ;;  %v10615_v37 = vld [vmem:[#allocation53_spill] sm:$0xff] }
 0x595   : > { %v4470_v59 = vpop.permute.xlu1 %4469  ;;  %v5365_v44 = vadd.f32 %v5364_v32, %v5363_v31  ;;  %v9128_v5 = vpop.permute.xlu0 %4567  ;;  %v2094_v20 = vperm.slane %v2088_v1, %v10593_v0  ;;  %v2084_v22 = vsel %vm775_vm8, 0.0, %v2083_v16  ;;  %v2070_v18 = vsel %vm775_vm8, %v9098_v49, %v2069_v56 }
 0x596   : > { %v5216_v30 = vmul.f32 %v4470_v59, %v2062_v28  ;;  %v9131_v33 = vpop.permute.xlu2 %4539  ;;  %v4779_v28 = vperm.slane %v8992_v50, 5  ;;  %v5221_v60 = vmul.f32 %v9055_v17, %v2084_v22  ;;  %v4898_v4 = vperm.slane %v9106_v48, 6 }
 0x597   : > { %v2112_v13 = vsel %vm775_vm8, %v2111_v63, %v2094_v20  ;;  %v2113_v53 = vrot.slane %v2094_v20, 4  ;;  %v5374_v35 = vsel %vm3087_vm9, %v5220_v7, 0.0  ;;  %v4807_v46 = vperm.slane %v9057_v10, 1 }
 0x598   : > { %v5366_v58 = vsel %vm3087_vm9, %v5216_v30, 0.0  ;;  %v2118_v55 = vperm.slane %v2112_v13, %v10597_v27  ;;  %v2123_v16 = vrot.slane %v9161_v51, 4  ;;  %v4821_v20 = vperm.slane %v9057_v10, 3 }
 0x599   : > { %v5367_v39 = vadd.f32 %v5366_v58, %v5365_v44  ;;  %v2089_v58 = vrot.slane %v10613_v47, 4  ;;  %v2114_v49 = vsel %vm775_vm8, %v2106_v52, %v2113_v53  ;;  %v9183_v47 = vpop.eup %5986  ;;  %v4828_v22 = vperm.slane %v9057_v10, 4 }
 0x59a   : > { %v2122_v24 = vperm.slane %v2114_v49, %v10597_v27  ;;  %v4919_v63 = vperm.slane %v9183_v47, 1  ;;  %v2135_v7 = vrot.slane %v2118_v55, 4  ;;  %v5224_v53 = vmul.f32 %v9080_v54, %v2118_v55 }
 0x59b   : > { %v5369_v62 = vadd.f32 %v5368_v61, %v5367_v39  ;;  %4784 = vperm.xlu1 %5943, %v4779_v28   ;;  %4882 = vperm.xlu0 %5942, %v4877_v25   ;;  %v5376_v39 = vsel %vm3087_vm9, %v5221_v60, 0.0  ;;  %v9176_v28 = vperm.slane %v2070_v18, %v10597_v27  ;;  %v2090_v25 = vsel %vm775_vm8, %v10611_v23, %v2089_v58  ;;  %v10617_v60 = vld [vmem:[#allocation48_spill] sm:$0xff] }
 0x59c   : > { %4791 = vperm.xlu2 %5944, %v4786_v6   ;;  %v2143_v23 = vrot.slane %v10615_v37, 4  ;;  %v2137_v18 = vrot.slane %v2122_v24, 4  ;;  %v5226_v49 = vmul.f32 %v9131_v33, %v2122_v24  ;;  %v5382_v55 = vsel %vm3087_vm9, %v5224_v53, 0.0 }
 0x59d   : > { %v4491_v2 = vpop.permute.xlu1 %4490  ;;  %v5371_v31 = vadd.f32 %v5370_v9, %v5369_v62  ;;  %v9153_v32 = vpop.permute.xlu0 %4588  ;;  %v10614_v9 = vld [vmem:[#allocation41_spill] sm:$0xff]  ;;  %v4940_v33 = vperm.slane %v9183_v47, 4 }
 0x59e   : > { %v5219_v59 = vmul.f32 %v4491_v2, %v2082_v21  ;;  %v9157_v44 = vpop.permute.xlu2 %4560  ;;  %v2155_v56 = vrot.slane %v10614_v9, 4  ;;  %v2098_v21 = vperm.slane %v2090_v25, %v10593_v0  ;;  %v2138_v54 = vsel %vm775_vm8, 0.0, %v2137_v18 }
 0x5a0   : > { %v5372_v30 = vsel %vm3087_vm9, %v5219_v59, 0.0  ;;  %v2124_v59 = vsel %vm775_vm8, %v2123_v16, %v2098_v21  ;;  %v5227_v16 = vmul.f32 %v9104_v8, %v2138_v54  ;;  %v2157_v8 = vrot.slane %v10617_v60, 4  ;;  %v10620_v54 = vld [vmem:[#allocation66_spill] sm:$0xff] }
 0x5a1   : > { %v5373_v45 = vadd.f32 %v5372_v30, %v5371_v31  ;;  %v2156_v30 = vsel %vm775_vm8, %v2155_v56, %v10617_v60 }
 0x5a3   : > { %v5375_v17 = vadd.f32 %v5374_v35, %v5373_v45  ;;  %4805 = vperm.xlu1 %5943, %v4800_v42   ;;  %4903 = vperm.xlu0 %5942, %v4898_v4   ;;  %v10618_v45 = vld [vmem:[#allocation10_spill] sm:$0xff]  ;;  %v10619_v4 = vsub.f32 %v8466_v11, %v8646_v41  ;;  %v2130_v35 = vperm.slane %v2124_v59, %v10597_v27  ;;  %v5387_v59 = vsel %vm3087_vm9, %v5227_v16, 0.0 }
 0x5a4   : > { %4812 = vperm.xlu2 %5944, %v4807_v46   ;;  %v2144_v42 = vsel %vm775_vm8, %v2143_v23, %v10618_v45  ;;  %v2136_v46 = vsel %vm775_vm8, 0.0, %v2135_v7 }
 0x5a5   : > { %v4512_v61 = vpop.permute.xlu1 %4511  ;;  %v5377_v6 = vadd.f32 %v5376_v39, %v5375_v17  ;;  %v9181_v1 = vpop.permute.xlu0 %4609  ;;  %v4064_v13 = vmul.f32 1.442695, %v10619_v4  ;;  %v2162_v39 = vperm.slane %v2156_v30, %v10593_v0  ;;  %v2150_v11 = vperm.slane %v2144_v42, %v10593_v0 }
 0x5a6   : > { %v5222_v62 = vmul.f32 %v4512_v61, %v9176_v28  ;;  %v9187_v52 = vpop.permute.xlu2 %4581  ;;  %v2139_v56 = vrot.slane %v2130_v35, 4 }
 0x5a7   : > { %5988 = vpow2.f32 %v4064_v13  ;;  %v2167_v24 = vrot.slane %v2162_v39, 4 }
 0x5a8   : > { %v5378_v2 = vsel %vm3087_vm9, %v5222_v62, 0.0  ;;  %v2140_v18 = vsel %vm775_vm8, 0.0, %v2139_v56 }
 0x5a9   : > { %v9194_v31 = vadd.f32 %v5378_v2, %v5377_v6  ;;  %v2125_v6 = vrot.slane %v2098_v21, 4  ;;  %v4842_v2 = vperm.slane %v9057_v10, 6  ;;  %v5385_v21 = vsel %vm3087_vm9, %v5226_v49, 0.0 }
 0x5aa   : > { %v5229_v53 = vmul.f32 %v9157_v44, %v2140_v18  ;;  %v2145_v49 = vrot.slane %v10618_v45, 4  ;;  %v4863_v44 = vperm.slane %v9106_v48, 1 }
 0x5ab   : > { %10616 = vst [vmem:[#allocation36_spill] sm:$0xff] %v9194_v31  ;;  %4826 = vperm.xlu1 %5943, %v4821_v20   ;;  %4924 = vperm.xlu0 %5942, %v4919_v63   ;;  %v2126_v20 = vsel %vm775_vm8, %v9161_v51, %v2125_v6  ;;  %v4849_v63 = vperm.slane %v9057_v10, 7  ;;  %v2158_v6 = vsel %vm775_vm8, %v10614_v9, %v2157_v8 }
 0x5ac   : > { %4833 = vperm.xlu2 %5944, %v4828_v22   ;;  %v2168_v22 = vsel %vm775_vm8, %v2167_v24, %v2150_v11  ;;  %v2134_v30 = vperm.slane %v2126_v20, %v10597_v27  ;;  %v2166_v9 = vperm.slane %v2158_v6, %v10593_v0  ;;  %v10621_v20 = vsub.f32 %v8707_v15, %v8741_v29 }
 0x5ad   : > { %v4533_v58 = vpop.permute.xlu1 %4532  ;;  %v9210_v17 = vpop.permute.xlu0 %4630 }
 0x5ae   : > { %v5225_v25 = vmul.f32 %v4533_v58, %v2136_v46  ;;  %v9214_v61 = vpop.permute.xlu2 %4602  ;;  %v9234_v13 = vpop.eup %5988  ;;  %v2169_v46 = vrot.slane %v2150_v11, 4  ;;  %v5230_v16 = vmul.f32 %v9128_v5, %v2134_v30  ;;  %v2141_v11 = vrot.slane %v2134_v30, 4 }
 0x5b0   : > { %v5383_v62 = vsel %vm3087_vm9, %v5225_v25, 0.0  ;;  %v2174_v25 = vperm.slane %v2168_v22, %v10597_v27  ;;  %v2170_v45 = vsel %vm775_vm8, %v2162_v39, %v2169_v46 }
 0x5b1   : > { %v5384_v23 = vadd.f32 %v5383_v62, %v5382_v55  ;;  %v2211_v55 = vrot.slane %v10620_v54, 4  ;;  %v2178_v8 = vperm.slane %v2170_v45, %v10597_v27 }
 0x5b2   : > { %v2191_v5 = vrot.slane %v2174_v25, 4 }
 0x5b3   : > { %v5386_v7 = vadd.f32 %v5385_v21, %v5384_v23  ;;  %4847 = vperm.xlu1 %5943, %v4842_v2   ;;  %4945 = vperm.xlu0 %5942, %v4940_v33   ;;  %v5391_v23 = vsel %vm3087_vm9, %v5229_v53, 0.0  ;;  %v4870_v2 = vperm.slane %v9106_v48, 2  ;;  %v2146_v33 = vsel %vm775_vm8, %v10615_v37, %v2145_v49  ;;  %v10623_v53 = vld [vmem:[#allocation61_spill] sm:$0xff] }
 0x5b4   : > { %4854 = vperm.xlu2 %5944, %v4849_v63   ;;  %v4068_v21 = vmul.f32 1.442695, %v10621_v20  ;;  %v5393_v63 = vsel %vm3087_vm9, %v5230_v16, 0.0  ;;  %v2154_v18 = vperm.slane %v2146_v33, %v10593_v0  ;;  %v2199_v46 = vrot.slane %v10623_v53, 4 }
 0x5b5   : > { %v4554_v42 = vpop.permute.xlu1 %4553  ;;  %v5388_v51 = vadd.f32 %v5387_v59, %v5386_v7  ;;  %v9232_v4 = vpop.permute.xlu0 %4651  ;;  %v10622_v7 = vld [vmem:[#allocation52_spill] sm:$0xff]  ;;  %v2142_v59 = vsel %vm775_vm8, 0.0, %v2141_v11  ;;  %v2179_v49 = vrot.slane %v2166_v9, 4  ;;  %v4891_v11 = vperm.slane %v9106_v48, 5 }
 0x5b6   : > { %v5228_v58 = vmul.f32 %v4554_v42, %v2130_v35  ;;  %v9237_v60 = vpop.permute.xlu2 %4623  ;;  %v4975_v35 = vperm.slane %v9234_v13, 1  ;;  %v2212_v39 = vsel %vm775_vm8, %v2211_v55, %v10622_v7  ;;  %v5232_v42 = vmul.f32 %v9187_v52, %v2174_v25 }
 0x5b7   : > { %5990 = vpow2.f32 %v4068_v21  ;;  %v9272_v55 = vperm.slane %v2212_v39, %v10593_v0  ;;  %v4884_v52 = vperm.slane %v9106_v48, 4  ;;  %v4982_v25 = vperm.slane %v9234_v13, 2 }
 0x5b8   : > { %v5389_v62 = vsel %vm3087_vm9, %v5228_v58, 0.0  ;;  %v2192_v58 = vsel %vm775_vm8, 0.0, %v2191_v5 }
 0x5b9   : > { %v5390_v56 = vadd.f32 %v5389_v62, %v5388_v51  ;;  %v5233_v6 = vmul.f32 %v9153_v32, %v2192_v58  ;;  %v2193_v62 = vrot.slane %v2178_v8, 4  ;;  %v2223_v5 = vrot.slane %v9272_v55, 4 }
 0x5bb   : > { %v5392_v24 = vadd.f32 %v5391_v23, %v5390_v56  ;;  %4868 = vperm.xlu1 %5943, %v4863_v44   ;;  %4980 = vperm.xlu0 %5942, %v4975_v35   ;;  %v2180_v44 = vsel %vm775_vm8, %v2179_v49, %v2154_v18  ;;  %v5397_v35 = vsel %vm3087_vm9, %v5232_v42, 0.0  ;;  %v10624_v23 = vld [vmem:[#allocation26_spill] sm:$0xff]  ;;  %v5399_v33 = vsel %vm3087_vm9, %v5233_v6, 0.0 }
 0x5bc   : > { %4875 = vperm.xlu2 %5944, %v4870_v2   ;;  %v2200_v32 = vsel %vm775_vm8, %v2199_v46, %v10624_v23  ;;  %v2181_v2 = vrot.slane %v2154_v18, 4  ;;  %v2186_v20 = vperm.slane %v2180_v44, %v10597_v27  ;;  %v2194_v21 = vsel %vm775_vm8, 0.0, %v2193_v62 }
 0x5bd   : > { %v4575_v22 = vpop.permute.xlu1 %4574  ;;  %v5394_v37 = vadd.f32 %v5393_v63, %v5392_v24  ;;  %v9262_v30 = vpop.permute.xlu0 %4672  ;;  %v2213_v24 = vrot.slane %v10622_v7, 4  ;;  %v5235_v18 = vmul.f32 %v9214_v61, %v2194_v21  ;;  %v4905_v62 = vperm.slane %v9106_v48, 7  ;;  %v10627_v21 = vld [vmem:[#allocation83_spill] sm:$0xff] }
 0x5be   : > { %v5231_v15 = vmul.f32 %v4575_v22, %v2142_v59  ;;  %v9266_v51 = vpop.permute.xlu2 %4644  ;;  %v9289_v22 = vpop.eup %5990  ;;  %v5236_v46 = vmul.f32 %v9181_v1, %v2186_v20  ;;  %v2182_v58 = vsel %vm775_vm8, %v2166_v9, %v2181_v2  ;;  %v2195_v61 = vrot.slane %v2186_v20, 4  ;;  %v10626_v2 = vld [vmem:[#allocation84_spill] sm:$0xff] }
 0x5bf   : > { %v2214_v7 = vsel %vm775_vm8, %v10620_v54, %v2213_v24  ;;  %v2201_v54 = vrot.slane %v10624_v23, 4 }
 0x5c0   : > { %v5395_v16 = vsel %vm3087_vm9, %v5231_v15, 0.0 }
 0x5c1   : > { %v5396_v56 = vadd.f32 %v5395_v16, %v5394_v37  ;;  %v2206_v37 = vperm.slane %v2200_v32, %v10593_v0  ;;  %v9311_v32 = vperm.slane %v2182_v58, %v10597_v27 }
 0x5c3   : > { %v5398_v45 = vadd.f32 %v5397_v35, %v5396_v56  ;;  %4889 = vperm.xlu1 %5943, %v4884_v52   ;;  %4987 = vperm.xlu0 %5942, %v4982_v25   ;;  %v2224_v49 = vsel %vm775_vm8, %v2223_v5, %v2206_v37  ;;  %v5101_v56 = vperm.slane %v9289_v22, 3  ;;  %v4912_v52 = vperm.slane %v9183_v47, 0  ;;  %v10625_v25 = vld [vmem:[#allocation74_spill] sm:$0xff] }
 0x5c4   : > { %4896 = vperm.xlu2 %5944, %v4891_v11   ;;  %v2323_v1 = vrot.slane %v10625_v25, 4  ;;  %v2230_v9 = vperm.slane %v2224_v49, %v10597_v27  ;;  %v2222_v35 = vperm.slane %v2214_v7, %v10593_v0  ;;  %v5405_v11 = vsel %vm3087_vm9, %v5236_v46, 0.0  ;;  %v10628_v7 = vld [vmem:[#allocation73_spill] sm:$0xff] }
 0x5c5   : > { %v4596_v63 = vpop.permute.xlu1 %4595  ;;  %v5400_v39 = vadd.f32 %v5399_v33, %v5398_v45  ;;  %v9287_v59 = vpop.permute.xlu0 %4693  ;;  %v2202_v45 = vsel %vm775_vm8, %v10623_v53, %v2201_v54  ;;  %v2196_v33 = vsel %vm775_vm8, 0.0, %v2195_v61  ;;  %v2267_v46 = vrot.slane %v10628_v7, 4 }
 0x5c6   : > { %v5234_v42 = vmul.f32 %v4596_v63, %v2178_v8  ;;  %v9293_v15 = vpop.permute.xlu2 %4665  ;;  %v5403_v8 = vsel %vm3087_vm9, %v5235_v18, 0.0  ;;  %v2324_v23 = vsel %vm775_vm8, %v2323_v1, %v10626_v2  ;;  %v2311_v63 = vrot.slane %v10627_v21, 4 }
 0x5c7   : > { %v2225_v53 = vrot.slane %v2206_v37, 4  ;;  %v2247_v58 = vrot.slane %v2230_v9, 4  ;;  %v2210_v49 = vperm.slane %v2202_v45, %v10593_v0  ;;  %v4933_v1 = vperm.slane %v9183_v47, 3 }
 0x5c8   : > { %v5401_v6 = vsel %vm3087_vm9, %v5234_v42, 0.0 }
 0x5c9   : > { %v5402_v16 = vadd.f32 %v5401_v6, %v5400_v39  ;;  %v5238_v39 = vmul.f32 %v9237_v60, %v9311_v32  ;;  %v2235_v6 = vrot.slane %v2222_v35, 4  ;;  %v4926_v60 = vperm.slane %v9183_v47, 2 }
 0x5ca   : > { %v2248_v45 = vsel %vm775_vm8, 0.0, %v2247_v58 }
 0x5cb   : > { %v5404_v44 = vadd.f32 %v5403_v8, %v5402_v16  ;;  %4910 = vperm.xlu1 %5943, %v4905_v62   ;;  %5106 = vperm.xlu0 %5942, %v5101_v56   ;;  %v9328_v16 = vperm.slane %v2324_v23, %v10593_v0  ;;  %v2226_v56 = vsel %vm775_vm8, %v9272_v55, %v2225_v53  ;;  %v5003_v8 = vperm.slane %v9234_v13, 5 }
 0x5cc   : > { %4917 = vperm.xlu2 %5944, %v4912_v52   ;;  %v10629_v52 = vld [vmem:[#allocation32_spill] sm:$0xff]  ;;  %v5409_v54 = vsel %vm3087_vm9, %v5238_v39, 0.0  ;;  %v10632_v55 = vsub.f32 %v8485_v34, %v8646_v41  ;;  %v2237_v39 = vrot.slane %v2210_v49, 4 }
 0x5cd   : > { %v4617_v5 = vpop.permute.xlu1 %4616  ;;  %v5406_v24 = vadd.f32 %v5405_v11, %v5404_v44  ;;  %v9318_v20 = vpop.permute.xlu0 %4714  ;;  %v2312_v37 = vsel %vm775_vm8, %v2311_v63, %v10629_v52  ;;  %v10630_v44 = vld [vmem:[#allocation75_spill] sm:$0xff]  ;;  %v5241_v63 = vmul.f32 %v9266_v51, %v2248_v45  ;;  %v10634_v45 = vld [vmem:[#allocation30_spill] sm:$0xff] }
 0x5ce   : > { %v5237_v18 = vmul.f32 %v4617_v5, %v2196_v33  ;;  %v9323_v42 = vpop.permute.xlu2 %4686  ;;  %v2268_v11 = vsel %vm775_vm8, %v2267_v46, %v10630_v44  ;;  %v4066_v33 = vmul.f32 1.442695, %v10632_v55  ;;  %v2234_v5 = vperm.slane %v2226_v56, %v10597_v27 }
 0x5cf   : > { %v9352_v46 = vperm.slane %v2312_v37, %v10593_v0 }
 0x5d0   : > { %v5407_v62 = vsel %vm3087_vm9, %v5237_v18, 0.0  ;;  %v2335_v18 = vrot.slane %v9328_v16, 4  ;;  %v5242_v34 = vmul.f32 %v9232_v4, %v2234_v5  ;;  %5992 = vpow2.f32 %v4066_v33 }
 0x5d1   : > { %v5408_v61 = vadd.f32 %v5407_v62, %v5406_v24  ;;  %v2236_v24 = vsel %vm775_vm8, %v2235_v6, %v2210_v49  ;;  %v10633_v62 = vld [vmem:[#allocation62_spill] sm:$0xff]  ;;  %v2274_v6 = vperm.slane %v2268_v11, %v10593_v0  ;;  %v2238_v49 = vsel %vm775_vm8, %v2222_v35, %v2237_v39 }
 0x5d2   : > { %v2242_v51 = vperm.slane %v2236_v24, %v10597_v27  ;;  %v2249_v37 = vrot.slane %v2234_v5, 4  ;;  %v5122_v4 = vperm.slane %v9289_v22, 6  ;;  %v5416_v55 = vsel %vm3087_vm9, %v5242_v34, 0.0 }
 0x5d3   : > { %v9342_v23 = vadd.f32 %v5409_v54, %v5408_v61  ;;  %4931 = vperm.xlu1 %5943, %v4926_v60   ;;  %5008 = vperm.xlu0 %5942, %v5003_v8   ;;  %v2255_v61 = vrot.slane %v10633_v62, 4  ;;  %v5414_v60 = vsel %vm3087_vm9, %v5241_v63, 0.0  ;;  %v4968_v35 = vperm.slane %v9234_v13, 0 }
 0x5d4   : > { %4938 = vperm.xlu2 %5944, %v4933_v1   ;;  %v4947_v1 = vperm.slane %v9183_v47, 5  ;;  %v2269_v33 = vrot.slane %v10630_v44, 4  ;;  %v2251_v24 = vrot.slane %v2242_v51, 4  ;;  %v2246_v5 = vperm.slane %v2238_v49, %v10597_v27 }
 0x5d5   : > { %10631 = vst [vmem:[#allocation106_spill] sm:$0xff] %v9342_v23  ;;  %v4638_v53 = vpop.permute.xlu1 %4637  ;;  %v9354_v58 = vpop.permute.xlu0 %4735  ;;  %v2256_v11 = vsel %vm775_vm8, %v2255_v61, %v10634_v45  ;;  %v10635_v39 = vsub.f32 %v8714_v3, %v8741_v29  ;;  %v2279_v61 = vrot.slane %v2274_v6, 4  ;;  %v2250_v34 = vsel %vm775_vm8, 0.0, %v2249_v37 }
 0x5d6   : > { %v5240_v41 = vmul.f32 %v4638_v53, %v2230_v9  ;;  %v9358_v56 = vpop.permute.xlu2 %4707  ;;  %v2336_v9 = vsel %vm775_vm8, %v2335_v18, %v9352_v46  ;;  %v2262_v44 = vperm.slane %v2256_v11, %v10593_v0  ;;  %v5244_v49 = vmul.f32 %v9293_v15, %v2242_v51 }
 0x5d7   : > { %v4070_v53 = vmul.f32 1.442695, %v10635_v39  ;;  %v2342_v18 = vperm.slane %v2336_v9, %v10597_v27  ;;  %v2257_v3 = vrot.slane %v10634_v45, 4  ;;  %v2270_v29 = vsel %vm775_vm8, %v10628_v7, %v2269_v33 }
 0x5d8   : > { %v5413_v8 = vsel %vm3087_vm9, %v5240_v41, 0.0  ;;  %v2253_v9 = vrot.slane %v2246_v5, 4  ;;  %v2280_v11 = vsel %vm775_vm8, %v2279_v61, %v2262_v44  ;;  %v5080_v51 = vperm.slane %v9289_v22, 0 }
 0x5d9   : > { %v5415_v54 = vadd.f32 %v5414_v60, %v5413_v8  ;;  %v9380_v8 = vpop.eup %5992  ;;  %5994 = vpow2.f32 %v4070_v53  ;;  %v2281_v45 = vrot.slane %v2262_v44, 4  ;;  %v2278_v7 = vperm.slane %v2270_v29, %v10593_v0 }
 0x5da   : > { %v5024_v39 = vperm.slane %v9380_v8, 0  ;;  %v5087_v33 = vperm.slane %v9289_v22, 1  ;;  %v2254_v44 = vsel %vm775_vm8, 0.0, %v2253_v9  ;;  %v5094_v9 = vperm.slane %v9289_v22, 2 }
 0x5db   : > { %4952 = vperm.xlu1 %5943, %v4947_v1   ;;  %5127 = vperm.xlu0 %5942, %v5122_v4   ;;  %v5417_v63 = vadd.f32 %v5416_v55, %v5415_v54  ;;  %v2252_v4 = vsel %vm775_vm8, 0.0, %v2251_v24  ;;  %v2282_v61 = vsel %vm775_vm8, %v2274_v6, %v2281_v45  ;;  %5996 = vrcp.f32 %v8879_v12 }
 0x5dc   : > { %4973 = vperm.xlu2 %5944, %v4968_v35   ;;  %v5245_v37 = vmul.f32 %v9262_v30, %v2252_v4  ;;  %v2359_v35 = vrot.slane %v2342_v18, 4  ;;  %v2258_v30 = vsel %vm775_vm8, %v10633_v62, %v2257_v3  ;;  %v5247_v3 = vmul.f32 %v9323_v42, %v2254_v44 }
 0x5dd   : > { %v4659_v41 = vpop.permute.xlu1 %4658  ;;  %v4757_v60 = vpop.permute.xlu0 %4756  ;;  %v2290_v6 = vperm.slane %v2282_v61, %v10597_v27  ;;  %5998 = vrcp.f32 %v8856_v40  ;;  %v5052_v26 = vperm.slane %v9380_v8, 4 }
 0x5de   : > { %v5243_v1 = vmul.f32 %v4659_v41, %v2250_v34  ;;  %v9384_v54 = vpop.permute.xlu2 %4728  ;;  %v5420_v34 = vsel %vm3087_vm9, %v5244_v49, 0.0  ;;  %v5422_v53 = vsel %vm3087_vm9, %v5245_v37, 0.0  ;;  %v2360_v41 = vsel %vm775_vm8, 0.0, %v2359_v35 }
 0x5df   : > { %v5257_v49 = vmul.f32 %v4757_v60, %v2360_v41  ;;  %v9407_v62 = vpop.eup %5994  ;;  %6000 = vrcp.f32 %v8821_v57 }
 0x5e0   : > { %v5418_v55 = vsel %vm3087_vm9, %v5243_v1, 0.0  ;;  %v5150_v40 = vperm.slane %v9407_v62, 2 }
 0x5e1   : > { %v5419_v15 = vadd.f32 %v5418_v55, %v5417_v63  ;;  %v2286_v63 = vperm.slane %v2280_v11, %v10597_v27  ;;  %v2291_v55 = vrot.slane %v2278_v7, 4  ;;  %v2266_v11 = vperm.slane %v2258_v30, %v10593_v0 }
 0x5e2   : > { %v5445_v45 = vsel %vm3087_vm9, %v5257_v49, 0.0 }
 0x5e3   : > { %v5421_v24 = vadd.f32 %v5420_v34, %v5419_v15  ;;  %5085 = vperm.xlu1 %5943, %v5080_v51   ;;  %5029 = vperm.xlu0 %5942, %v5024_v39   ;;  %v5248_v51 = vmul.f32 %v9287_v59, %v2286_v63  ;;  %v2303_v39 = vrot.slane %v2286_v63, 4  ;;  %v2292_v30 = vsel %vm775_vm8, %v2291_v55, %v2266_v11 }
 0x5e4   : > { %5092 = vperm.xlu2 %5944, %v5087_v33   ;;  %v5426_v33 = vsel %vm3087_vm9, %v5247_v3, 0.0  ;;  %v4989_v59 = vperm.slane %v9234_v13, 3  ;;  %v2298_v61 = vperm.slane %v2292_v30, %v10597_v27 }
 0x5e5   : > { %v4680_v1 = vpop.permute.xlu1 %4679  ;;  %v5423_v29 = vadd.f32 %v5422_v53, %v5421_v24  ;;  %v9405_v4 = vpop.permute.xlu0 %4777  ;;  %v5428_v63 = vsel %vm3087_vm9, %v5248_v51, 0.0  ;;  %v2304_v41 = vsel %vm775_vm8, 0.0, %v2303_v39  ;;  %v4996_v39 = vperm.slane %v9234_v13, 4 }
 0x5e6   : > { %v5246_v37 = vmul.f32 %v4680_v1, %v2246_v5  ;;  %v4750_v15 = vpop.permute.xlu2 %4749  ;;  %v5143_v5 = vperm.slane %v9407_v62, 1 }
 0x5e7   : > { %v5256_v35 = vmul.f32 %v4750_v15, %v2342_v18  ;;  %v2305_v18 = vrot.slane %v2290_v6, 4  ;;  %v2293_v15 = vrot.slane %v2266_v11, 4 }
 0x5e8   : > { %v5424_v60 = vsel %vm3087_vm9, %v5246_v37, 0.0 }
 0x5e9   : > { %v5425_v34 = vadd.f32 %v5424_v60, %v5423_v29  ;;  %v5444_v42 = vsel %vm3087_vm9, %v5256_v35, 0.0  ;;  %v5250_v29 = vmul.f32 %v9358_v56, %v2290_v6  ;;  %v2306_v37 = vsel %vm775_vm8, 0.0, %v2305_v18 }
 0x5ea   : > { %v9420_v24 = vadd.f32 %v5445_v45, %v5444_v42  ;;  %v5251_v35 = vmul.f32 %v9318_v20, %v2306_v37  ;;  %v2307_v60 = vrot.slane %v2298_v61, 4  ;;  %v5045_v45 = vperm.slane %v9380_v8, 3 }
 0x5eb   : > { %v5427_v53 = vadd.f32 %v5426_v33, %v5425_v34  ;;  %5099 = vperm.xlu1 %5943, %v5094_v9   ;;  %5148 = vperm.xlu0 %5942, %v5143_v5   ;;  %v2294_v34 = vsel %vm775_vm8, %v2278_v7, %v2293_v15  ;;  %v5432_v56 = vsel %vm3087_vm9, %v5250_v29, 0.0  ;;  %v5108_v6 = vperm.slane %v9289_v22, 4 }
 0x5ec   : > { %4994 = vperm.xlu2 %5944, %v4989_v59   ;;  %v2325_v42 = vrot.slane %v10626_v2, 4  ;;  %v5434_v20 = vsel %vm3087_vm9, %v5251_v35, 0.0  ;;  %v2302_v11 = vperm.slane %v2294_v34, %v10597_v27  ;;  %v2308_v33 = vsel %vm775_vm8, 0.0, %v2307_v60 }
 0x5ed   : > { %v4701_v44 = vpop.permute.xlu1 %4700  ;;  %v5429_v49 = vadd.f32 %v5428_v63, %v5427_v53  ;;  %v9426_v1 = vpop.permute.xlu0 %4798  ;;  %v2313_v7 = vrot.slane %v10629_v52, 4  ;;  %v5253_v53 = vmul.f32 %v9384_v54, %v2308_v33  ;;  %v2337_v2 = vrot.slane %v9352_v46, 4 }
 0x5ee   : > { %v5249_v3 = vmul.f32 %v4701_v44, %v2304_v41  ;;  %v9429_v55 = vpop.permute.xlu2 %4770  ;;  %v10636_v44 = vld [vmem:[#allocation18_spill] sm:$0xff]  ;;  %v2326_v29 = vsel %vm775_vm8, %v10625_v25, %v2325_v42  ;;  %v5254_v35 = vmul.f32 %v9354_v58, %v2302_v11  ;;  %v5115_v46 = vperm.slane %v9289_v22, 5  ;;  %v10638_v58 = vld [vmem:[#allocation51_spill] sm:$0xff]  ;;  %v10639_v42 = vld [vmem:[#allocation44_spill] sm:$0xff] }
 0x5ef   : > { %v2314_v15 = vsel %vm775_vm8, %v10627_v21, %v2313_v7  ;;  %v2334_v60 = vperm.slane %v2326_v29, %v10593_v0  ;;  %v2338_v25 = vsel %vm775_vm8, %v9328_v16, %v2337_v2  ;;  %v10640_v2 = vld [vmem:[#allocation24_spill] sm:$0xff] }
 0x5f0   : > { %v5430_v51 = vsel %vm3087_vm9, %v5249_v3, 0.0  ;;  %v10637_v3 = vld [vmem:[#allocation57_spill] sm:$0xff]  ;;  %v2346_v16 = vperm.slane %v2338_v25, %v10597_v27  ;;  %v5129_v25 = vperm.slane %v9289_v22, 7 }
 0x5f1   : > { %v5431_v9 = vadd.f32 %v5430_v51, %v5429_v49  ;;  %v2369_v49 = vrot.slane %v10636_v44, 4  ;;  %v2379_v37 = vrot.slane %v10637_v3, 4  ;;  %v2309_v51 = vrot.slane %v2302_v11, 4 }
 0x5f3   : > { %v5433_v5 = vadd.f32 %v5432_v56, %v5431_v9  ;;  %5001 = vperm.xlu1 %5943, %v4996_v39   ;;  %5050 = vperm.xlu0 %5942, %v5045_v45   ;;  %v5438_v9 = vsel %vm3087_vm9, %v5253_v53, 0.0  ;;  %v5010_v39 = vperm.slane %v9234_v13, 6  ;;  %v2367_v45 = vrot.slane %v10638_v58, 4 }
 0x5f4   : > { %5113 = vperm.xlu2 %5944, %v5108_v6   ;;  %v2370_v34 = vsel %vm775_vm8, %v10638_v58, %v2369_v49  ;;  %v2322_v56 = vperm.slane %v2314_v15, %v10593_v0  ;;  %v5440_v6 = vsel %vm3087_vm9, %v5254_v35, 0.0  ;;  %v2381_v49 = vrot.slane %v10639_v42, 4 }
 0x5f5   : > { %v4722_v30 = vpop.permute.xlu1 %4721  ;;  %v5435_v59 = vadd.f32 %v5434_v20, %v5433_v5  ;;  %v9443_v18 = vpop.permute.xlu0 %4819  ;;  %v2380_v5 = vsel %vm775_vm8, %v2379_v37, %v10639_v42  ;;  %v2310_v20 = vsel %vm775_vm8, 0.0, %v2309_v51  ;;  %v9481_v29 = vperm.slane %v2370_v34, %v10593_v0  ;;  %v10642_v42 = vld [vmem:[#allocation64_spill] sm:$0xff] }
 0x5f6   : > { %v5252_v63 = vmul.f32 %v4722_v30, %v2298_v61  ;;  %v9448_v41 = vpop.permute.xlu2 %4791  ;;  %v5164_v61 = vperm.slane %v9407_v62, 4  ;;  %v2368_v37 = vsel %vm775_vm8, %v2367_v45, %v10636_v44  ;;  %v2349_v15 = vrot.slane %v2322_v56, 4 }
 0x5f7   : > { %v9486_v35 = vperm.slane %v2380_v5, %v10593_v0  ;;  %v5066_v51 = vperm.slane %v9380_v8, 6  ;;  %v2382_v44 = vsel %vm775_vm8, %v10637_v3, %v2381_v49  ;;  %v2374_v45 = vperm.slane %v2368_v37, %v10593_v0 }
 0x5f8   : > { %v5436_v52 = vsel %vm3087_vm9, %v5252_v63, 0.0  ;;  %v2425_v63 = vrot.slane %v10640_v2, 4  ;;  %v2350_v34 = vsel %vm775_vm8, %v2334_v60, %v2349_v15  ;;  %v2435_v5 = vrot.slane %v10642_v42, 4  ;;  %v10643_v15 = vld [vmem:[#allocation69_spill] sm:$0xff] }
 0x5f9   : > { %v5437_v54 = vadd.f32 %v5436_v52, %v5435_v59  ;;  %v2347_v59 = vrot.slane %v2334_v60, 4 }
 0x5fb   : > { %v5439_v21 = vadd.f32 %v5438_v9, %v5437_v54  ;;  %5120 = vperm.xlu1 %5943, %v5115_v46   ;;  %5169 = vperm.xlu0 %5942, %v5164_v61   ;;  %v2361_v54 = vrot.slane %v2346_v16, 4  ;;  %v5017_v61 = vperm.slane %v9234_v13, 7  ;;  %v2348_v9 = vsel %vm775_vm8, %v2347_v59, %v2322_v56 }
 0x5fc   : > { %5015 = vperm.xlu2 %5944, %v5010_v39   ;;  %v10641_v39 = vld [vmem:[#allocation56_spill] sm:$0xff]  ;;  %v2354_v3 = vperm.slane %v2348_v9, %v10597_v27  ;;  %v9510_v59 = vperm.slane %v2382_v44, %v10593_v0 }
 0x5fd   : > { %v4743_v11 = vpop.permute.xlu1 %4742  ;;  %v5441_v33 = vadd.f32 %v5440_v6, %v5439_v21  ;;  %v9474_v30 = vpop.permute.xlu0 %4840  ;;  %v2423_v21 = vrot.slane %v10641_v39, 4  ;;  %v2426_v58 = vsel %vm775_vm8, %v10641_v39, %v2425_v63  ;;  %v2391_v6 = vrot.slane %v9486_v35, 4 }
 0x5fe   : > { %v5255_v7 = vmul.f32 %v4743_v11, %v2310_v20  ;;  %v9476_v53 = vpop.permute.xlu2 %4812  ;;  %v2362_v20 = vsel %vm775_vm8, 0.0, %v2361_v54  ;;  %v2437_v54 = vrot.slane %v10643_v15, 4  ;;  %v2363_v44 = vrot.slane %v2354_v3, 4 }
 0x5ff   : > { %v5259_v60 = vmul.f32 %v9429_v55, %v2362_v20  ;;  %v9520_v37 = vsel %vm775_vm8, %v2423_v21, %v10640_v2  ;;  %v2392_v55 = vsel %vm775_vm8, %v2391_v6, %v2374_v45  ;;  %v5136_v2 = vperm.slane %v9407_v62, 0 }
 0x600   : > { %v5442_v52 = vsel %vm3087_vm9, %v5255_v7, 0.0  ;;  %v9513_v7 = vperm.slane %v2426_v58, %v10593_v0  ;;  %v2403_v58 = vrot.slane %v9510_v59, 4 }
 0x601   : > { %v9489_v46 = vadd.f32 %v5442_v52, %v5441_v33  ;;  %v2436_v52 = vsel %vm775_vm8, %v2435_v5, %v10643_v15  ;;  %v5449_v12 = vsel %vm3087_vm9, %v5259_v60, 0.0  ;;  %v4222_v60 = vsel %vm3911_vm10, %v9234_v13, 0.0 }
 0x602   : > { %v9535_v21 = vperm.slane %v2436_v52, %v10593_v0  ;;  %v4223_v15 = vsel %vm3911_vm10, %v9380_v8, 0.0  ;;  %v2364_v52 = vsel %vm775_vm8, 0.0, %v2363_v44 }
 0x603   : > { %5022 = vperm.xlu1 %5943, %v5017_v61   ;;  %5071 = vperm.xlu0 %5942, %v5066_v51   ;;  %v2358_v61 = vperm.slane %v2350_v34, %v10597_v27  ;;  %v5260_v51 = vmul.f32 %v9405_v4, %v2354_v3  ;;  %v5031_v4 = vperm.slane %v9380_v8, 1  ;;  %v10644_v34 = vld [vmem:[#allocation65_spill] sm:$0xff]  ;;  %v9543_v3 = vsel %vm775_vm8, %v10642_v42, %v2437_v54  ;;  %v5997_v42 = vpop.eup %5996 }
 0x604   : > { %5134 = vperm.xlu2 %5944, %v5129_v25   ;;  %v4954_v25 = vperm.slane %v9183_v47, 6  ;;  %v2491_v6 = vrot.slane %v10644_v34, 4  ;;  %v10651_v54 = vld [vmem:[#allocation45_spill] sm:$0xff] }
 0x605   : > { %v4764_v11 = vpop.permute.xlu1 %4763  ;;  %v9507_v33 = vpop.permute.xlu0 %4861  ;;  %v2365_v5 = vrot.slane %v2358_v61, 4  ;;  %v5451_v20 = vsel %vm3087_vm9, %v5260_v51, 0.0  ;;  %v10645_v51 = vld [vmem:[#allocation76_spill] sm:$0xff] }
 0x606   : > { %v5258_v63 = vmul.f32 %v4764_v11, %v2346_v16  ;;  %v9516_v49 = vpop.permute.xlu2 %4833  ;;  %v2393_v11 = vrot.slane %v2374_v45, 4  ;;  %v2492_v45 = vsel %vm775_vm8, %v2491_v6, %v10645_v51  ;;  %v2493_v13 = vrot.slane %v10645_v51, 4 }
 0x607   : > { %v2366_v44 = vsel %vm775_vm8, 0.0, %v2365_v5  ;;  %v9570_v51 = vperm.slane %v2492_v45, %v10593_v0 }
 0x608   : > { %v5447_v16 = vsel %vm3087_vm9, %v5258_v63, 0.0  ;;  %v2398_v63 = vperm.slane %v2392_v55, %v10597_v27  ;;  %v5262_v55 = vmul.f32 %v9448_v41, %v2358_v61  ;;  %v5263_v56 = vmul.f32 %v9426_v1, %v2366_v44 }
 0x609   : > { %v5448_v9 = vadd.f32 %v5447_v16, %v9420_v24  ;;  %v5621_v41 = vperm.slane %v5997_v42, 0  ;;  %v9578_v1 = vsel %vm775_vm8, %v10644_v34, %v2493_v13  ;;  %v10649_v42 = vld [vmem:[#allocation86_spill] sm:$0xff]  ;;  %v2430_v13 = vperm.slane %v9520_v37, %v10593_v0 }
 0x60a   : > { %v2415_v61 = vrot.slane %v2398_v63, 4  ;;  %v5455_v5 = vsel %vm3087_vm9, %v5262_v55, 0.0  ;;  %v2535_v45 = vrot.slane %v10649_v42, 4  ;;  %v4231_v37 = vsel %vm3911_vm10, %v9289_v22, 0.0 }
 0x60b   : > { %v5450_v24 = vadd.f32 %v5449_v12, %v5448_v9  ;;  %5141 = vperm.xlu1 %5943, %v5136_v2   ;;  %4959 = vperm.xlu0 %5942, %v4954_v25  }
 0x60c   : > { %5036 = vperm.xlu2 %5944, %v5031_v4   ;;  %v10647_v4 = vld [vmem:[#allocation85_spill] sm:$0xff]  ;;  %v2416_v34 = vsel %vm775_vm8, 0.0, %v2415_v61  ;;  %v4180_v61 = vrot.slane %v8780_v36, 4 }
 0x60d   : > { %v4785_v16 = vpop.permute.xlu1 %4784  ;;  %v5452_v9 = vadd.f32 %v5451_v20, %v5450_v24  ;;  %v9552_v2 = vpop.permute.xlu0 %4882  ;;  %v2547_v39 = vrot.slane %v10647_v4, 4  ;;  %v2394_v24 = vsel %vm775_vm8, %v9486_v35, %v2393_v11  ;;  %v4224_v20 = vadd.f32 %v4223_v15, %v4222_v60  ;;  %v10648_v11 = vld [vmem:[#allocation78_spill] sm:$0xff] }
 0x60e   : > { %v5261_v25 = vmul.f32 %v4785_v16, %v2364_v52  ;;  %v9558_v12 = vpop.permute.xlu2 %4854  ;;  %v5038_v16 = vperm.slane %v9380_v8, 2  ;;  %v2404_v35 = vsel %vm775_vm8, %v2403_v58, %v9481_v29  ;;  %v2402_v15 = vperm.slane %v2394_v24, %v10597_v27 }
 0x60f   : > { %10646 = vst [vmem:[#allocation97_spill] sm:$0xff] %v9558_v12  ;;  %v4225_v44 = vrot.slane %v4224_v20, 4  ;;  %v5457_v58 = vsel %vm3087_vm9, %v5263_v56, 0.0  ;;  %v5265_v56 = vmul.f32 %v9476_v53, %v2416_v34  ;;  %v2536_v12 = vsel %vm775_vm8, %v2535_v45, %v10651_v54 }
 0x610   : > { %v5453_v6 = vsel %vm3087_vm9, %v5261_v25, 0.0  ;;  %v10650_v25 = vld [vmem:[#allocation77_spill] sm:$0xff]  ;;  %v5266_v60 = vmul.f32 %v9443_v18, %v2402_v15  ;;  %v4181_v18 = vadd.f32 %v4180_v61, %v8780_v36 }
 0x611   : > { %v5454_v52 = vadd.f32 %v5453_v6, %v5452_v9  ;;  %v2548_v55 = vsel %vm775_vm8, %v2547_v39, %v10650_v25  ;;  %v2410_v6 = vperm.slane %v2404_v35, %v10597_v27  ;;  %v4205_v39 = vsel %vm3911_vm10, %v9057_v10, 0.0 }
 0x612   : > { %v5461_v31 = vsel %vm3087_vm9, %v5265_v56, 0.0  ;;  %v9613_v57 = vperm.slane %v2548_v55, %v10593_v0  ;;  %v2449_v56 = vrot.slane %v2430_v13, 4 }
 0x613   : > { %v5456_v9 = vadd.f32 %v5455_v5, %v5454_v52  ;;  %5043 = vperm.xlu1 %5943, %v5038_v16   ;;  %5626 = vperm.xlu0 %5942, %v5621_v41   ;;  %v5999_v41 = vpop.eup %5998  ;;  %v4204_v5 = vsel %vm3911_vm10, %v8992_v50, 0.0  ;;  %v4226_v50 = vadd.f32 %v4225_v44, %v4224_v20  ;;  %v2419_v20 = vrot.slane %v2410_v6, 4 }
 0x614   : > { %5155 = vperm.xlu2 %5944, %v5150_v40   ;;  %v5614_v53 = vperm.slane %v5999_v41, 0  ;;  %v10652_v41 = vrot.slane %v9535_v21, 4 }
 0x615   : > { %v4806_v24 = vpop.permute.xlu1 %4805  ;;  %v5458_v52 = vadd.f32 %v5457_v58, %v5456_v9  ;;  %v9590_v16 = vpop.permute.xlu0 %4903  ;;  %v4232_v9 = vsel %vm3911_vm10, %v9407_v62, 0.0  ;;  %v2417_v58 = vrot.slane %v2402_v15, 4  ;;  %v4227_v44 = vrot.slane %v4226_v50, 2 }
 0x616   : > { %v5264_v40 = vmul.f32 %v4806_v24, %v2398_v63  ;;  %v9597_v35 = vpop.permute.xlu2 %4875  ;;  %v4206_v63 = vadd.f32 %v4205_v39, %v4204_v5  ;;  %v5157_v24 = vperm.slane %v9407_v62, 3  ;;  %v4233_v22 = vadd.f32 %v4232_v9, %v4231_v37  ;;  %v6001_v37 = vpop.eup %6000 }
 0x617   : > { %v2448_v45 = vsel %vm775_vm8, %v10652_v41, %v2430_v13  ;;  %v10653_v5 = vrot.slane %v9481_v29, 4  ;;  %v2418_v36 = vsel %vm775_vm8, 0.0, %v2417_v58  ;;  %v5268_v9 = vmul.f32 %v9516_v49, %v2410_v6 }
 0x618   : > { %v5459_v10 = vsel %vm3087_vm9, %v5264_v40, 0.0  ;;  %v4207_v55 = vrot.slane %v4206_v63, 4  ;;  %v4182_v13 = vrot.slane %v4181_v18, 2  ;;  %v2420_v58 = vsel %vm775_vm8, 0.0, %v2419_v20 }
 0x619   : > { %v5460_v34 = vadd.f32 %v5459_v10, %v5458_v52  ;;  %v5463_v52 = vsel %vm3087_vm9, %v5266_v60, 0.0  ;;  %v2406_v39 = vsel %vm775_vm8, %v9510_v59, %v10653_v5  ;;  %v4234_v60 = vrot.slane %v4233_v22, 4 }
 0x61a   : > { %v2446_v10 = vperm.slane %v9543_v3, %v10593_v0  ;;  %v4214_v59 = vsel %vm3911_vm10, %v9183_v47, 0.0  ;;  %v2450_v49 = vsel %vm775_vm8, %v9535_v21, %v2449_v56  ;;  %v5600_v6 = vperm.slane %v6001_v37, 0  ;;  %v10654_v56 = vld [vmem:[#allocation29_spill] sm:$0xff] }
 0x61b   : > { %v5462_v15 = vadd.f32 %v5461_v31, %v5460_v34  ;;  %5162 = vperm.xlu1 %5943, %v5157_v24   ;;  %5619 = vperm.xlu0 %5942, %v5614_v53   ;;  %v4228_v34 = vadd.f32 %v4227_v44, %v4226_v50  ;;  %v5269_v24 = vmul.f32 %v9474_v30, %v2420_v58  ;;  %v5059_v41 = vperm.slane %v9380_v8, 5 }
 0x61c   : > { %5057 = vperm.xlu2 %5944, %v5052_v26   ;;  %v4213_v26 = vsel %vm3911_vm10, %v9106_v48, 0.0  ;;  %v4235_v5 = vadd.f32 %v4234_v60, %v4233_v22  ;;  %v4183_v20 = vadd.f32 %v4182_v13, %v4181_v18  ;;  %v2454_v50 = vperm.slane %v2448_v45, %v10597_v27 }
 0x61d   : > { %v4827_v31 = vpop.permute.xlu1 %4826  ;;  %v5464_v40 = vadd.f32 %v5463_v52, %v5462_v15  ;;  %v9625_v61 = vpop.permute.xlu0 %4924  ;;  %v4208_v15 = vadd.f32 %v4207_v55, %v4206_v63  ;;  %v4215_v48 = vadd.f32 %v4214_v59, %v4213_v26  ;;  %v2459_v30 = vrot.slane %v2446_v10, 4 }
 0x61e   : > { %v5267_v29 = vmul.f32 %v4827_v31, %v2418_v36  ;;  %v9630_v53 = vpop.permute.xlu2 %4896  ;;  %v5467_v36 = vsel %vm3087_vm9, %v5268_v9, 0.0  ;;  %v5171_v31 = vperm.slane %v9407_v62, 5  ;;  %v5469_v21 = vsel %vm3087_vm9, %v5269_v24, 0.0 }
 0x61f   : > { %v2458_v63 = vperm.slane %v2450_v49, %v10597_v27  ;;  %v9648_v55 = vperm.slane %v2406_v39, %v10597_v27  ;;  %v2559_v22 = vrot.slane %v9613_v57, 4  ;;  %v9656_v45 = vperm.slane %v2536_v12, %v10593_v0 }
 0x620   : > { %v5465_v3 = vsel %vm3087_vm9, %v5267_v29, 0.0  ;;  %v4209_v37 = vrot.slane %v4208_v15, 2  ;;  %v4216_v26 = vrot.slane %v4215_v48, 4  ;;  %v4236_v59 = vrot.slane %v4235_v5, 2 }
 0x621   : > { %v5466_v52 = vadd.f32 %v5465_v3, %v5464_v40  ;;  %v10655_v40 = vrot.slane %v10648_v11, 4  ;;  %v4229_v39 = vrot.slane %v4228_v34, 1  ;;  %v4184_v24 = vrot.slane %v4183_v20, 1 }
 0x622   : > { %v10656_v49 = vrot.slane %v9513_v7, 4  ;;  %v2460_v12 = vsel %vm775_vm8, %v2459_v30, %v9513_v7  ;;  %v4237_v7 = vadd.f32 %v4236_v59, %v4235_v5 }
 0x623   : > { %v5468_v44 = vadd.f32 %v5467_v36, %v5466_v52  ;;  %5064 = vperm.xlu1 %5943, %v5059_v41   ;;  %5605 = vperm.xlu0 %5942, %v5600_v6   ;;  %v2480_v18 = vsel %vm775_vm8, %v10655_v40, %v10654_v56  ;;  %v2471_v6 = vrot.slane %v2454_v50, 4  ;;  %v4278_v52 = vperm.slane %v8916_v19, %v8204_v14 }
 0x624   : > { %5176 = vperm.xlu2 %5944, %v5171_v31   ;;  %v2462_v3 = vsel %vm775_vm8, %v2446_v10, %v10656_v49  ;;  %v2473_v41 = vrot.slane %v2458_v63, 4  ;;  %v2560_v31 = vsel %vm775_vm8, %v2559_v22, %v9656_v45  ;;  %v5178_v10 = vperm.slane %v9407_v62, 6 }
 0x625   : > { %v4848_v60 = vpop.permute.xlu1 %4847  ;;  %v5470_v9 = vadd.f32 %v5469_v21, %v5468_v44  ;;  %v9658_v29 = vpop.permute.xlu0 %4945  ;;  %v4210_v44 = vadd.f32 %v4209_v37, %v4208_v15  ;;  %v4273_v21 = vperm.slane %v8864_v43, %v8204_v14  ;;  %v4230_v30 = vadd.f32 %v4229_v39, %v4228_v34 }
 0x626   : > { %v5270_v13 = vmul.f32 %v4848_v60, %v9648_v55  ;;  %v9661_v58 = vpop.permute.xlu2 %4917  ;;  %v4217_v60 = vadd.f32 %v4216_v26, %v4215_v48  ;;  %v5073_v49 = vperm.slane %v9380_v8, 7  ;;  %v2503_v19 = vrot.slane %v9570_v51, 4 }
 0x627   : > { %v4185_v23 = vadd.f32 %v4184_v24, %v4183_v20  ;;  %v2566_v15 = vperm.slane %v2560_v31, %v10597_v27  ;;  %v2486_v22 = vperm.slane %v2480_v18, %v10593_v0  ;;  %v4294_v37 = vadd.f32 %v4278_v52, %v4230_v30 }
 0x628   : > { %v5471_v36 = vsel %vm3087_vm9, %v5270_v13, 0.0  ;;  %v2466_v13 = vperm.slane %v2460_v12, %v10597_v27  ;;  %v4211_v34 = vrot.slane %v4210_v44, 1  ;;  %v2474_v8 = vsel %vm775_vm8, 0.0, %v2473_v41 }
 0x629   : > { %v9675_v40 = vadd.f32 %v5471_v36, %v5470_v9  ;;  %v5272_v9 = vmul.f32 %v9507_v33, %v2454_v50  ;;  %v9685_v36 = vperm.slane %v2462_v3, %v10597_v27  ;;  %v4289_v48 = vadd.f32 %v4273_v21, %v4185_v23  ;;  %v10657_v33 = vld [vmem:[#allocation28_spill] sm:$0xff]  ;;  %v10658_v3 = vld [vmem:[#allocation22_spill] sm:$0xff] }
 0x62a   : > { %v2472_v5 = vsel %vm775_vm8, 0.0, %v2471_v6  ;;  %v4218_v59 = vrot.slane %v4217_v60, 2  ;;  %v4238_v39 = vrot.slane %v4237_v7, 1  ;;  %v5274_v24 = vmul.f32 %v9597_v35, %v2458_v63 }
 0x62b   : > { %5183 = vperm.xlu1 %5943, %v5178_v10   ;;  %v4276_v50 = vperm.slane %v10657_v33, %v8204_v14  ;;  %v4279_v52 = vperm.slane %v10658_v3, %v8204_v14  ;;  %v2475_v23 = vrot.slane %v2466_v13, 4  ;;  %v2583_v31 = vrot.slane %v2566_v15, 4 }
 0x62c   : > { %5078 = vperm.xlu2 %5944, %v5073_v49   ;;  %6002 = vrcp.f32 %v4294_v37  ;;  %v5475_v6 = vsel %vm3087_vm9, %v5272_v9, 0.0  ;;  %v5275_v41 = vmul.f32 %v9552_v2, %v2474_v8  ;;  %v4212_v10 = vadd.f32 %v4211_v34, %v4210_v44 }
 0x62d   : > { %v4869_v20 = vpop.permute.xlu1 %4868  ;;  %v4981_v26 = vpop.permute.xlu0 %4980  ;;  %6004 = vrcp.f32 %v4289_v48  ;;  %v5185_v63 = vperm.slane %v9407_v62, 7  ;;  %v4219_v30 = vadd.f32 %v4218_v59, %v4217_v60  ;;  %v4239_v49 = vadd.f32 %v4238_v39, %v4237_v7 }
 0x62e   : > { %v5273_v18 = vmul.f32 %v4869_v20, %v2472_v5  ;;  %v9690_v12 = vpop.permute.xlu2 %4938  ;;  %v5478_v5 = vsel %vm3087_vm9, %v5274_v24, 0.0  ;;  %v4961_v20 = vperm.slane %v9183_v47, 7  ;;  %v2481_v3 = vrot.slane %v10654_v56, 4 }
 0x62f   : > { %v4292_v37 = vadd.f32 %v4276_v50, %v4212_v10  ;;  %v2505_v9 = vrot.slane %v2486_v22, 4  ;;  %v4295_v2 = vadd.f32 %v4279_v52, %v4239_v49  ;;  %v5480_v8 = vsel %vm3087_vm9, %v5275_v41, 0.0 }
 0x630   : > { %v5476_v21 = vsel %vm3087_vm9, %v5273_v18, 0.0  ;;  %v2504_v44 = vsel %vm775_vm8, %v2503_v19, %v2486_v22  ;;  %v2584_v34 = vsel %vm775_vm8, 0.0, %v2583_v31  ;;  %v9708_v62 = vperm.slane %v9578_v1, %v10593_v0 }
 0x631   : > { %v5477_v35 = vadd.f32 %v5476_v21, %v5475_v6  ;;  %v2476_v47 = vsel %vm775_vm8, 0.0, %v2475_v23  ;;  %v5289_v60 = vmul.f32 %v4981_v26, %v2584_v34  ;;  %v4220_v39 = vrot.slane %v4219_v30, 1 }
 0x632   : > { %v6003_v59 = vpop.eup %6002  ;;  %v5277_v24 = vmul.f32 %v9630_v53, %v2476_v47  ;;  %v2477_v22 = vrot.slane %v9685_v36, 4  ;;  %6006 = vrcp.f32 %v4292_v37  ;;  %v2510_v1 = vperm.slane %v2504_v44, %v10597_v27 }
 0x633   : > { %v5479_v43 = vadd.f32 %v5478_v5, %v5477_v35  ;;  %5190 = vperm.xlu1 %5943, %v5185_v63   ;;  %v6005_v50 = vpop.eup %6004  ;;  %v2506_v52 = vsel %vm775_vm8, %v9570_v51, %v2505_v9  ;;  %6008 = vrcp.f32 %v4295_v2  ;;  %v5278_v31 = vmul.f32 %v9590_v16, %v9685_v36 }
 0x634   : > { %4966 = vperm.xlu2 %5944, %v4961_v20   ;;  %v5507_v6 = vsel %vm3087_vm9, %v5289_v60, 0.0  ;;  %v4221_v10 = vadd.f32 %v4220_v39, %v4219_v30  ;;  %v5484_v35 = vsel %vm3087_vm9, %v5277_v24, 0.0  ;;  %v2527_v63 = vrot.slane %v2510_v1, 4 }
 0x635   : > { %v4890_v56 = vpop.permute.xlu1 %4889  ;;  %v5481_v7 = vadd.f32 %v5480_v8, %v5479_v43  ;;  %v9711_v48 = vpop.permute.xlu0 %4987  ;;  %v10659_v43 = vld [vmem:[#allocation21_spill] sm:$0xff]  ;;  %v2482_v16 = vsel %vm775_vm8, %v10648_v11, %v2481_v3  ;;  %v5486_v49 = vsel %vm3087_vm9, %v5278_v31, 0.0  ;;  %v2514_v20 = vperm.slane %v2506_v52, %v10597_v27  ;;  %v10661_v52 = vld [vmem:[#allocation100_spill] sm:$0xff] }
 0x636   : > { %v5276_v18 = vmul.f32 %v4890_v56, %v2466_v13  ;;  %v4974_v19 = vpop.permute.xlu2 %4973  ;;  %v4277_v23 = vperm.slane %v10659_v43, %v8204_v14  ;;  %v5642_v13 = vperm.slane %v6003_v59, 0  ;;  %v2478_v30 = vsel %vm775_vm8, 0.0, %v2477_v22  ;;  %v10660_v56 = vld [vmem:[#allocation101_spill] sm:$0xff] }
 0x637   : > { %v5288_v26 = vmul.f32 %v4974_v19, %v2566_v15  ;;  %v5607_v15 = vperm.slane %v6005_v50, 0  ;;  %v2515_v44 = vrot.slane %v9708_v62, 4  ;;  %v5280_v34 = vmul.f32 %v9661_v58, %v2510_v1 }
 0x638   : > { %v5482_v53 = vsel %vm3087_vm9, %v5276_v18, 0.0  ;;  %v4293_v36 = vadd.f32 %v4277_v23, %v4221_v10  ;;  %v6007_v5 = vpop.eup %6006  ;;  %v9740_v3 = vperm.slane %v2482_v16, %v10593_v0  ;;  %v2528_v60 = vsel %vm775_vm8, 0.0, %v2527_v63 }
 0x639   : > { %v5483_v41 = vadd.f32 %v5482_v53, %v5481_v7  ;;  %v5506_v21 = vsel %vm3087_vm9, %v5288_v26, 0.0  ;;  %v6009_v8 = vpop.eup %6008  ;;  %v2915_v7 = vrot.slane %v10660_v56, 4  ;;  %v5281_v59 = vmul.f32 %v9625_v61, %v2528_v60 }
 0x63a   : > { %v9726_v51 = vadd.f32 %v5507_v6, %v5506_v21  ;;  %6010 = vrcp.f32 %v4293_v36  ;;  %v5649_v24 = vperm.slane %v6009_v8, 0  ;;  %v2529_v18 = vrot.slane %v2514_v20, 4  ;;  %v10662_v21 = vld [vmem:[#allocation98_spill] sm:$0xff] }
 0x63b   : > { %v5485_v14 = vadd.f32 %v5484_v35, %v5483_v41  ;;  %5647 = vperm.xlu1 %5943, %v5642_v13   ;;  %v5628_v22 = vperm.slane %v6007_v5, 0  ;;  %v2516_v58 = vsel %vm775_vm8, %v2515_v44, %v9740_v3  ;;  %v5490_v50 = vsel %vm3087_vm9, %v5280_v34, 0.0 }
 0x63c   : > { %5612 = vperm.xlu2 %5944, %v5607_v15   ;;  %v2916_v26 = vsel %vm775_vm8, %v2915_v7, %v10661_v52  ;;  %v5492_v23 = vsel %vm3087_vm9, %v5281_v59, 0.0  ;;  %v2522_v61 = vperm.slane %v2516_v58, %v10597_v27  ;;  %v2530_v31 = vsel %vm775_vm8, 0.0, %v2529_v18  ;;  %v10665_v58 = vld [vmem:[#allocation102_spill] sm:$0xff] }
 0x63d   : > { %v4911_v37 = vpop.permute.xlu1 %4910  ;;  %v5487_v9 = vadd.f32 %v5486_v49, %v5485_v14  ;;  %v9733_v2 = vpop.permute.xlu0 %5106  ;;  %v2903_v10 = vrot.slane %v10662_v21, 4  ;;  %v5283_v35 = vmul.f32 %v9690_v12, %v2530_v31  ;;  %v2922_v14 = vperm.slane %v2916_v26, %v10593_v0  ;;  %v10667_v31 = vld [vmem:[#allocation15_spill] sm:$0xff] }
 0x63e   : > { %v5279_v47 = vmul.f32 %v4911_v37, %v2478_v30  ;;  %v9737_v11 = vpop.permute.xlu2 %5092  ;;  %v5284_v16 = vmul.f32 %v9658_v29, %v2522_v61  ;;  %v2531_v30 = vrot.slane %v2522_v61, 4  ;;  %v10663_v37 = vld [vmem:[#allocation99_spill] sm:$0xff] }
 0x63f   : > { %v5496_v8 = vsel %vm3087_vm9, %v5283_v35, 0.0  ;;  %v2927_v44 = vrot.slane %v2922_v14, 4 }
 0x640   : > { %v5488_v39 = vsel %vm3087_vm9, %v5279_v47, 0.0  ;;  %v6011_v41 = vpop.eup %6010  ;;  %v5498_v12 = vsel %vm3087_vm9, %v5284_v16, 0.0  ;;  %v2532_v47 = vsel %vm775_vm8, 0.0, %v2531_v30  ;;  %v10670_v16 = vld [vmem:[#allocation60_spill] sm:$0xff] }
 0x641   : > { %v5489_v19 = vadd.f32 %v5488_v39, %v5487_v9  ;;  %v5635_v49 = vperm.slane %v6011_v41, 0  ;;  %v2904_v9 = vsel %vm775_vm8, %v2903_v10, %v10663_v37  ;;  %v10669_v10 = vld [vmem:[#allocation55_spill] sm:$0xff] }
 0x642   : > { %v2603_v35 = vrot.slane %v10669_v10, 4 }
 0x643   : > { %v5491_v1 = vadd.f32 %v5490_v50, %v5489_v19  ;;  %5654 = vperm.xlu1 %5943, %v5649_v24  }
 0x644   : > { %5633 = vperm.xlu2 %5944, %v5628_v22  }
 0x645   : > { %v4932_v53 = vpop.permute.xlu1 %4931  ;;  %v5493_v13 = vadd.f32 %v5492_v23, %v5491_v1  ;;  %v9754_v6 = vpop.permute.xlu0 %5008 }
 0x646   : > { %v5282_v15 = vmul.f32 %v4932_v53, %v2514_v20  ;;  %v9758_v63 = vpop.permute.xlu2 %4994  ;;  %v2910_v20 = vperm.slane %v2904_v9, %v10593_v0  ;;  %v2593_v53 = vrot.slane %v10667_v31, 4 }
 0x648   : > { %v5494_v36 = vsel %vm3087_vm9, %v5282_v15, 0.0  ;;  %v2928_v24 = vsel %vm775_vm8, %v2927_v44, %v2910_v20  ;;  %v2929_v15 = vrot.slane %v2910_v20, 4 }
 0x649   : > { %v5495_v5 = vadd.f32 %v5494_v36, %v5493_v13  ;;  %v9778_v22 = vperm.slane %v2928_v24, %v10597_v27  ;;  %v10668_v13 = vld [vmem:[#allocation47_spill] sm:$0xff]  ;;  %v2604_v36 = vsel %vm775_vm8, %v2603_v35, %v10670_v16 }
 0x64a   : > { %v2594_v41 = vsel %vm775_vm8, %v10668_v13, %v2593_v53  ;;  %v2930_v30 = vsel %vm775_vm8, %v2922_v14, %v2929_v15  ;;  %v2591_v44 = vrot.slane %v10668_v13, 4  ;;  %v10674_v14 = vld [vmem:[#allocation82_spill] sm:$0xff] }
 0x64b   : > { %v5497_v34 = vadd.f32 %v5496_v8, %v5495_v5  ;;  %5640 = vperm.xlu1 %5943, %v5635_v49   ;;  %v5576_v50 = vmul.f32 %v10665_v58, %v9778_v22  ;;  %v10671_v49 = vld [vmem:[#allocation67_spill] sm:$0xff]  ;;  %v9824_v58 = vperm.slane %v2930_v30, %v10597_v27  ;;  %v10676_v13 = vld [vmem:[#allocation90_spill] sm:$0xff] }
 0x64c   : > { %v2661_v5 = vrot.slane %v10671_v49, 4  ;;  %v2592_v15 = vsel %vm775_vm8, %v2591_v44, %v10667_v31 }
 0x64d   : > { %v4953_v29 = vpop.permute.xlu1 %4952  ;;  %v5499_v60 = vadd.f32 %v5498_v12, %v5497_v34  ;;  %v9769_v7 = vpop.permute.xlu0 %5127  ;;  %v9789_v61 = vadd.f32 %v5576_v50, %v9067_v38  ;;  %v2537_v38 = vrot.slane %v10651_v54, 4  ;;  %v9806_v34 = vperm.slane %v2594_v41, %v10593_v0  ;;  %v10675_v50 = vld [vmem:[#allocation37_spill] sm:$0xff] }
 0x64e   : > { %v5285_v59 = vmul.f32 %v4953_v29, %v2532_v47  ;;  %v9771_v39 = vpop.permute.xlu2 %5113  ;;  %v2549_v12 = vrot.slane %v10650_v25, 4  ;;  %v10673_v47 = vld [vmem:[#allocation20_spill] sm:$0xff]  ;;  %v2662_v24 = vsel %vm775_vm8, %v10674_v14, %v2661_v5  ;;  %v9817_v54 = vperm.slane %v2604_v36, %v10593_v0 }
 0x64f   : > { %10666 = vst [vmem:[#allocation33_spill] sm:$0xff] %v9789_v61  ;;  %v2649_v29 = vrot.slane %v10673_v47, 4  ;;  %v2705_v53 = vrot.slane %v10675_v50, 4  ;;  %v2647_v41 = vrot.slane %v10676_v13, 4 }
 0x650   : > { %v5500_v18 = vsel %vm3087_vm9, %v5285_v59, 0.0  ;;  %v2659_v59 = vrot.slane %v10674_v14, 4  ;;  %v2550_v25 = vsel %vm775_vm8, %v10647_v4, %v2549_v12  ;;  %v2561_v4 = vrot.slane %v9656_v45, 4  ;;  %v10678_v14 = vld [vmem:[#allocation68_spill] sm:$0xff] }
 0x651   : > { %v9775_v19 = vadd.f32 %v5500_v18, %v5499_v60  ;;  %v2605_v60 = vrot.slane %v10670_v16, 4  ;;  %v2538_v18 = vsel %vm775_vm8, %v10649_v42, %v2537_v38  ;;  %v2650_v35 = vsel %vm775_vm8, %v10676_v13, %v2649_v29  ;;  %v10677_v38 = vld [vmem:[#allocation91_spill] sm:$0xff] }
 0x652   : > { %v9834_v42 = vperm.slane %v2662_v24, %v10593_v0  ;;  %v2660_v36 = vsel %vm775_vm8, %v2659_v59, %v10671_v49  ;;  %v9840_v5 = vperm.slane %v2538_v18, %v10593_v0  ;;  %v9843_v30 = vperm.slane %v2550_v25, %v10593_v0 }
 0x653   : > { %10664 = vst [vmem:[#allocation120_spill] sm:$0xff] %v9775_v19  ;;  %v2703_v12 = vrot.slane %v10677_v38, 4  ;;  %v2606_v31 = vsel %vm775_vm8, %v10669_v10, %v2605_v60  ;;  %v2615_v44 = vrot.slane %v9817_v54, 4  ;;  %v9850_v29 = vperm.slane %v2650_v35, %v10593_v0  ;;  %v10680_v35 = vld [vmem:[#allocation93_spill] sm:$0xff] }
 0x654   : > { %v2953_v45 = vrot.slane %v9824_v58, 4  ;;  %v2717_v49 = vrot.slane %v10678_v14, 4  ;;  %v2648_v24 = vsel %vm775_vm8, %v2647_v41, %v10673_v47  ;;  %v2706_v18 = vsel %vm775_vm8, %v10677_v38, %v2705_v53  ;;  %v10681_v19 = vld [vmem:[#allocation105_spill] sm:$0xff] }
 0x655   : > { %v9782_v1 = vpop.permute.xlu1 %5085  ;;  %v9784_v26 = vpop.permute.xlu0 %5029  ;;  %v2666_v60 = vperm.slane %v2660_v36, %v10593_v0  ;;  %v2715_v16 = vrot.slane %v10680_v35, 4  ;;  %v2562_v43 = vsel %vm775_vm8, %v9613_v57, %v2561_v4  ;;  %v2573_v47 = vrot.slane %v9840_v5, 4 }
 0x656   : > { %v9786_v23 = vpop.permute.xlu2 %5015  ;;  %v2571_v41 = vrot.slane %v9843_v30, 4  ;;  %v2704_v53 = vsel %vm775_vm8, %v2703_v12, %v10675_v50  ;;  %v2718_v38 = vsel %vm775_vm8, %v10680_v35, %v2717_v49  ;;  %v2654_v36 = vperm.slane %v2648_v24, %v10593_v0 }
 0x657   : > { %v2685_v13 = vrot.slane %v9850_v29, 4  ;;  %v9879_v61 = vperm.slane %v2706_v18, %v10593_v0  ;;  %v2954_v57 = vsel %vm775_vm8, 0.0, %v2953_v45  ;;  %v2905_v4 = vrot.slane %v10663_v37, 4 }
 0x658   : > { %v2570_v50 = vperm.slane %v2562_v43, %v10597_v27  ;;  %v9887_v12 = vperm.slane %v2704_v53, %v10593_v0  ;;  %v2716_v49 = vsel %vm775_vm8, %v2715_v16, %v10678_v14  ;;  %v9892_v24 = vperm.slane %v2718_v38, %v10593_v0 }
 0x659   : > { %v2671_v18 = vrot.slane %v2666_v60, 4  ;;  %v2906_v45 = vsel %vm775_vm8, %v10662_v21, %v2905_v4  ;;  %v2085_v37 = vrot.slane %v9176_v28, 4  ;;  %v2673_v43 = vrot.slane %v2654_v36, 4 }
 0x65a   : > { %v2598_v53 = vperm.slane %v2592_v15, %v10593_v0  ;;  %v9904_v16 = vperm.slane %v2606_v31, %v10593_v0  ;;  %v9908_v38 = vperm.slane %v2716_v49, %v10593_v0  ;;  %v2585_v21 = vrot.slane %v2570_v50, 4 }
 0x65b   : > { %v2672_v35 = vsel %vm775_vm8, %v2671_v18, %v2654_v36  ;;  %v2572_v15 = vsel %vm775_vm8, %v2571_v41, %v9840_v5  ;;  %v9923_v4 = vperm.slane %v2906_v45, %v10593_v0  ;;  %v2086_v49 = vsel %vm775_vm8, 0.0, %v2085_v37 }
 0x65c   : > { %v2616_v31 = vsel %vm775_vm8, %v2615_v44, %v2598_v53  ;;  %v2678_v18 = vperm.slane %v2672_v35, %v10597_v27  ;;  %v10682_v5 = vrot.slane %v9806_v34, 4  ;;  %v2578_v45 = vperm.slane %v2572_v15, %v10597_v27 }
 0x65d   : > { %v9799_v9 = vpop.permute.xlu1 %5099  ;;  %v9801_v8 = vpop.permute.xlu0 %5148  ;;  %v9939_v37 = vperm.slane %v2616_v31, %v10597_v27  ;;  %v2574_v35 = vsel %vm775_vm8, %v9843_v30, %v2573_v47 }
 0x65e   : > { %10672 = vst [vmem:[#allocation6_spill] sm:$0xff] %v9801_v8  ;;  %v9809_v20 = vpop.permute.xlu2 %5134  ;;  %v5579_v8 = vmul.f32 %v10681_v19, %v2954_v57  ;;  %v2421_v19 = vrot.slane %v9648_v55, 4  ;;  %v2630_v44 = vsel %vm775_vm8, %v9904_v16, %v10682_v5  ;;  %v2695_v15 = vrot.slane %v2678_v18, 4 }
 0x65f   : > { %v2587_v30 = vrot.slane %v2578_v45, 4 }
 0x660   : > { %v2422_v14 = vsel %vm775_vm8, 0.0, %v2421_v19 }
 0x665   : > { %v9859_v25 = vpop.permute.xlu1 %5001  ;;  %v9861_v10 = vpop.permute.xlu0 %5050 }
 0x666   : > { %10679 = vst [vmem:[#allocation116_spill] sm:$0xff] %v9861_v10  ;;  %v9868_v59 = vpop.permute.xlu2 %5036  ;;  %v2197_v10 = vrot.slane %v9311_v32, 4  ;;  %v9899_v32 = vadd.f32 %v5579_v8, %v9489_v46  ;;  %v2739_v8 = vrot.slane %v9892_v24, 4 }
 0x668   : > { %v2198_v28 = vsel %vm775_vm8, 0.0, %v2197_v10  ;;  %v2917_v10 = vrot.slane %v10661_v52, 4  ;;  %v2586_v52 = vsel %vm775_vm8, 0.0, %v2585_v21 }
 0x669   : > { %v5239_v36 = vmul.f32 %v9210_v17, %v2198_v28  ;;  %v2674_v17 = vsel %vm775_vm8, %v2666_v60, %v2673_v43  ;;  %v2617_v28 = vrot.slane %v2598_v53, 4  ;;  %v5290_v60 = vmul.f32 %v9711_v48, %v2570_v50  ;;  %v10683_v53 = vld [vmem:[#allocation103_spill] sm:$0xff] }
 0x66a   : > { %v2918_v41 = vsel %vm775_vm8, %v10660_v56, %v2917_v10  ;;  %v5291_v43 = vmul.f32 %v9758_v63, %v2586_v52  ;;  %v5578_v5 = vmul.f32 %v10683_v53, %v9824_v58  ;;  %v2682_v56 = vperm.slane %v2674_v17, %v10597_v27  ;;  %v10684_v10 = vld [vmem:[#allocation106_spill] sm:$0xff] }
 0x66b   : > { %v5411_v19 = vsel %vm3087_vm9, %v5239_v36, 0.0  ;;  %v9951_v31 = vperm.slane %v2918_v41, %v10593_v0  ;;  %v5292_v36 = vmul.f32 %v9859_v25, %v2578_v45  ;;  %v2618_v48 = vsel %vm775_vm8, %v9817_v54, %v2617_v28  ;;  %v10686_v25 = vld [vmem:[#allocation35_spill] sm:$0xff] }
 0x66c   : > { %v5412_v21 = vadd.f32 %v5411_v19, %v10684_v10  ;;  %v9957_v63 = vperm.slane %v2630_v44, %v10597_v27  ;;  %v10685_v58 = vrot.slane %v9834_v42, 4  ;;  %v2582_v50 = vperm.slane %v2574_v35, %v10597_v27 }
 0x66d   : > { %v9911_v55 = vpop.permute.xlu1 %5120  ;;  %v9913_v46 = vpop.permute.xlu0 %5169  ;;  %v5223_v19 = vmul.f32 %v10686_v25, %v2086_v49  ;;  %v5509_v54 = vsel %vm3087_vm9, %v5290_v60, 0.0  ;;  %v5511_v28 = vsel %vm3087_vm9, %v5291_v43, 0.0  ;;  %v5304_v44 = vmul.f32 %v9782_v1, %v2678_v18 }
 0x66e   : > { %v9920_v57 = vpop.permute.xlu2 %5155  ;;  %v2684_v47 = vsel %vm775_vm8, %v10685_v58, %v9850_v29  ;;  %v9966_v41 = vadd.f32 %v5578_v5, %v5412_v21  ;;  %v2697_v53 = vrot.slane %v2682_v56, 4  ;;  %v2696_v10 = vsel %vm775_vm8, 0.0, %v2695_v15 }
 0x66f   : > { %v5510_v35 = vadd.f32 %v5509_v54, %v9726_v51  ;;  %v2627_v58 = vrot.slane %v9904_v16, 4  ;;  %v2939_v5 = vrot.slane %v9951_v31, 4  ;;  %v5305_v21 = vmul.f32 %v9737_v11, %v2696_v10 }
 0x670   : > { %v5306_v49 = vmul.f32 %v9799_v9, %v2682_v56  ;;  %v5513_v60 = vsel %vm3087_vm9, %v5292_v36, 0.0  ;;  %v2588_v43 = vsel %vm775_vm8, 0.0, %v2587_v30  ;;  %v2690_v18 = vperm.slane %v2684_v47, %v10597_v27  ;;  %v10687_v36 = vld [vmem:[#allocation36_spill] sm:$0xff] }
 0x671   : > { %v5512_v1 = vadd.f32 %v5511_v28, %v5510_v35  ;;  %v2589_v25 = vrot.slane %v2582_v50, 4  ;;  %v5380_v15 = vsel %vm3087_vm9, %v5223_v19, 0.0  ;;  %v5293_v51 = vmul.f32 %v9754_v6, %v2588_v43  ;;  %v10688_v28 = vld [vmem:[#allocation97_spill] sm:$0xff] }
 0x672   : > { %v5537_v16 = vsel %vm3087_vm9, %v5304_v44, 0.0  ;;  %v9987_v54 = vperm.slane %v2618_v48, %v10597_v27  ;;  %v2698_v11 = vsel %vm775_vm8, 0.0, %v2697_v53  ;;  %v2639_v56 = vrot.slane %v9939_v37, 4 }
 0x673   : > { %v5514_v9 = vadd.f32 %v5513_v60, %v5512_v1  ;;  %v9992_v30 = vadd.f32 %v5380_v15, %v10687_v36  ;;  %v2940_v47 = vsel %vm775_vm8, %v2939_v5, %v9923_v4  ;;  %v5271_v19 = vmul.f32 %v10688_v28, %v2422_v14 }
 0x674   : > { %v5538_v6 = vsel %vm3087_vm9, %v5305_v21, 0.0  ;;  %v5540_v44 = vsel %vm3087_vm9, %v5306_v49, 0.0  ;;  %v5307_v48 = vmul.f32 %v9733_v2, %v2698_v11  ;;  %v2699_v35 = vrot.slane %v2690_v18, 4 }
 0x675   : > { %v5023_v17 = vpop.permute.xlu1 %5022  ;;  %v9964_v52 = vpop.permute.xlu0 %5071  ;;  %v5539_v10 = vadd.f32 %v5538_v6, %v5537_v16  ;;  %v2590_v53 = vsel %vm775_vm8, 0.0, %v2589_v25  ;;  %v5515_v1 = vsel %vm3087_vm9, %v5293_v51, 0.0  ;;  %v5294_v5 = vmul.f32 %v9786_v23, %v2582_v50 }
 0x676   : > { %v9972_v45 = vpop.permute.xlu2 %5057  ;;  %v5295_v15 = vmul.f32 %v5023_v17, %v2590_v53  ;;  %v2628_v14 = vsel %vm775_vm8, %v2627_v58, %v9806_v34  ;;  %v10012_v2 = vperm.slane %v2940_v47, %v10597_v27  ;;  %v5516_v16 = vadd.f32 %v5515_v1, %v5514_v9 }
 0x677   : > { %v5541_v49 = vadd.f32 %v5540_v44, %v5539_v10  ;;  %v2645_v25 = vrot.slane %v9957_v63, 4  ;;  %v5473_v11 = vsel %vm3087_vm9, %v5271_v19, 0.0  ;;  %v2686_v23 = vsel %vm775_vm8, %v9834_v42, %v2685_v13 }
 0x678   : > { %v2727_v50 = vrot.slane %v9908_v38, 4  ;;  %v10689_v34 = vrot.slane %v9740_v3, 4  ;;  %v5580_v58 = vmul.f32 %v10657_v33, %v10012_v2  ;;  %v5542_v51 = vsel %vm3087_vm9, %v5307_v48, 0.0 }
 0x679   : > { %v2700_v9 = vsel %vm775_vm8, 0.0, %v2699_v35  ;;  %v5474_v36 = vadd.f32 %v5473_v11, %v9675_v40  ;;  %v5308_v29 = vmul.f32 %v9771_v39, %v2690_v18  ;;  %v5517_v42 = vsel %vm3087_vm9, %v5294_v5, 0.0 }
 0x67a   : > { %v2518_v17 = vsel %vm775_vm8, %v9708_v62, %v10689_v34  ;;  %v5309_v13 = vmul.f32 %v9911_v55, %v2700_v9  ;;  %v5519_v3 = vsel %vm3087_vm9, %v5295_v15, 0.0  ;;  %v2694_v47 = vperm.slane %v2686_v23, %v10597_v27 }
 0x67b   : > { %v5543_v62 = vadd.f32 %v5542_v51, %v5541_v49  ;;  %v5518_v28 = vadd.f32 %v5517_v42, %v5516_v16  ;;  %v10035_v19 = vadd.f32 %v5580_v58, %v5474_v36  ;;  %v2941_v33 = vrot.slane %v9923_v4, 4 }
 0x67c   : > { %v5296_v6 = vmul.f32 %v9784_v26, %v9939_v37  ;;  %v2728_v40 = vsel %vm775_vm8, %v2727_v50, %v9887_v12  ;;  %v2641_v39 = vrot.slane %v9987_v54, 4  ;;  %v2640_v55 = vsel %vm775_vm8, 0.0, %v2639_v56 }
 0x67d   : > { %v10001_v60 = vpop.permute.xlu1 %5141  ;;  %v10003_v43 = vpop.permute.xlu0 %4959  ;;  %v5520_v18 = vadd.f32 %v5519_v3, %v5518_v28  ;;  %v2634_v44 = vperm.slane %v2628_v14, %v10597_v27  ;;  %v2526_v48 = vperm.slane %v2518_v17, %v10597_v27  ;;  %v5544_v53 = vsel %vm3087_vm9, %v5308_v29, 0.0 }
 0x67e   : > { %v10009_v21 = vpop.permute.xlu2 %5176  ;;  %v5546_v4 = vsel %vm3087_vm9, %v5309_v13, 0.0  ;;  %v2729_v26 = vrot.slane %v9887_v12, 4  ;;  %v10050_v37 = vsel %vm775_vm8, 0.0, %v2645_v25  ;;  %v5310_v56 = vmul.f32 %v9769_v7, %v2694_v47 }
 0x67f   : > { %v2734_v5 = vperm.slane %v2728_v40, %v10597_v27  ;;  %v2701_v15 = vrot.slane %v2694_v47, 4  ;;  %v5545_v14 = vadd.f32 %v5544_v53, %v5543_v62  ;;  %v5521_v49 = vsel %vm3087_vm9, %v5296_v6, 0.0  ;;  %v10691_v53 = vld [vmem:[#allocation6_spill] sm:$0xff] }
 0x680   : > { %v5297_v16 = vmul.f32 %v9868_v59, %v2640_v55  ;;  %v2730_v11 = vsel %vm775_vm8, %v9908_v38, %v2729_v26  ;;  %v5522_v25 = vadd.f32 %v5521_v49, %v5520_v18  ;;  %v2533_v50 = vrot.slane %v2526_v48, 4 }
 0x681   : > { %v5547_v23 = vadd.f32 %v5546_v4, %v5545_v14  ;;  %v2643_v34 = vrot.slane %v2634_v44, 4  ;;  %v2951_v17 = vrot.slane %v9778_v22, 4  ;;  %v2955_v7 = vrot.slane %v10012_v2, 4 }
 0x682   : > { %v2942_v58 = vsel %vm775_vm8, %v9951_v31, %v2941_v33  ;;  %v2642_v51 = vsel %vm775_vm8, 0.0, %v2641_v39  ;;  %v5548_v59 = vsel %vm3087_vm9, %v5310_v56, 0.0  ;;  %v2751_v9 = vrot.slane %v2734_v5, 4  ;;  %v10690_v33 = vld [vmem:[#allocation116_spill] sm:$0xff] }
 0x683   : > { %v2702_v38 = vsel %vm775_vm8, 0.0, %v2701_v15  ;;  %v5523_v29 = vsel %vm3087_vm9, %v5297_v16, 0.0  ;;  %v5312_v22 = vmul.f32 %v10001_v60, %v2734_v5  ;;  %v5549_v42 = vadd.f32 %v5548_v59, %v5547_v23  ;;  %v10693_v23 = vld [vmem:[#allocation104_spill] sm:$0xff] }
 0x684   : > { %v5311_v36 = vmul.f32 %v9809_v20, %v2702_v38  ;;  %v5524_v13 = vadd.f32 %v5523_v29, %v5522_v25  ;;  %v2534_v47 = vsel %vm775_vm8, 0.0, %v2533_v50  ;;  %v2644_v62 = vsel %vm775_vm8, 0.0, %v2643_v34  ;;  %v10695_v29 = vld [vmem:[#allocation33_spill] sm:$0xff] }
 0x685   : > { %v5044_v10 = vpop.permute.xlu1 %5043  ;;  %v5627_v35 = vpop.permute.xlu0 %5626  ;;  %v10076_v28 = vperm.slane %v2942_v58, %v10597_v27  ;;  %v5299_v6 = vmul.f32 %v10690_v33, %v2642_v51  ;;  %v2740_v20 = vsel %vm775_vm8, %v2739_v8, %v9879_v61  ;;  %v5286_v60 = vmul.f32 %v10003_v43, %v2526_v48  ;;  %v10694_v58 = vld [vmem:[#allocation120_spill] sm:$0xff] }
 0x686   : > { %v10052_v1 = vpop.permute.xlu2 %5078  ;;  %v5298_v12 = vmul.f32 %v5044_v10, %v9987_v54  ;;  %v2738_v54 = vperm.slane %v2730_v11, %v10597_v27  ;;  %v2956_v39 = vsel %vm775_vm8, 0.0, %v2955_v7  ;;  %v2952_v55 = vsel %vm775_vm8, 0.0, %v2951_v17 }
 0x687   : > { %v2752_v18 = vsel %vm775_vm8, 0.0, %v2751_v9  ;;  %v5550_v26 = vsel %vm3087_vm9, %v5311_v36, 0.0  ;;  %v5552_v56 = vsel %vm3087_vm9, %v5312_v22, 0.0  ;;  %v2746_v15 = vperm.slane %v2740_v20, %v10597_v27 }
 0x688   : > { %v5525_v2 = vsel %vm3087_vm9, %v5298_v12, 0.0  ;;  %v5313_v4 = vmul.f32 %v10691_v53, %v2752_v18  ;;  %v2753_v5 = vrot.slane %v2738_v54, 4  ;;  %v5300_v8 = vmul.f32 %v9972_v45, %v2634_v44  ;;  %v10697_v53 = vld [vmem:[#allocation109_spill] sm:$0xff] }
 0x689   : > { %v5526_v10 = vadd.f32 %v5525_v2, %v5524_v13  ;;  %v5551_v43 = vadd.f32 %v5550_v26, %v5549_v42  ;;  %v10692_v48 = vrot.slane %v9879_v61, 4  ;;  %v5527_v49 = vsel %vm3087_vm9, %v5299_v6, 0.0  ;;  %v10696_v6 = vld [vmem:[#allocation21_spill] sm:$0xff] }
 0x68a   : > { %v5502_v16 = vsel %vm3087_vm9, %v5286_v60, 0.0  ;;  %v5577_v25 = vmul.f32 %v10693_v23, %v2952_v55  ;;  %v5659_v17 = vmul.f32 %v5627_v35, %v9899_v32  ;;  %v5554_v45 = vsel %vm3087_vm9, %v5313_v4, 0.0 }
 0x68b   : > { %v2742_v14 = vsel %vm775_vm8, %v9892_v24, %v10692_v48  ;;  %v5553_v50 = vadd.f32 %v5552_v56, %v5551_v43  ;;  %v5528_v34 = vadd.f32 %v5527_v49, %v5526_v10  ;;  %v5314_v61 = vmul.f32 %v9920_v57, %v2738_v54 }
 0x68c   : > { %v5302_v24 = vmul.f32 %v9964_v52, %v9957_v63  ;;  %v2754_v44 = vsel %vm775_vm8, 0.0, %v2753_v5  ;;  %v5529_v7 = vsel %vm3087_vm9, %v5300_v8, 0.0  ;;  %v5585_v38 = vadd.f32 %v5577_v25, %v9992_v30 }
 0x68d   : > { %v5163_v31 = vpop.permute.xlu1 %5162  ;;  %v5620_v3 = vpop.permute.xlu0 %5619  ;;  %v5555_v22 = vadd.f32 %v5554_v45, %v5553_v50  ;;  %v5670_v63 = vrot.slane %v5659_v17, 4  ;;  %v5530_v52 = vadd.f32 %v5529_v7, %v5528_v34  ;;  %v2755_v42 = vrot.slane %v2746_v15, 4 }
 0x68e   : > { %v4967_v40 = vpop.permute.xlu2 %4966  ;;  %v5658_v11 = vmul.f32 %v5620_v3, %v9966_v41  ;;  %v5503_v41 = vadd.f32 %v5502_v16, %v10694_v58  ;;  %v5315_v51 = vmul.f32 %v5163_v31, %v2754_v44  ;;  %v5303_v13 = vmul.f32 %v10052_v1, %v10050_v37 }
 0x68f   : > { %v5287_v12 = vmul.f32 %v4967_v40, %v2534_v47  ;;  %v5581_v20 = vmul.f32 %v10696_v6, %v2956_v39  ;;  %v5556_v60 = vsel %vm3087_vm9, %v5314_v61, 0.0  ;;  %v5533_v40 = vsel %vm3087_vm9, %v5302_v24, 0.0 }
 0x690   : > { %v5664_v36 = vrot.slane %v5658_v11, 4  ;;  %v5558_v55 = vsel %vm3087_vm9, %v5315_v51, 0.0  ;;  %v5557_v18 = vadd.f32 %v5556_v60, %v5555_v22  ;;  %v5582_v4 = vmul.f32 %v10697_v53, %v10076_v28  ;;  %v5738_v53 = vld [vmem:[%s10205_s3] sm:$0xff] }
 0x691   : > { %v5504_v32 = vsel %vm3087_vm9, %v5287_v12, 0.0  ;;  %v5316_v26 = vmul.f32 %v9913_v46, %v2746_v15  ;;  %v5535_v56 = vsel %vm3087_vm9, %v5303_v13, 0.0  ;;  %v2750_v39 = vperm.slane %v2742_v14, %v10597_v27 }
 0x692   : > { %v5505_v30 = vadd.f32 %v5504_v32, %v5503_v41  ;;  %v5559_v5 = vadd.f32 %v5558_v55, %v5557_v18  ;;  %v2756_v16 = vsel %vm775_vm8, 0.0, %v2755_v42  ;;  %v2957_v15 = vrot.slane %v10076_v28, 4  ;;  %v10698_v41 = vld [vmem:[#allocation22_spill] sm:$0xff] }
 0x693   : > { %v5560_v12 = vsel %vm3087_vm9, %v5316_v26, 0.0  ;;  %v5317_v23 = vmul.f32 %v10009_v21, %v2756_v16  ;;  %v2757_v46 = vrot.slane %v2750_v39, 4 }
 0x694   : > { %v5589_v49 = vadd.f32 %v5581_v20, %v5505_v30  ;;  %v5561_v50 = vadd.f32 %v5560_v12, %v5559_v5  ;;  %v2958_v58 = vsel %vm775_vm8, 0.0, %v2957_v15 }
 0x695   : > { %v5065_v59 = vpop.permute.xlu1 %5064  ;;  %v5606_v9 = vpop.permute.xlu0 %5605  ;;  %v5562_v14 = vsel %vm3087_vm9, %v5317_v23, 0.0  ;;  %v2758_v61 = vsel %vm775_vm8, 0.0, %v2757_v46  ;;  %v5583_v51 = vmul.f32 %v10698_v41, %v2958_v58 }
 0x696   : > { %v5301_v35 = vmul.f32 %v5065_v59, %v2644_v62  ;;  %v5656_v57 = vmul.f32 %v5606_v9, %v10695_v29  ;;  %v5613_v54 = vpop.permute.xlu2 %5612  ;;  %v5563_v45 = vadd.f32 %v5562_v14, %v5561_v50 }
 0x697   : > { %v5657_v2 = vmul.f32 %v5613_v54, %v5585_v38 }
 0x698   : > { %v5531_v31 = vsel %vm3087_vm9, %v5301_v35, 0.0  ;;  %v5665_v3 = vsel %vm775_vm8, %v5664_v36, %v5656_v57 }
 0x699   : > { %v5532_v47 = vadd.f32 %v5531_v31, %v5530_v52  ;;  %v5669_v33 = vperm.slane %v5665_v3, %v10593_v0  ;;  %v5671_v62 = vsel %vm775_vm8, %v5670_v63, %v5657_v2 }
 0x69a   : > { %v5675_v10 = vperm.slane %v5671_v62, %v10593_v0 }
 0x69b   : > { %v5534_v37 = vadd.f32 %v5533_v40, %v5532_v47  ;;  %v5690_v1 = vrot.slane %v5669_v33, 4 }
 0x69c   : > { %v5688_v17 = vrot.slane %v5675_v10, 4 }
 0x69d   : > { %v5691_v8 = vsel %vm775_vm8, %v5675_v10, %v5690_v1  ;;  %v5184_v43 = vpop.permute.xlu1 %5183  ;;  %v5536_v48 = vadd.f32 %v5535_v56, %v5534_v37  ;;  %v5741_v1 = vld [vmem:[%s10205_s3 + $0x18] sm:$0xff]  ;;  %v5740_v10 = vld [vmem:[%s10205_s3 + $0x10] sm:$0xff] }
 0x69e   : > { %v5318_v25 = vmul.f32 %v5184_v43, %v2750_v39  ;;  %v5689_v28 = vsel %vm775_vm8, %v5688_v17, %v5669_v33  ;;  %v5634_v38 = vpop.permute.xlu2 %5633  ;;  %v5699_v31 = vperm.slane %v5691_v8, %v10597_v27  ;;  %5761 = vmatpush.msrb.mxu3 %v5741_v1 }
 0x69f   : > { %v5590_v11 = vadd.f32 %v5582_v4, %v5536_v48  ;;  %v5660_v35 = vmul.f32 %v5634_v38, %v10035_v19  ;;  %v5695_v47 = vperm.slane %v5689_v28, %v10597_v27 }
 0x6a0   : > { %v5564_v34 = vsel %vm3087_vm9, %v5318_v25, 0.0  ;;  %v5718_v6 = vrot.slane %v5699_v31, 4  ;;  %5762 = vmatpush.msrb.mxu3 %v5740_v10 }
 0x6a1   : > { %v5565_v7 = vadd.f32 %v5564_v34, %v5563_v45  ;;  %v5714_v18 = vrot.slane %v5695_v47, 4 }
 0x6a5   : > { %v5191_v24 = vpop.permute.xlu1 %5190 }
 0x6a6   : > { %v5319_v44 = vmul.f32 %v5191_v24, %v2758_v61 }
 0x6a8   : > { %v5566_v21 = vsel %vm3087_vm9, %v5319_v44, 0.0 }
 0x6a9   : > { %v5567_v59 = vadd.f32 %v5566_v21, %v5565_v7 }
 0x6ab   : > { %v5591_v9 = vadd.f32 %v5583_v51, %v5567_v59 }
 0x6ad   : > { %v5648_v36 = vpop.permute.xlu1 %5647 }
 0x6ae   : > { %v5662_v32 = vmul.f32 %v5648_v36, %v5590_v11 }
 0x6b0   : > { %v5676_v29 = vrot.slane %v5662_v32, 4 }
 0x6b2   : > { %v5677_v57 = vsel %vm775_vm8, %v5676_v29, %v5660_v35 }
 0x6b3   : > { %v5681_v63 = vperm.slane %v5677_v57, %v10593_v0 }
 0x6b5   : > { %v5655_v54 = vpop.permute.xlu1 %5654  ;;  %v5702_v3 = vrot.slane %v5681_v63, 4 }
 0x6b6   : > { %v5663_v22 = vmul.f32 %v5655_v54, %v5591_v9 }
 0x6b8   : > { %v5682_v2 = vrot.slane %v5663_v22, 4 }
 0x6bd   : > { %v5641_v52 = vpop.permute.xlu1 %5640 }
 0x6be   : > { %v5661_v42 = vmul.f32 %v5641_v52, %v5589_v49  ;;  %v5947_v49 = vld [vmem:[%s10209_s7] ss:$0 sm:$0xff] }
 0x6c0   : > { %v5683_v13 = vsel %vm775_vm8, %v5682_v2, %v5661_v42 }
 0x6c1   : > { %v5687_v30 = vperm.slane %v5683_v13, %v10593_v0 }
 0x6c3   : > { %v5700_v19 = vrot.slane %v5687_v30, 4  ;;  %v5703_v33 = vsel %vm775_vm8, %v5687_v30, %v5702_v3 }
 0x6c4   : > { %v5711_v62 = vperm.slane %v5703_v33, %v10597_v27 }
 0x6c5   : > { %v5701_v20 = vsel %vm775_vm8, %v5700_v19, %v5681_v63 }
 0x6c6   : > { %v5719_v60 = vsel %vm775_vm8, %v5711_v62, %v5718_v6  ;;  %v5716_v40 = vrot.slane %v5711_v62, 4  ;;  %v5707_v55 = vperm.slane %v5701_v20, %v10597_v27  ;;  %v5739_v27 = vld [vmem:[%s10205_s3 + $0x8] sm:$0xff] }
 0x6c7   : > { %5729 = vrot.lane.b32.xlu1 %v5719_v60, %s6083_s21  ;;  %5763 = vmatpush.msrb.mxu3 %v5739_v27  ;;  %s5872_s21 = sshll.u32 %s6152_s9, 3 }
 0x6c8   : > { %v5717_v0 = vsel %vm775_vm8, %v5716_v40, %v5699_v31  ;;  %v5715_v37 = vsel %vm775_vm8, %v5707_v55, %v5714_v18  ;;  %v5712_v4 = vrot.slane %v5707_v55, 4  ;;  %s5781_s24 = scalar_lea.hbm %s10210_s8, %s5872_s21 }
 0x6c9   : > { %5725 = vrot.lane.b32.xlu0 %v5717_v0, %s6084_s22  ;;  %5721 = vrot.lane.b32.xlu2 %v5715_v37, %s6085_s23  ;;  %s5785_s19 = sshll.u32 %s5781_s24, 4  ;;  %s6032_s23 = scalar_lea.hbm %s10210_s8, 16  ;;  %s5786_s19 = int_to_ptr.hbm [resolvable:$true] %s5785_s19 }
 0x6ca   : > { %5764 = vmatpush.msrb.mxu3 %v5738_v53  ;;  %v5713_v56 = vsel %vm775_vm8, %v5712_v4, %v5695_v47  ;;  %s6026_s25 = sshra.s32 %s5786_s19, 4  ;;  %s6027_s25 = int_to_ptr.hbm [resolvable:$true] %s6026_s25 }
 0x6cb   : > { %s6028_s9 = scalar_lea.hbm %s6027_s25, 8  ;;  %p6033_p0 = scmp.lt.s32.totalorder %s6027_s25, %s10210_s8 }
 0x6cc   : > { %p6029_p11 = scmp.ne.s32.totalorder %s6027_s25, %s6028_s9  ;;  %p6034_p1 = scmp.lt.s32.totalorder %s6032_s23, %s6028_s9 }
 0x6ce   : > { %p6030_p12 = pnand %p6029_p11, %p6169_p5  ;;  %p6035_p2 = por %p6034_p1, %p6033_p0 }
 0x6d0   : > { %p6031_p13 = pneg %p6030_p12 }
 0x6d2   : > { %p6036_p3 = pnand %p6035_p2, %p6031_p13 }
 0x723   : > { %v5722_v26 = vpop.permute.xlu2 %5721 }
 0x724   : > { %v5733_v39 = vsel %vm5732_vm11, %v5713_v56, %v5722_v26 }
 0x739   : > { %v5730_v8 = vpop.permute.xlu1 %5729 }
 0x73b   : > { %v5726_v5 = vpop.permute.xlu0 %5725 }
 0x73c   : > { %v5735_v43 = vsel %vm5734_vm12, %v5733_v39, %v5726_v5 }
 0x73d   : > { %v5737_v48 = vsel %vm5736_vm13, %v5735_v43, %v5730_v8 }
 0x73e   : > { %5870 = vmatmul.msk.f32.vlgmr.msrb.gmra.mxu3 %vm326_vm0, %v5737_v48 }
 0x7c1   : > { %v5766_v16 = vpop.f32.mrf.mxu3 }
 0x7c2   : > { %v5767_v11 = vadd.f32 %v5947_v49, %v5766_v16 }
 0x7c4   : > { %5769 = vst [vmem:[%s299_s17] sm:$0xff] %v5767_v11 }
 0x7c5   : > { %6039 = shalt.err (!%p6036_p3)
}
 0x7c6   : > { %5887 = dma.vmem_to_hbm [thread:$0]  (%p6169_p5), %s5784_s18, 128, %s5786_s19, %s5771_s20  }
 0x7c7 PF: > { %p5893_p4 = scmp.ge.s32.totalorder %s6074_s30, 2  ;;  %s5797_s26 = sand.u32 1, %s6062_s27  }
 0x7c8   : > { %s5798_s24 = scalar_lea.sflag [#allocation3], %s5797_s26 }
 0x7c9   : > { %p5890_p7 = pnand %p5893_p4, %p6173_p6 }
 0x7cb   : > { %p5891_p8 = pneg %p5890_p7 }
 0x7cd   : > { %6057 = dma.done.wait (%p5891_p8), %s5798_s24, 128  }
 0x7ce   : > { %6059 = vsyncadd (%p5891_p8), %s5798_s24, 4294967168  ;;  %p18_p9 = scmp.ge.s32.totalorder %s6156_s11, 4   ;;  %s10699_s27 = smov %s6066_s28 }
 0x7cf   : > { %s10700_s28 = smov %s6070_s29  ;;  %s10701_s29 = smov %s6167_s14 }
 0x7d0   : > { %s10702_s30 = smov %s6156_s11  ;;  %20 = sbr.rel (!%p18_p9) target bundleno = 3 (0x3), region = 87 }
 0x7d5   :  { %5804 = vsyncpa [#allocation3], 1 }
 0x7d6   :  { %5806 = vsyncpa [#allocation3 + $0x1], 1 }

</bundles_post_ra>
